<compile_context>
chip_gen: v6e
topology: v6e:2x2x1
jax: 0.10.0
libtpu: 0.0.40
codegen_flags: <defaults>
</compile_context>

<pallas_src>
import math
import functools

import jax
import jax.numpy as jnp
from jax import lax
from jax.experimental import pallas as pl
from jax.experimental.pallas import tpu as pltpu


# ----------------------------------------------------------------------------
# Pallas kernels
# ----------------------------------------------------------------------------

def _gemm_bias_relu_kernel(x_ref, w_ref, b_ref, o_ref):
    """One M-tile of relu(X @ W + b).  X:(tm,K)  W:(K,N)  b:(1,N)  O:(tm,N)."""
    acc = jnp.dot(x_ref[...], w_ref[...], preferred_element_type=jnp.float32)
    o_ref[...] = jnp.maximum(acc + b_ref[...], 0.0).astype(o_ref.dtype)


def gemm_bias_relu(x, w, b, *, tm=128):
    """relu(x @ w + b) with batch*spatial folded into M; M tiled on a parallel grid."""
    M, K = x.shape
    N = w.shape[1]
    Mp = ((M + tm - 1) // tm) * tm
    if Mp != M:
        x = jnp.pad(x, ((0, Mp - M), (0, 0)))
    out = pl.pallas_call(
        _gemm_bias_relu_kernel,
        out_shape=jax.ShapeDtypeStruct((Mp, N), jnp.float32),
        grid=(Mp // tm,),
        in_specs=[
            pl.BlockSpec((tm, K), lambda i: (i, 0)),
            pl.BlockSpec((K, N), lambda i: (0, 0)),
            pl.BlockSpec((1, N), lambda i: (0, 0)),
        ],
        out_specs=pl.BlockSpec((tm, N), lambda i: (i, 0)),
        compiler_params=pltpu.CompilerParams(dimension_semantics=("parallel",)),
    )(x, w, b)
    return out[:M]


def _head_kernel(num_fm, a_ref, w5_ref, b5_ref, noise_ref, tmpl_ref, o_ref):
    """Fused PCAE head for one batch element.

    a_ref    : (1, S, C)  conv4 activations (S = spatial positions of the final map)
    w5_ref   : (K, C, F)  1x1-conv weights, rearranged per capsule
    b5_ref   : (K, 1, F)
    noise_ref: (1, K, 1)  presence noise (uniform(-2,2) in 'train' mode)
    tmpl_ref : (K, T*T)   flattened templates
    o_ref    : (1, K, 1 + 6 + T*T + (F-8))   ->  [d_m | x_m | template | c_z]
    """
    F = num_fm
    a = a_ref[0]                                     # (S, C)
    w5 = w5_ref[...]                                 # (K, C, F)
    K = w5.shape[0]
    S, C = a.shape

    # 1x1 conv for all capsules at once (batched over the capsule axis; no per-capsule
    # Python loop / lane concat).
    ab = jnp.broadcast_to(a[None, :, :], (K, S, C))
    y = jnp.einsum("ksc,kcf->ksf", ab, w5,
                   preferred_element_type=jnp.float32) + b5_ref[...]    # (K, S, F)

    # Attention map = last feature map; softmax over the CAPSULE axis
    # (the PyTorch module applies nn.Softmax(1) to a (B, K, 1, H*W) view).
    att = y[:, :, F - 1:F]                           # (K, S, 1)
    att = att - jnp.max(att, axis=0, keepdims=True)
    p = jnp.exp(att)
    att_soft = p * pl.reciprocal(jnp.sum(p, axis=0, keepdims=True))     # (K, S, 1)

    # Attention-weighted spatial pooling of the remaining F-1 feature maps.
    part = jnp.sum(y[:, :, :F - 1] * att_soft, axis=1)                  # (K, F-1)

    x_m = jnp.maximum(part[:, 0:6], 0.0)                                # (K, 6)
    z = part[:, 6:7] + noise_ref[0]                                     # (K, 1)
    d_m = 1.0 / (1.0 + jnp.exp(-z))                                     # sigmoid
    c_z = jnp.maximum(part[:, 7:], 0.0)                                 # (K, F-8)

    out = jnp.concatenate([d_m, x_m, tmpl_ref[...], c_z], axis=-1)      # (K, 144)
    o_ref[0] = out.astype(o_ref.dtype)


def pcae_head(a4, w5r, b5r, noise, templates_flat, *, num_fm):
    B, S, C = a4.shape
    K = w5r.shape[0]
    TT = templates_flat.shape[1]
    d_out = 1 + 6 + TT + (num_fm - 8)
    return pl.pallas_call(
        functools.partial(_head_kernel, num_fm),
        out_shape=jax.ShapeDtypeStruct((B, K, d_out), jnp.float32),
        grid=(B,),
        in_specs=[
            pl.BlockSpec((1, S, C), lambda b: (b, 0, 0)),
            pl.BlockSpec((K, C, num_fm), lambda b: (0, 0, 0)),
            pl.BlockSpec((K, 1, num_fm), lambda b: (0, 0, 0)),
            pl.BlockSpec((1, K, 1), lambda b: (b, 0, 0)),
            pl.BlockSpec((K, TT), lambda b: (0, 0)),
        ],
        out_specs=pl.BlockSpec((1, K, d_out), lambda b: (b, 0, 0)),
        compiler_params=pltpu.CompilerParams(dimension_semantics=("parallel",)),
    )(a4, w5r, b5r, noise, templates_flat)


# ----------------------------------------------------------------------------
# Wrapper (layout plumbing only: im2col, weight rearrangement, reshapes)
# ----------------------------------------------------------------------------

def _im2col(x_nhwc, ksize, stride):
    """Valid (ksize x ksize) patches -> (B*OH*OW, ksize*ksize*C)."""
    B, H, W, C = x_nhwc.shape
    OH = (H - ksize) // stride + 1
    OW = (W - ksize) // stride + 1
    cols = []
    for ky in range(ksize):
        for kx in range(ksize):
            cols.append(x_nhwc[:, ky:ky + stride * (OH - 1) + 1:stride,
                                  kx:kx + stride * (OW - 1) + 1:stride, :])
    patches = jnp.concatenate(cols, axis=-1)           # (B, OH, OW, k*k*C)
    return patches.reshape(B * OH * OW, ksize * ksize * C), OH, OW


def pcae_forward(x, params, noise, *, num_capsules, num_feature_maps):
    """PCAE.forward(x, attribution=True) -> input_ocae.view(B, -1)."""
    B = x.shape[0]
    K, F = num_capsules, num_feature_maps

    h = jnp.transpose(x, (0, 2, 3, 1)).astype(jnp.float32)     # NHWC

    # Capsule CNN: 4 x (3x3 conv + ReLU) = im2col + fused Pallas GEMM per layer.
    for name, stride in (("conv1", 2), ("conv2", 2), ("conv3", 1), ("conv4", 1)):
        w = params[name + "_w"]                                # (Cout, Cin, 3, 3)
        b = params[name + "_b"]                                # (Cout,)
        cout = w.shape[0]
        wmat = jnp.transpose(w, (2, 3, 1, 0)).reshape(-1, cout)  # (9*Cin, Cout)
        patches, OH, OW = _im2col(h, 3, stride)
        y = gemm_bias_relu(patches, wmat, b.reshape(1, cout))
        h = y.reshape(B, OH, OW, cout)

    S = h.shape[1] * h.shape[2]
    C = h.shape[3]
    a4 = h.reshape(B, S, C)

    # Final 1x1 conv (output channel c*F + f) rearranged per capsule.
    w5 = params["conv5_w"].reshape(K * F, C)
    w5r = jnp.transpose(w5.reshape(K, F, C), (0, 2, 1))        # (K, C, F)
    b5r = params["conv5_b"].reshape(K, 1, F)
    templates_flat = params["templates"].reshape(K, -1)

    out = pcae_head(a4, w5r, b5r, noise.reshape(B, K, 1), templates_flat, num_fm=F)
    # TODO(synk): the template-transform branch (geometric_transform + affine_grid +
    # grid_sample) and the Gaussian-mixture log-likelihood are only used when
    # attribution=False; grid_sample (data-dependent bilinear gather) has no clean
    # Pallas equivalent and is not implemented here.
    return out.reshape(B, -1)


# ----------------------------------------------------------------------------
# Pure-JAX reference mirroring the PyTorch forward (attribution=True)
# ----------------------------------------------------------------------------

def pcae_reference(x, params, noise, *, num_capsules, num_feature_maps):
    K, F = num_capsules, num_feature_maps
    h = x
    for name, stride in (("conv1", 2), ("conv2", 2), ("conv3", 1), ("conv4", 1)):
        h = lax.conv_general_dilated(
            h, params[name + "_w"], (stride, stride), "VALID",
            dimension_numbers=("NCHW", "OIHW", "NCHW"),
            precision=lax.Precision.HIGHEST)
        h = jax.nn.relu(h + params[name + "_b"].reshape(1, -1, 1, 1))
    h = lax.conv_general_dilated(
        h, params["conv5_w"], (1, 1), "VALID",
        dimension_numbers=("NCHW", "OIHW", "NCHW"),
        precision=lax.Precision.HIGHEST)
    h = h + params["conv5_b"].reshape(1, -1, 1, 1)

    B, _, H, W = h.shape
    outputs = h.reshape(B, K, F, H, W)
    attention = outputs[:, :, -1:, :, :]                       # (B, K, 1, H, W)
    att_soft = jax.nn.softmax(attention.reshape(B, K, 1, H * W), axis=1)
    att_soft = att_soft.reshape(B, K, 1, H, W)
    feature_maps = outputs[:, :, :-1, :, :]
    part = jnp.sum(feature_maps * att_soft, axis=(-2, -1))     # (B, K, F-1)

    x_m = jax.nn.relu(part[:, :, :6])
    d_m = jax.nn.sigmoid(part[:, :, 6] + noise)[..., None]
    c_z = jax.nn.relu(part[:, :, 7:])
    TT = params["templates"].shape[1] * params["templates"].shape[2]
    templ_b = jnp.broadcast_to(params["templates"].reshape(K, TT)[None], (B, K, TT))
    input_ocae = jnp.concatenate([d_m, x_m, templ_b, c_z], axis=-1)
    return input_ocae.reshape(B, -1)


# ----------------------------------------------------------------------------
# Parameters & demo
# ----------------------------------------------------------------------------

def make_params(key, *, num_capsules, num_feature_maps, template_size, conv_width=128):
    K, F = num_capsules, num_feature_maps
    ks = jax.random.split(key, 11)

    def conv(kw, kb, cout, cin, ksz):
        bound = 1.0 / math.sqrt(cin * ksz * ksz)
        w = jax.random.uniform(kw, (cout, cin, ksz, ksz), jnp.float32, -bound, bound)
        b = jax.random.uniform(kb, (cout,), jnp.float32, -bound, bound)
        return w, b

    p = {}
    p["conv1_w"], p["conv1_b"] = conv(ks[0], ks[1], conv_width, 1, 3)
    p["conv2_w"], p["conv2_b"] = conv(ks[2], ks[3], conv_width, conv_width, 3)
    p["conv3_w"], p["conv3_b"] = conv(ks[4], ks[5], conv_width, conv_width, 3)
    p["conv4_w"], p["conv4_b"] = conv(ks[6], ks[7], conv_width, conv_width, 3)
    p["conv5_w"], p["conv5_b"] = conv(ks[8], ks[9], K * F, conv_width, 1)
    p["templates"] = jax.random.normal(
        ks[10], (K, template_size, template_size), jnp.float32)
    return p


if __name__ == "__main__":
    B, H = 2, 28                      # MNIST-sized input (the conv stack needs >= 23)
    num_capsules, num_feature_maps, template_size = 24, 24, 11

    key = jax.random.PRNGKey(0)
    k_params, k_x, k_noise = jax.random.split(key, 3)
    params = make_params(k_params, num_capsules=num_capsules,
                         num_feature_maps=num_feature_maps,
                         template_size=template_size)
    x = jax.random.normal(k_x, (B, 1, H, H), jnp.float32)
    # 'train'-mode presence noise (PyTorch uses uniform(-2, 2)); generated
    # deterministically here and shared by the kernel path and the reference.
    noise = jax.random.uniform(k_noise, (B, num_capsules), jnp.float32, -2.0, 2.0)

    fwd = jax.jit(functools.partial(pcae_forward, num_capsules=num_capsules,
                                    num_feature_maps=num_feature_maps))
    out = jax.block_until_ready(fwd(x, params, noise))

    ref = pcae_reference(x, params, noise, num_capsules=num_capsules,
                         num_feature_maps=num_feature_maps)
    expected_dim = num_capsules * (1 + 6 + template_size * template_size
                                   + (num_feature_maps - 8))
    assert out.shape == (B, expected_dim), out.shape
    assert jnp.allclose(out, ref, atol=2e-3, rtol=2e-3), \
        float(jnp.max(jnp.abs(out - ref)))

    print("KERNEL_OK")
</pallas_src>

<mosaic_0001>
module attributes {stable_mosaic.version = 11 : i64} {
  func.func @_gemm_bias_relu_kernel(%arg0: i32, %arg1: memref<128x9xf32, #tpu.memory_space<vmem>>, %arg2: memref<9x128xf32, #tpu.memory_space<vmem>>, %arg3: memref<1x128xf32, #tpu.memory_space<vmem>>, %arg4: memref<128x128xf32, #tpu.memory_space<vmem>>) attributes {dimension_semantics = [#tpu.dimension_semantics<parallel>], iteration_bounds = array<i64: 3>, scalar_prefetch = 0 : i64, scratch_operands = 0 : i64, tpu.core_type = #tpu.core_type<tc>, window_params = [{transform_indices = @transform_0, window_bounds = array<i64: 128, 9>}, {pipeline_mode = #tpu.pipeline_mode<synchronous>, transform_indices = @transform_1, window_bounds = array<i64: 9, 128>}, {pipeline_mode = #tpu.pipeline_mode<synchronous>, transform_indices = @transform_2, window_bounds = array<i64: 1, 128>}, {transform_indices = @transform_3, window_bounds = array<i64: 128, 128>}]} {
    %c0 = arith.constant 0 : index
    %c0_0 = arith.constant 0 : index
    %0 = vector.load %arg1[%c0, %c0_0] : memref<128x9xf32, #tpu.memory_space<vmem>>, vector<128x9xf32>
    %c0_1 = arith.constant 0 : index
    %c0_2 = arith.constant 0 : index
    %1 = vector.load %arg2[%c0_1, %c0_2] : memref<9x128xf32, #tpu.memory_space<vmem>>, vector<9x128xf32>
    %cst = arith.constant dense<0.000000e+00> : vector<128x128xf32>
    %2 = tpu.matmul %0, %1, %cst {dimension_numbers = #tpu.dot_dimension_numbers<[1], [0], [0], [1], [0, 0, 1, 1], [], []>} : vector<128x9xf32>, vector<9x128xf32>, vector<128x128xf32> -> vector<128x128xf32>
    %c0_3 = arith.constant 0 : index
    %c0_4 = arith.constant 0 : index
    %3 = vector.load %arg3[%c0_3, %c0_4] : memref<1x128xf32, #tpu.memory_space<vmem>>, vector<1x128xf32>
    %4 = vector.broadcast %3 : vector<1x128xf32> to vector<128x128xf32>
    %5 = arith.addf %2, %4 : vector<128x128xf32>
    %cst_5 = arith.constant 0.000000e+00 : f32
    %6 = vector.broadcast %cst_5 : f32 to vector<128x128xf32>
    %7 = arith.maximumf %5, %6 : vector<128x128xf32>
    %c0_6 = arith.constant 0 : index
    %c0_7 = arith.constant 0 : index
    %8 = vector.load %arg4[%c0_6, %c0_7] : memref<128x128xf32, #tpu.memory_space<vmem>>, vector<128x128xf32>
    tpu.vector_store %arg4[%c0_6, %c0_7], %7 {strides = array<i32>} : memref<128x128xf32, #tpu.memory_space<vmem>>, vector<128x128xf32>,
    return
  }
  func.func @transform_0(%arg0: i32) -> (i32, i32) {
    %c0_i32 = arith.constant 0 : i32
    %c0_i32_0 = arith.constant 0 : i32
    return %arg0, %c0_i32 : i32, i32
  }
  func.func @transform_1(%arg0: i32) -> (i32, i32) {
    %c0_i32 = arith.constant 0 : i32
    %c0_i32_0 = arith.constant 0 : i32
    %c0_i32_1 = arith.constant 0 : i32
    return %c0_i32, %c0_i32_0 : i32, i32
  }
  func.func @transform_2(%arg0: i32) -> (i32, i32) {
    %c0_i32 = arith.constant 0 : i32
    %c0_i32_0 = arith.constant 0 : i32
    %c0_i32_1 = arith.constant 0 : i32
    return %c0_i32, %c0_i32_0 : i32, i32
  }
  func.func @transform_3(%arg0: i32) -> (i32, i32) {
    %c0_i32 = arith.constant 0 : i32
    %c0_i32_0 = arith.constant 0 : i32
    return %arg0, %c0_i32 : i32, i32
  }
}

module attributes {stable_mosaic.version = 11 : i64} {
  func.func @_gemm_bias_relu_kernel(%arg0: i32, %arg1: memref<128x1152xf32, #tpu.memory_space<vmem>>, %arg2: memref<1152x128xf32, #tpu.memory_space<vmem>>, %arg3: memref<1x128xf32, #tpu.memory_space<vmem>>, %arg4: memref<128x128xf32, #tpu.memory_space<vmem>>) attributes {dimension_semantics = [#tpu.dimension_semantics<parallel>], iteration_bounds = array<i64: 1>, scalar_prefetch = 0 : i64, scratch_operands = 0 : i64, tpu.core_type = #tpu.core_type<tc>, window_params = [{transform_indices = @transform_0, window_bounds = array<i64: 128, 1152>}, {pipeline_mode = #tpu.pipeline_mode<synchronous>, transform_indices = @transform_1, window_bounds = array<i64: 1152, 128>}, {pipeline_mode = #tpu.pipeline_mode<synchronous>, transform_indices = @transform_2, window_bounds = array<i64: 1, 128>}, {transform_indices = @transform_3, window_bounds = array<i64: 128, 128>}]} {
    %c0 = arith.constant 0 : index
    %c0_0 = arith.constant 0 : index
    %0 = vector.load %arg1[%c0, %c0_0] : memref<128x1152xf32, #tpu.memory_space<vmem>>, vector<128x1152xf32>
    %c0_1 = arith.constant 0 : index
    %c0_2 = arith.constant 0 : index
    %1 = vector.load %arg2[%c0_1, %c0_2] : memref<1152x128xf32, #tpu.memory_space<vmem>>, vector<1152x128xf32>
    %cst = arith.constant dense<0.000000e+00> : vector<128x128xf32>
    %2 = tpu.matmul %0, %1, %cst {dimension_numbers = #tpu.dot_dimension_numbers<[1], [0], [0], [1], [0, 0, 1, 1], [], []>} : vector<128x1152xf32>, vector<1152x128xf32>, vector<128x128xf32> -> vector<128x128xf32>
    %c0_3 = arith.constant 0 : index
    %c0_4 = arith.constant 0 : index
    %3 = vector.load %arg3[%c0_3, %c0_4] : memref<1x128xf32, #tpu.memory_space<vmem>>, vector<1x128xf32>
    %4 = vector.broadcast %3 : vector<1x128xf32> to vector<128x128xf32>
    %5 = arith.addf %2, %4 : vector<128x128xf32>
    %cst_5 = arith.constant 0.000000e+00 : f32
    %6 = vector.broadcast %cst_5 : f32 to vector<128x128xf32>
    %7 = arith.maximumf %5, %6 : vector<128x128xf32>
    %c0_6 = arith.constant 0 : index
    %c0_7 = arith.constant 0 : index
    %8 = vector.load %arg4[%c0_6, %c0_7] : memref<128x128xf32, #tpu.memory_space<vmem>>, vector<128x128xf32>
    tpu.vector_store %arg4[%c0_6, %c0_7], %7 {strides = array<i32>} : memref<128x128xf32, #tpu.memory_space<vmem>>, vector<128x128xf32>,
    return
  }
  func.func @transform_0(%arg0: i32) -> (i32, i32) {
    %c0_i32 = arith.constant 0 : i32
    %c0_i32_0 = arith.constant 0 : i32
    return %arg0, %c0_i32 : i32, i32
  }
  func.func @transform_1(%arg0: i32) -> (i32, i32) {
    %c0_i32 = arith.constant 0 : i32
    %c0_i32_0 = arith.constant 0 : i32
    %c0_i32_1 = arith.constant 0 : i32
    return %c0_i32, %c0_i32_0 : i32, i32
  }
  func.func @transform_2(%arg0: i32) -> (i32, i32) {
    %c0_i32 = arith.constant 0 : i32
    %c0_i32_0 = arith.constant 0 : i32
    %c0_i32_1 = arith.constant 0 : i32
    return %c0_i32, %c0_i32_0 : i32, i32
  }
  func.func @transform_3(%arg0: i32) -> (i32, i32) {
    %c0_i32 = arith.constant 0 : i32
    %c0_i32_0 = arith.constant 0 : i32
    return %arg0, %c0_i32 : i32, i32
  }
}

module attributes {stable_mosaic.version = 11 : i64} {
  func.func @_head_kernel(%arg0: i32, %arg1: memref<1x4x128xf32, #tpu.memory_space<vmem>>, %arg2: memref<24x128x24xf32, #tpu.memory_space<vmem>>, %arg3: memref<24x1x24xf32, #tpu.memory_space<vmem>>, %arg4: memref<1x24x1xf32, #tpu.memory_space<vmem>>, %arg5: memref<24x121xf32, #tpu.memory_space<vmem>>, %arg6: memref<1x24x144xf32, #tpu.memory_space<vmem>>) attributes {dimension_semantics = [#tpu.dimension_semantics<parallel>], iteration_bounds = array<i64: 2>, scalar_prefetch = 0 : i64, scratch_operands = 0 : i64, tpu.core_type = #tpu.core_type<tc>, window_params = [{transform_indices = @transform_0, window_bounds = array<i64: 1, 4, 128>}, {pipeline_mode = #tpu.pipeline_mode<synchronous>, transform_indices = @transform_1, window_bounds = array<i64: 24, 128, 24>}, {pipeline_mode = #tpu.pipeline_mode<synchronous>, transform_indices = @transform_2, window_bounds = array<i64: 24, 1, 24>}, {transform_indices = @transform_3, window_bounds = array<i64: 1, 24, 1>}, {pipeline_mode = #tpu.pipeline_mode<synchronous>, transform_indices = @transform_4, window_bounds = array<i64: 24, 121>}, {transform_indices = @transform_5, window_bounds = array<i64: 1, 24, 144>}]} {
    %c0 = arith.constant 0 : index
    %c0_0 = arith.constant 0 : index
    %c0_1 = arith.constant 0 : index
    %0 = vector.load %arg1[%c0, %c0_0, %c0_1] : memref<1x4x128xf32, #tpu.memory_space<vmem>>, vector<1x4x128xf32>
    %1 = vector.shape_cast %0 : vector<1x4x128xf32> to vector<4x128xf32>
    %c0_2 = arith.constant 0 : index
    %c0_3 = arith.constant 0 : index
    %c0_4 = arith.constant 0 : index
    %2 = vector.load %arg2[%c0_2, %c0_3, %c0_4] : memref<24x128x24xf32, #tpu.memory_space<vmem>>, vector<24x128x24xf32>
    %3 = vector.shape_cast %1 : vector<4x128xf32> to vector<1x4x128xf32>
    %4 = vector.shape_cast %3 : vector<1x4x128xf32> to vector<1x4x128xf32>
    %5 = vector.broadcast %4 : vector<1x4x128xf32> to vector<24x4x128xf32>
    "tpu.trace_start"() <{level = 10 : i32, message = "ksc,kcf->ksf"}> : () -> ()
    %cst = arith.constant dense<0.000000e+00> : vector<24x4x24xf32>
    %6 = tpu.matmul %5, %2, %cst {dimension_numbers = #tpu.dot_dimension_numbers<[2], [1], [1], [2], [0, 0, 0, 1, 1, 2], [0], [0]>} : vector<24x4x128xf32>, vector<24x128x24xf32>, vector<24x4x24xf32> -> vector<24x4x24xf32>
    "tpu.trace_stop"() : () -> ()
    %c0_5 = arith.constant 0 : index
    %c0_6 = arith.constant 0 : index
    %c0_7 = arith.constant 0 : index
    %7 = vector.load %arg3[%c0_5, %c0_6, %c0_7] : memref<24x1x24xf32, #tpu.memory_space<vmem>>, vector<24x1x24xf32>
    %8 = vector.broadcast %7 : vector<24x1x24xf32> to vector<24x4x24xf32>
    %9 = arith.addf %6, %8 : vector<24x4x24xf32>
    %10 = vector.extract_strided_slice %9 {offsets = [0, 0, 23], sizes = [24, 4, 1], strides = [1, 1, 1]} : vector<24x4x24xf32> to vector<24x4x1xf32>
    %cst_8 = arith.constant dense<0xFF800000> : vector<4x1xf32>
    %11 = vector.multi_reduction <maximumf>, %10, %cst_8 [0] : vector<24x4x1xf32> to vector<4x1xf32>
    %12 = vector.shape_cast %11 : vector<4x1xf32> to vector<1x4x1xf32>
    %13 = vector.broadcast %12 : vector<1x4x1xf32> to vector<24x4x1xf32>
    %14 = arith.subf %10, %13 : vector<24x4x1xf32>
    %15 = math.exp %14 : vector<24x4x1xf32>
    %cst_9 = arith.constant dense<0.000000e+00> : vector<4x1xf32>
    %16 = vector.multi_reduction <add>, %15, %cst_9 [0] : vector<24x4x1xf32> to vector<4x1xf32>
    %17 = vector.shape_cast %16 : vector<4x1xf32> to vector<1x4x1xf32>
    %18 = tpu.reciprocal %17 : vector<1x4x1xf32> -> vector<1x4x1xf32>
    %19 = vector.broadcast %18 : vector<1x4x1xf32> to vector<24x4x1xf32>
    %20 = arith.mulf %15, %19 : vector<24x4x1xf32>
    %21 = vector.extract_strided_slice %9 {offsets = [0, 0, 0], sizes = [24, 4, 23], strides = [1, 1, 1]} : vector<24x4x24xf32> to vector<24x4x23xf32>
    %22 = vector.broadcast %20 : vector<24x4x1xf32> to vector<24x4x23xf32>
    %23 = arith.mulf %21, %22 : vector<24x4x23xf32>
    %cst_10 = arith.constant dense<0.000000e+00> : vector<24x23xf32>
    %24 = vector.multi_reduction <add>, %23, %cst_10 [1] : vector<24x4x23xf32> to vector<24x23xf32>
    %25 = vector.extract_strided_slice %24 {offsets = [0, 0], sizes = [24, 6], strides = [1, 1]} : vector<24x23xf32> to vector<24x6xf32>
    %cst_11 = arith.constant 0.000000e+00 : f32
    %26 = vector.broadcast %cst_11 : f32 to vector<24x6xf32>
    %27 = arith.maximumf %25, %26 : vector<24x6xf32>
    %28 = vector.extract_strided_slice %24 {offsets = [0, 6], sizes = [24, 1], strides = [1, 1]} : vector<24x23xf32> to vector<24x1xf32>
    %c0_12 = arith.constant 0 : index
    %c0_13 = arith.constant 0 : index
    %c0_14 = arith.constant 0 : index
    %29 = vector.load %arg4[%c0_12, %c0_13, %c0_14] : memref<1x24x1xf32, #tpu.memory_space<vmem>>, vector<1x24x1xf32>
    %30 = vector.shape_cast %29 : vector<1x24x1xf32> to vector<24x1xf32>
    %31 = arith.addf %28, %30 : vector<24x1xf32>
    %cst_15 = arith.constant 0.000000e+00 : f32
    %32 = vector.broadcast %cst_15 : f32 to vector<24x1xf32>
    %33 = arith.subf %32, %31 : vector<24x1xf32>
    %34 = math.exp %33 : vector<24x1xf32>
    %cst_16 = arith.constant 1.000000e+00 : f32
    %35 = vector.broadcast %cst_16 : f32 to vector<24x1xf32>
    %36 = arith.addf %35, %34 : vector<24x1xf32>
    %cst_17 = arith.constant 1.000000e+00 : f32
    %37 = vector.broadcast %cst_17 : f32 to vector<24x1xf32>
    %38 = arith.divf %37, %36 : vector<24x1xf32>
    %39 = vector.extract_strided_slice %24 {offsets = [0, 7], sizes = [24, 16], strides = [1, 1]} : vector<24x23xf32> to vector<24x16xf32>
    %cst_18 = arith.constant 0.000000e+00 : f32
    %40 = vector.broadcast %cst_18 : f32 to vector<24x16xf32>
    %41 = arith.maximumf %39, %40 : vector<24x16xf32>
    %c0_19 = arith.constant 0 : index
    %c0_20 = arith.constant 0 : index
    %42 = vector.load %arg5[%c0_19, %c0_20] : memref<24x121xf32, #tpu.memory_space<vmem>>, vector<24x121xf32>
    %43 = tpu.concatenate %38, %27, %42, %41 in 1 : vector<24x1xf32>, vector<24x6xf32>, vector<24x121xf32>, vector<24x16xf32> -> vector<24x144xf32>
    %c0_21 = arith.constant 0 : index
    %c0_22 = arith.constant 0 : index
    %c0_23 = arith.constant 0 : index
    %44 = vector.load %arg6[%c0_21, %c0_22, %c0_23] : memref<1x24x144xf32, #tpu.memory_space<vmem>>, vector<1x24x144xf32>
    %45 = vector.shape_cast %44 : vector<1x24x144xf32> to vector<24x144xf32>
    %46 = vector.shape_cast %43 : vector<24x144xf32> to vector<1x24x144xf32>
    tpu.vector_store %arg6[%c0_21, %c0_22, %c0_23], %46 {strides = array<i32>} : memref<1x24x144xf32, #tpu.memory_space<vmem>>, vector<1x24x144xf32>,
    return
  }
  func.func @transform_0(%arg0: i32) -> (i32, i32, i32) {
    %c0_i32 = arith.constant 0 : i32
    %c0_i32_0 = arith.constant 0 : i32
    %c0_i32_1 = arith.constant 0 : i32
    return %arg0, %c0_i32, %c0_i32_0 : i32, i32, i32
  }
  func.func @transform_1(%arg0: i32) -> (i32, i32, i32) {
    %c0_i32 = arith.constant 0 : i32
    %c0_i32_0 = arith.constant 0 : i32
    %c0_i32_1 = arith.constant 0 : i32
    %c0_i32_2 = arith.constant 0 : i32
    return %c0_i32, %c0_i32_0, %c0_i32_1 : i32, i32, i32
  }
  func.func @transform_2(%arg0: i32) -> (i32, i32, i32) {
    %c0_i32 = arith.constant 0 : i32
    %c0_i32_0 = arith.constant 0 : i32
    %c0_i32_1 = arith.constant 0 : i32
    %c0_i32_2 = arith.constant 0 : i32
    return %c0_i32, %c0_i32_0, %c0_i32_1 : i32, i32, i32
  }
  func.func @transform_3(%arg0: i32) -> (i32, i32, i32) {
    %c0_i32 = arith.constant 0 : i32
    %c0_i32_0 = arith.constant 0 : i32
    %c0_i32_1 = arith.constant 0 : i32
    return %arg0, %c0_i32, %c0_i32_0 : i32, i32, i32
  }
  func.func @transform_4(%arg0: i32) -> (i32, i32) {
    %c0_i32 = arith.constant 0 : i32
    %c0_i32_0 = arith.constant 0 : i32
    %c0_i32_1 = arith.constant 0 : i32
    return %c0_i32, %c0_i32_0 : i32, i32
  }
  func.func @transform_5(%arg0: i32) -> (i32, i32, i32) {
    %c0_i32 = arith.constant 0 : i32
    %c0_i32_0 = arith.constant 0 : i32
    %c0_i32_1 = arith.constant 0 : i32
    return %arg0, %c0_i32, %c0_i32_0 : i32, i32, i32
  }
}

</mosaic_0001>

<bundles_post_ra>
// kernel: pcae_forward.5
= control target key start
LH: loop header
LB: loop body
LE: loop exit
PB: predicated region body
PF: predicated region fallthrough
CT: control target
= control target key end

     0   :  { %s600_s12 = smov 0   ;;  %s667_s0 = inlined_call_operand.vmem [shape: f32[384,9], index: 0, kind: input, shape index: {}]   ;;  %s668_s1 = inlined_call_operand.vmem [shape: f32[9,128], index: 1, kind: input, shape index: {}]   ;;  %s669_s2 = inlined_call_operand.vmem [shape: f32[1,128], index: 2, kind: input, shape index: {}]   ;;  %s670_s3 = inlined_call_operand.vmem [shape: f32[384,128], index: 3, kind: output, shape index: {}]  }
   0x1 LB: > { %s485_s13 = sadd.s32 4294967295, %s578_s12   ;;  %p489_p0 = scmp.ge.s32.totalorder %s578_s12, 1  ;;  %s578_s12 = sphi %s600_s12, %s13_s12  }
   0x2   : > { %p138_p1 = scmp.lt.s32.totalorder %s578_s12, 4 }
   0x4   : > { %p139_p2 = pnand %p489_p0, %p138_p1 }
   0x5   : > { %s490_s18 = sshll.u32 (!%p139_p2), %s485_s13, 4 }
   0x6   : > { %142 = sbr.rel (%p139_p2) target bundleno = 229 (0xe5), region = 32  ;;  %p163_p3 = scmp.lt.s32.totalorder (!%p139_p2), %s490_s18, 47 }
   0xb   : > { %v191_v0 = vld [vmem:[%s668_s1 + $0x8] sm:$0x1]  ;;  %vm248_vm0 = vcmask 1040384   ;;  %v190_v1 = vld [vmem:[%s668_s1] sm:$0xff]  ;;  %s672_s18 = smov (!%p163_p3, %s490_s18), 47  ;;  %vm199_vm1 = vcmask 72704  }
   0xc   : > { %532 = vmatprep.subr.msk.mxu0 %vm248_vm0, %v191_v0  ;;  %560 = vmatprep.subr.msk.mxu1 %vm248_vm0, %v191_v0  ;;  %s491_s19 = sshll.u32 %s672_s18, 3  ;;  %v494_v18 = vld [vmem:[%s669_s2] ss:$0 sm:$0xff] }
   0xd   : > { %533 = vmatpush3.msk.msra.mxu0 %vm248_vm0, %v191_v0  ;;  %562 = vmatpush3.msk.msra.mxu1 %vm248_vm0, %v191_v0  ;;  %s166_s22 = scalar_lea.vmem %s667_s0, %s491_s19  ;;  %s646_s27 = scalar_lea.vmem %s670_s3, %s491_s19 }
   0xe   : > { %534 = vmatprep.subr.mxu0 %v190_v1  ;;  %561 = vmatprep.subr.mxu1 %v190_v1  ;;  %v174_v2 = vld [vmem:[%s166_s22] sm:$0xff]  ;;  %v175_v4 = vld [vmem:[%s166_s22 + $0x8] sm:$0xff]  ;;  %v176_v6 = vld [vmem:[%s166_s22 + $0x10] sm:$0xff] }
   0xf   : > { %535 = vmatpush3.msra.mxu0 %v190_v1  ;;  %563 = vmatpush3.msra.mxu1 %v190_v1  ;;  %v182_v3 = vld [vmem:[%s166_s22 + $0x40] sm:$0xff]  ;;  %v183_v5 = vld [vmem:[%s166_s22 + $0x48] sm:$0xff]  ;;  %v184_v7 = vld [vmem:[%s166_s22 + $0x50] sm:$0xff] }
  0x10   : > { %536 = vmatprep.mubr.msk.f32.mxu0 %vm199_vm1, %v174_v2  ;;  %548 = vmatprep.mubr.msk.f32.mxu1 %vm199_vm1, %v182_v3  ;;  %v177_v8 = vld [vmem:[%s166_s22 + $0x18] sm:$0xff]  ;;  %v178_v10 = vld [vmem:[%s166_s22 + $0x20] sm:$0xff]  ;;  %v179_v12 = vld [vmem:[%s166_s22 + $0x28] sm:$0xff] }
  0x11   : > { %537 = vmatmul.mubr.msk.f32.vlgmr.msra.gmra.mxu0 %vm199_vm1, %v175_v4  ;;  %549 = vmatmul.mubr.msk.f32.vlgmr.msra.gmra.mxu1 %vm199_vm1, %v183_v5  ;;  %v185_v9 = vld [vmem:[%s166_s22 + $0x58] sm:$0xff]  ;;  %v186_v11 = vld [vmem:[%s166_s22 + $0x60] sm:$0xff]  ;;  %v187_v13 = vld [vmem:[%s166_s22 + $0x68] sm:$0xff] }
  0x12   : > { %539 = vmatprep.mubr.msk.f32.mxu0 %vm199_vm1, %v176_v6  ;;  %551 = vmatprep.mubr.msk.f32.mxu1 %vm199_vm1, %v184_v7  ;;  %v180_v14 = vld [vmem:[%s166_s22 + $0x30] sm:$0xff]  ;;  %v181_v16 = vld [vmem:[%s166_s22 + $0x38] sm:$0xff] }
  0x13   : > { %v188_v15 = vld [vmem:[%s166_s22 + $0x70] sm:$0xff]  ;;  %v189_v17 = vld [vmem:[%s166_s22 + $0x78] sm:$0xff] }
  0x15   : > { %540 = vmatmul.mubr.msk.f32.gmra.mxu0 %vm199_vm1, %v177_v8  ;;  %552 = vmatmul.mubr.msk.f32.gmra.mxu1 %vm199_vm1, %v185_v9 }
  0x16   : > { %542 = vmatprep.mubr.msk.f32.mxu0 %vm199_vm1, %v178_v10  ;;  %554 = vmatprep.mubr.msk.f32.mxu1 %vm199_vm1, %v186_v11 }
  0x19   : > { %543 = vmatmul.mubr.msk.f32.gmra.mxu0 %vm199_vm1, %v179_v12  ;;  %555 = vmatmul.mubr.msk.f32.gmra.mxu1 %vm199_vm1, %v187_v13 }
  0x1a   : > { %545 = vmatprep.mubr.msk.f32.mxu0 %vm199_vm1, %v180_v14  ;;  %557 = vmatprep.mubr.msk.f32.mxu1 %vm199_vm1, %v188_v15 }
  0x1d   : > { %546 = vmatmul.mubr.msk.f32.gmra.mxu0 %vm199_vm1, %v181_v16  ;;  %558 = vmatmul.mubr.msk.f32.gmra.mxu1 %vm199_vm1, %v189_v17 }
  0xd1   : > { %v538_v19 = vpop.f32.mrf.mxu0  ;;  %v550_v20 = vpop.f32.mrf.mxu1 }
  0xd2   : > { %v324_v21 = vadd.f32 %v538_v19, %v494_v18  ;;  %v364_v22 = vadd.f32 %v550_v20, %v494_v18 }
  0xd3   : > { %v318_v23 = vpop.f32.mrf.mxu0  ;;  %v358_v24 = vpop.f32.mrf.mxu1 }
  0xd4   : > { %v398_v25 = vmax.f32 %v324_v21, 0.0  ;;  %v406_v26 = vmax.f32 %v364_v22, 0.0  ;;  %v319_v27 = vadd.f32 %v494_v18, %v318_v23  ;;  %v359_v28 = vadd.f32 %v494_v18, %v358_v24 }
  0xd5   : > { %v541_v29 = vpop.f32.mrf.mxu0  ;;  %v553_v30 = vpop.f32.mrf.mxu1 }
  0xd6   : > { %414 = vst [vmem:[%s646_s27 + $0x8] sm:$0xff] %v398_v25  ;;  %422 = vst [vmem:[%s646_s27 + $0x48] sm:$0xff] %v406_v26  ;;  %v397_v31 = vmax.f32 %v319_v27, 0.0  ;;  %v405_v32 = vmax.f32 %v359_v28, 0.0  ;;  %v334_v33 = vadd.f32 %v541_v29, %v494_v18  ;;  %v374_v34 = vadd.f32 %v553_v30, %v494_v18 }
  0xd7   : > { %v328_v35 = vpop.f32.mrf.mxu0  ;;  %v368_v36 = vpop.f32.mrf.mxu1 }
  0xd8   : > { %413 = vst [vmem:[%s646_s27] sm:$0xff] %v397_v31  ;;  %421 = vst [vmem:[%s646_s27 + $0x40] sm:$0xff] %v405_v32  ;;  %v400_v37 = vmax.f32 %v334_v33, 0.0  ;;  %v408_v38 = vmax.f32 %v374_v34, 0.0  ;;  %v329_v39 = vadd.f32 %v494_v18, %v328_v35  ;;  %v369_v40 = vadd.f32 %v494_v18, %v368_v36 }
  0xd9   : > { %v544_v41 = vpop.f32.mrf.mxu0  ;;  %v556_v42 = vpop.f32.mrf.mxu1 }
  0xda   : > { %416 = vst [vmem:[%s646_s27 + $0x18] sm:$0xff] %v400_v37  ;;  %424 = vst [vmem:[%s646_s27 + $0x58] sm:$0xff] %v408_v38  ;;  %v399_v43 = vmax.f32 %v329_v39, 0.0  ;;  %v407_v44 = vmax.f32 %v369_v40, 0.0  ;;  %v344_v45 = vadd.f32 %v544_v41, %v494_v18  ;;  %v384_v46 = vadd.f32 %v556_v42, %v494_v18 }
  0xdb   : > { %v338_v47 = vpop.f32.mrf.mxu0  ;;  %v378_v48 = vpop.f32.mrf.mxu1 }
  0xdc   : > { %415 = vst [vmem:[%s646_s27 + $0x10] sm:$0xff] %v399_v43  ;;  %423 = vst [vmem:[%s646_s27 + $0x50] sm:$0xff] %v407_v44  ;;  %v402_v49 = vmax.f32 %v344_v45, 0.0  ;;  %v410_v50 = vmax.f32 %v384_v46, 0.0  ;;  %v339_v51 = vadd.f32 %v494_v18, %v338_v47  ;;  %v379_v52 = vadd.f32 %v494_v18, %v378_v48 }
  0xdd   : > { %v547_v53 = vpop.f32.mrf.mxu0  ;;  %v559_v54 = vpop.f32.mrf.mxu1 }
  0xde   : > { %418 = vst [vmem:[%s646_s27 + $0x28] sm:$0xff] %v402_v49  ;;  %426 = vst [vmem:[%s646_s27 + $0x68] sm:$0xff] %v410_v50  ;;  %v401_v55 = vmax.f32 %v339_v51, 0.0  ;;  %v409_v56 = vmax.f32 %v379_v52, 0.0  ;;  %v354_v57 = vadd.f32 %v547_v53, %v494_v18  ;;  %v394_v58 = vadd.f32 %v559_v54, %v494_v18 }
  0xdf   : > { %v348_v59 = vpop.f32.mrf.mxu0  ;;  %v388_v60 = vpop.f32.mrf.mxu1 }
  0xe0   : > { %417 = vst [vmem:[%s646_s27 + $0x20] sm:$0xff] %v401_v55  ;;  %425 = vst [vmem:[%s646_s27 + $0x60] sm:$0xff] %v409_v56  ;;  %v404_v61 = vmax.f32 %v354_v57, 0.0  ;;  %v412_v62 = vmax.f32 %v394_v58, 0.0  ;;  %v349_v63 = vadd.f32 %v494_v18, %v348_v59  ;;  %v389_v0 = vadd.f32 %v494_v18, %v388_v60 }
  0xe2   : > { %420 = vst [vmem:[%s646_s27 + $0x38] sm:$0xff] %v404_v61  ;;  %428 = vst [vmem:[%s646_s27 + $0x78] sm:$0xff] %v412_v62  ;;  %v403_v1 = vmax.f32 %v349_v63, 0.0  ;;  %v411_v2 = vmax.f32 %v389_v0, 0.0 }
  0xe4   : > { %419 = vst [vmem:[%s646_s27 + $0x30] sm:$0xff] %v403_v1  ;;  %427 = vst [vmem:[%s646_s27 + $0x70] sm:$0xff] %v411_v2 }
  0xe5 PF: > { %s13_s12 = sadd.s32 1, %s578_s12  }
  0xe6   : > { %p10_p4 = scmp.ge.s32.totalorder %s13_s12, 5  }
  0xe8   :  { %12 = sbr.rel (!%p10_p4) target bundleno = 1 (0x1), region = 62 }

// kernel: pcae_forward.6
= control target key start
LH: loop header
LB: loop body
LE: loop exit
PB: predicated region body
PF: predicated region fallthrough
CT: control target
= control target key end

     0   :  { %s2593_s1 = inlined_call_operand.vmem [shape: f32[1152,128], index: 1, kind: input, shape index: {}]   ;;  %s2594_s0 = inlined_call_operand.vmem [shape: f32[128,1152], index: 0, kind: input, shape index: {}]   ;;  %s2595_s2 = inlined_call_operand.vmem [shape: f32[1,128], index: 2, kind: input, shape index: {}]   ;;  %s2596_s3 = inlined_call_operand.vmem [shape: f32[128,128], index: 3, kind: output, shape index: {}]  }
   0x1   :  { %v189_v0 = vld [vmem:[%s2593_s1 + $0xf8] sm:$0xff]  ;;  %v188_v4 = vld [vmem:[%s2593_s1 + $0xf0] sm:$0xff]  ;;  %v187_v8 = vld [vmem:[%s2593_s1 + $0xe8] sm:$0xff] }
   0x2   :  { %v221_v1 = vld [vmem:[%s2593_s1 + $0x1f8] sm:$0xff]  ;;  %1071 = vmatprep.subr.mxu0 %v189_v0  ;;  %v220_v5 = vld [vmem:[%s2593_s1 + $0x1f0] sm:$0xff]  ;;  %v219_v9 = vld [vmem:[%s2593_s1 + $0x1e8] sm:$0xff] }
   0x3   :  { %v173_v2 = vld [vmem:[%s2593_s1 + $0x78] sm:$0xff]  ;;  %1151 = vmatprep.subr.mxu1 %v221_v1  ;;  %v172_v6 = vld [vmem:[%s2593_s1 + $0x70] sm:$0xff]  ;;  %v171_v10 = vld [vmem:[%s2593_s1 + $0x68] sm:$0xff] }
   0x4   :  { %v205_v3 = vld [vmem:[%s2593_s1 + $0x178] sm:$0xff]  ;;  %1072 = vmatpush3.msra.mxu0 %v173_v2  ;;  %v204_v7 = vld [vmem:[%s2593_s1 + $0x170] sm:$0xff]  ;;  %v203_v11 = vld [vmem:[%s2593_s1 + $0x168] sm:$0xff] }
   0x5   :  { %1152 = vmatpush3.msra.mxu1 %v205_v3  ;;  %1073 = vmatprep.subr.mxu0 %v188_v4  ;;  %v186_v12 = vld [vmem:[%s2593_s1 + $0xe0] sm:$0xff]  ;;  %v185_v16 = vld [vmem:[%s2593_s1 + $0xd8] sm:$0xff]  ;;  %v184_v20 = vld [vmem:[%s2593_s1 + $0xd0] sm:$0xff] }
   0x6   :  { %1153 = vmatprep.subr.mxu1 %v220_v5  ;;  %1074 = vmatpush3.msra.mxu0 %v172_v6  ;;  %v218_v13 = vld [vmem:[%s2593_s1 + $0x1e0] sm:$0xff]  ;;  %v217_v17 = vld [vmem:[%s2593_s1 + $0x1d8] sm:$0xff]  ;;  %v216_v21 = vld [vmem:[%s2593_s1 + $0x1d0] sm:$0xff] }
   0x7   :  { %1154 = vmatpush3.msra.mxu1 %v204_v7  ;;  %1075 = vmatprep.subr.mxu0 %v187_v8  ;;  %v170_v14 = vld [vmem:[%s2593_s1 + $0x60] sm:$0xff]  ;;  %v169_v18 = vld [vmem:[%s2593_s1 + $0x58] sm:$0xff]  ;;  %v168_v22 = vld [vmem:[%s2593_s1 + $0x50] sm:$0xff] }
   0x8   :  { %1155 = vmatprep.subr.mxu1 %v219_v9  ;;  %v202_v15 = vld [vmem:[%s2593_s1 + $0x160] sm:$0xff]  ;;  %1076 = vmatpush3.msra.mxu0 %v171_v10  ;;  %v201_v19 = vld [vmem:[%s2593_s1 + $0x158] sm:$0xff]  ;;  %v200_v23 = vld [vmem:[%s2593_s1 + $0x150] sm:$0xff] }
   0x9   :  { %1156 = vmatpush3.msra.mxu1 %v203_v11  ;;  %1077 = vmatprep.subr.mxu0 %v186_v12  ;;  %v183_v24 = vld [vmem:[%s2593_s1 + $0xc8] sm:$0xff]  ;;  %v182_v28 = vld [vmem:[%s2593_s1 + $0xc0] sm:$0xff]  ;;  %v181_v32 = vld [vmem:[%s2593_s1 + $0xb8] sm:$0xff] }
   0xa   :  { %1157 = vmatprep.subr.mxu1 %v218_v13  ;;  %1078 = vmatpush3.msra.mxu0 %v170_v14  ;;  %v215_v25 = vld [vmem:[%s2593_s1 + $0x1c8] sm:$0xff]  ;;  %v214_v29 = vld [vmem:[%s2593_s1 + $0x1c0] sm:$0xff]  ;;  %v213_v33 = vld [vmem:[%s2593_s1 + $0x1b8] sm:$0xff] }
   0xb   :  { %1158 = vmatpush3.msra.mxu1 %v202_v15  ;;  %1079 = vmatprep.subr.mxu0 %v185_v16  ;;  %v167_v26 = vld [vmem:[%s2593_s1 + $0x48] sm:$0xff]  ;;  %v166_v30 = vld [vmem:[%s2593_s1 + $0x40] sm:$0xff]  ;;  %v165_v34 = vld [vmem:[%s2593_s1 + $0x38] sm:$0xff] }
   0xc   :  { %1159 = vmatprep.subr.mxu1 %v217_v17  ;;  %1080 = vmatpush3.msra.mxu0 %v169_v18  ;;  %v199_v27 = vld [vmem:[%s2593_s1 + $0x148] sm:$0xff]  ;;  %v198_v31 = vld [vmem:[%s2593_s1 + $0x140] sm:$0xff]  ;;  %v197_v35 = vld [vmem:[%s2593_s1 + $0x138] sm:$0xff] }
   0xd   :  { %1160 = vmatpush3.msra.mxu1 %v201_v19  ;;  %1081 = vmatprep.subr.mxu0 %v184_v20  ;;  %v180_v36 = vld [vmem:[%s2593_s1 + $0xb0] sm:$0xff]  ;;  %v179_v40 = vld [vmem:[%s2593_s1 + $0xa8] sm:$0xff]  ;;  %v178_v44 = vld [vmem:[%s2593_s1 + $0xa0] sm:$0xff] }
   0xe   :  { %1161 = vmatprep.subr.mxu1 %v216_v21  ;;  %1082 = vmatpush3.msra.mxu0 %v168_v22  ;;  %v212_v37 = vld [vmem:[%s2593_s1 + $0x1b0] sm:$0xff]  ;;  %v211_v41 = vld [vmem:[%s2593_s1 + $0x1a8] sm:$0xff]  ;;  %v210_v45 = vld [vmem:[%s2593_s1 + $0x1a0] sm:$0xff] }
   0xf   :  { %1162 = vmatpush3.msra.mxu1 %v200_v23  ;;  %1083 = vmatprep.subr.mxu0 %v183_v24  ;;  %v164_v38 = vld [vmem:[%s2593_s1 + $0x30] sm:$0xff]  ;;  %v163_v42 = vld [vmem:[%s2593_s1 + $0x28] sm:$0xff]  ;;  %v162_v46 = vld [vmem:[%s2593_s1 + $0x20] sm:$0xff] }
  0x10   :  { %1163 = vmatprep.subr.mxu1 %v215_v25  ;;  %1084 = vmatpush3.msra.mxu0 %v167_v26  ;;  %v196_v39 = vld [vmem:[%s2593_s1 + $0x130] sm:$0xff]  ;;  %v195_v43 = vld [vmem:[%s2593_s1 + $0x128] sm:$0xff]  ;;  %v194_v47 = vld [vmem:[%s2593_s1 + $0x120] sm:$0xff] }
  0x11   :  { %1164 = vmatpush3.msra.mxu1 %v199_v27  ;;  %1085 = vmatprep.subr.mxu0 %v182_v28  ;;  %v177_v48 = vld [vmem:[%s2593_s1 + $0x98] sm:$0xff]  ;;  %v176_v52 = vld [vmem:[%s2593_s1 + $0x90] sm:$0xff]  ;;  %v175_v56 = vld [vmem:[%s2593_s1 + $0x88] sm:$0xff] }
  0x12   :  { %1165 = vmatprep.subr.mxu1 %v214_v29  ;;  %1086 = vmatpush3.msra.mxu0 %v166_v30  ;;  %v209_v49 = vld [vmem:[%s2593_s1 + $0x198] sm:$0xff]  ;;  %v208_v53 = vld [vmem:[%s2593_s1 + $0x190] sm:$0xff]  ;;  %v207_v57 = vld [vmem:[%s2593_s1 + $0x188] sm:$0xff] }
  0x13   :  { %1166 = vmatpush3.msra.mxu1 %v198_v31  ;;  %1087 = vmatprep.subr.mxu0 %v181_v32  ;;  %v161_v50 = vld [vmem:[%s2593_s1 + $0x18] sm:$0xff]  ;;  %v160_v54 = vld [vmem:[%s2593_s1 + $0x10] sm:$0xff]  ;;  %v159_v58 = vld [vmem:[%s2593_s1 + $0x8] sm:$0xff] }
  0x14   :  { %1167 = vmatprep.subr.mxu1 %v213_v33  ;;  %1088 = vmatpush3.msra.mxu0 %v165_v34  ;;  %v193_v51 = vld [vmem:[%s2593_s1 + $0x118] sm:$0xff]  ;;  %v192_v55 = vld [vmem:[%s2593_s1 + $0x110] sm:$0xff]  ;;  %v191_v59 = vld [vmem:[%s2593_s1 + $0x108] sm:$0xff] }
  0x15   :  { %1168 = vmatpush3.msra.mxu1 %v197_v35  ;;  %1089 = vmatprep.subr.mxu0 %v180_v36  ;;  %v174_v60 = vld [vmem:[%s2593_s1 + $0x80] sm:$0xff]  ;;  %v15_v63 = vld [vmem:[%s2594_s0 + $0x8] sm:$0xff]  ;;  %v17_v1 = vld [vmem:[%s2594_s0 + $0x18] sm:$0xff] }
  0x16   :  { %1169 = vmatprep.subr.mxu1 %v212_v37  ;;  %1090 = vmatpush3.msra.mxu0 %v164_v38  ;;  %v206_v61 = vld [vmem:[%s2593_s1 + $0x180] sm:$0xff]  ;;  %v16_v3 = vld [vmem:[%s2594_s0 + $0x10] sm:$0xff]  ;;  %v253_v4 = vld [vmem:[%s2593_s1 + $0x2f8] sm:$0xff] }
  0x17   :  { %1170 = vmatpush3.msra.mxu1 %v196_v39  ;;  %1091 = vmatprep.subr.mxu0 %v179_v40  ;;  %v158_v62 = vld [vmem:[%s2593_s1] sm:$0xff]  ;;  %v285_v5 = vld [vmem:[%s2593_s1 + $0x3f8] sm:$0xff]  ;;  %v24_v8 = vld [vmem:[%s2594_s0 + $0x50] sm:$0xff] }
  0x18   :  { %1171 = vmatprep.subr.mxu1 %v211_v41  ;;  %1092 = vmatpush3.msra.mxu0 %v163_v42  ;;  %v190_v0 = vld [vmem:[%s2593_s1 + $0x100] sm:$0xff]  ;;  %v237_v6 = vld [vmem:[%s2593_s1 + $0x278] sm:$0xff]  ;;  %v23_v10 = vld [vmem:[%s2594_s0 + $0x48] sm:$0xff] }
  0x19   :  { %1172 = vmatpush3.msra.mxu1 %v195_v43  ;;  %1093 = vmatprep.subr.mxu0 %v178_v44  ;;  %v14_v2 = vld [vmem:[%s2594_s0] sm:$0xff]  ;;  %v269_v7 = vld [vmem:[%s2593_s1 + $0x378] sm:$0xff]  ;;  %v252_v12 = vld [vmem:[%s2593_s1 + $0x2f0] sm:$0xff] }
  0x1a   :  { %1173 = vmatprep.subr.mxu1 %v210_v45  ;;  %1094 = vmatpush3.msra.mxu0 %v162_v46  ;;  %v26_v9 = vld [vmem:[%s2594_s0 + $0x60] sm:$0xff]  ;;  %v25_v11 = vld [vmem:[%s2594_s0 + $0x58] sm:$0xff]  ;;  %v284_v13 = vld [vmem:[%s2593_s1 + $0x3f0] sm:$0xff] }
  0x1b   :  { %1174 = vmatpush3.msra.mxu1 %v194_v47  ;;  %1095 = vmatprep.subr.mxu0 %v177_v48  ;;  %v236_v14 = vld [vmem:[%s2593_s1 + $0x270] sm:$0xff]  ;;  %v33_v16 = vld [vmem:[%s2594_s0 + $0x98] sm:$0xff]  ;;  %v35_v17 = vld [vmem:[%s2594_s0 + $0xa8] sm:$0xff] }
  0x1c   :  { %1175 = vmatprep.subr.mxu1 %v209_v49  ;;  %1096 = vmatpush3.msra.mxu0 %v161_v50  ;;  %v268_v15 = vld [vmem:[%s2593_s1 + $0x370] sm:$0xff]  ;;  %v34_v19 = vld [vmem:[%s2594_s0 + $0xa0] sm:$0xff]  ;;  %v251_v20 = vld [vmem:[%s2593_s1 + $0x2e8] sm:$0xff] }
  0x1d   :  { %1176 = vmatpush3.msra.mxu1 %v193_v51  ;;  %1097 = vmatprep.subr.mxu0 %v176_v52  ;;  %v32_v18 = vld [vmem:[%s2594_s0 + $0x90] sm:$0xff]  ;;  %v283_v21 = vld [vmem:[%s2593_s1 + $0x3e8] sm:$0xff]  ;;  %v42_v24 = vld [vmem:[%s2594_s0 + $0xe0] sm:$0xff] }
  0x1e   :  { %1177 = vmatprep.subr.mxu1 %v208_v53  ;;  %1098 = vmatpush3.msra.mxu0 %v160_v54  ;;  %v235_v22 = vld [vmem:[%s2593_s1 + $0x268] sm:$0xff]  ;;  %v44_v25 = vld [vmem:[%s2594_s0 + $0xf0] sm:$0xff]  ;;  %v41_v26 = vld [vmem:[%s2594_s0 + $0xd8] sm:$0xff] }
  0x1f   :  { %1178 = vmatpush3.msra.mxu1 %v192_v55  ;;  %1099 = vmatprep.subr.mxu0 %v175_v56  ;;  %v267_v23 = vld [vmem:[%s2593_s1 + $0x368] sm:$0xff]  ;;  %v250_v28 = vld [vmem:[%s2593_s1 + $0x2e0] sm:$0xff]  ;;  %v53_v33 = vld [vmem:[%s2594_s0 + $0x138] sm:$0xff] }
  0x20   :  { %1179 = vmatprep.subr.mxu1 %v207_v57  ;;  %1100 = vmatpush3.msra.mxu0 %v159_v58  ;;  %v43_v27 = vld [vmem:[%s2594_s0 + $0xe8] sm:$0xff]  ;;  %v282_v29 = vld [vmem:[%s2593_s1 + $0x3e0] sm:$0xff]  ;;  %v52_v35 = vld [vmem:[%s2594_s0 + $0x130] sm:$0xff] }
  0x21   :  { %1180 = vmatpush3.msra.mxu1 %v191_v59  ;;  %1101 = vmatprep.subr.mxu0 %v174_v60  ;;  %v234_v30 = vld [vmem:[%s2593_s1 + $0x260] sm:$0xff]  ;;  %v51_v32 = vld [vmem:[%s2594_s0 + $0x128] sm:$0xff]  ;;  %v249_v36 = vld [vmem:[%s2593_s1 + $0x2d8] sm:$0xff] }
  0x22   :  { %1181 = vmatprep.subr.mxu1 %v206_v61  ;;  %1102 = vmatpush3.msra.mxu0 %v158_v62  ;;  %v266_v31 = vld [vmem:[%s2593_s1 + $0x360] sm:$0xff]  ;;  %v281_v37 = vld [vmem:[%s2593_s1 + $0x3d8] sm:$0xff]  ;;  %v60_v40 = vld [vmem:[%s2594_s0 + $0x170] sm:$0xff] }
  0x23   :  { %373 = vmatprep.mubr.f32.mxu0 %v15_v63  ;;  %1182 = vmatpush3.msra.mxu1 %v190_v0  ;;  %v50_v34 = vld [vmem:[%s2594_s0 + $0x120] sm:$0xff]  ;;  %v233_v38 = vld [vmem:[%s2593_s1 + $0x258] sm:$0xff]  ;;  %v59_v42 = vld [vmem:[%s2594_s0 + $0x168] sm:$0xff] }
  0x24   :  { %518 = vmatprep.mubr.f32.mxu1 %v17_v1  ;;  %374 = vmatmul.mubr.f32.vlgmr.msra.gmra.mxu0 %v14_v2  ;;  %v265_v39 = vld [vmem:[%s2593_s1 + $0x358] sm:$0xff]  ;;  %v62_v41 = vld [vmem:[%s2594_s0 + $0x180] sm:$0xff]  ;;  %v248_v44 = vld [vmem:[%s2593_s1 + $0x2d0] sm:$0xff] }
  0x25   :  { %519 = vmatmul.mubr.f32.vlgmr.msra.gmra.mxu1 %v16_v3  ;;  %1231 = vmatprep.subr.mxu0 %v253_v4  ;;  %v61_v43 = vld [vmem:[%s2594_s0 + $0x178] sm:$0xff]  ;;  %v280_v45 = vld [vmem:[%s2593_s1 + $0x3d0] sm:$0xff]  ;;  %v71_v49 = vld [vmem:[%s2594_s0 + $0x1c8] sm:$0xff] }
  0x26   :  { %1311 = vmatprep.subr.mxu1 %v285_v5  ;;  %1232 = vmatpush3.msra.mxu0 %v237_v6  ;;  %v232_v46 = vld [vmem:[%s2593_s1 + $0x250] sm:$0xff]  ;;  %v69_v48 = vld [vmem:[%s2594_s0 + $0x1b8] sm:$0xff]  ;;  %v70_v51 = vld [vmem:[%s2594_s0 + $0x1c0] sm:$0xff] }
  0x27   :  { %1312 = vmatpush3.msra.mxu1 %v269_v7  ;;  %378 = vmatprep.mubr.f32.mxu0 %v24_v8  ;;  %v264_v47 = vld [vmem:[%s2593_s1 + $0x350] sm:$0xff]  ;;  %v247_v52 = vld [vmem:[%s2593_s1 + $0x2c8] sm:$0xff]  ;;  %v78_v56 = vld [vmem:[%s2594_s0 + $0x200] sm:$0xff] }
  0x28   :  { %523 = vmatprep.mubr.f32.mxu1 %v26_v9  ;;  %379 = vmatmul.mubr.f32.gmra.mxu0 %v23_v10  ;;  %v68_v50 = vld [vmem:[%s2594_s0 + $0x1b0] sm:$0xff]  ;;  %v279_v53 = vld [vmem:[%s2593_s1 + $0x3c8] sm:$0xff]  ;;  %v77_v58 = vld [vmem:[%s2594_s0 + $0x1f8] sm:$0xff] }
  0x29   :  { %524 = vmatmul.mubr.f32.gmra.mxu1 %v25_v11  ;;  %1233 = vmatprep.subr.mxu0 %v252_v12  ;;  %v231_v54 = vld [vmem:[%s2593_s1 + $0x248] sm:$0xff]  ;;  %v80_v57 = vld [vmem:[%s2594_s0 + $0x210] sm:$0xff]  ;;  %v246_v60 = vld [vmem:[%s2593_s1 + $0x2c0] sm:$0xff] }
  0x2a   :  { %1313 = vmatprep.subr.mxu1 %v284_v13  ;;  %1234 = vmatpush3.msra.mxu0 %v236_v14  ;;  %v263_v55 = vld [vmem:[%s2593_s1 + $0x348] sm:$0xff]  ;;  %v278_v61 = vld [vmem:[%s2593_s1 + $0x3c0] sm:$0xff]  ;;  %v89_v1 = vld [vmem:[%s2594_s0 + $0x258] sm:$0xff] }
  0x2b   :  { %1314 = vmatpush3.msra.mxu1 %v268_v15  ;;  %383 = vmatprep.mubr.f32.mxu0 %v33_v16  ;;  %v79_v59 = vld [vmem:[%s2594_s0 + $0x208] sm:$0xff]  ;;  %v230_v62 = vld [vmem:[%s2593_s1 + $0x240] sm:$0xff]  ;;  %v88_v3 = vld [vmem:[%s2594_s0 + $0x250] sm:$0xff] }
  0x2c   :  { %528 = vmatprep.mubr.f32.mxu1 %v35_v17  ;;  %384 = vmatmul.mubr.f32.gmra.mxu0 %v32_v18  ;;  %v262_v63 = vld [vmem:[%s2593_s1 + $0x340] sm:$0xff]  ;;  %v87_v0 = vld [vmem:[%s2594_s0 + $0x248] sm:$0xff]  ;;  %v245_v4 = vld [vmem:[%s2593_s1 + $0x2b8] sm:$0xff] }
  0x2d   :  { %529 = vmatmul.mubr.f32.gmra.mxu1 %v34_v19  ;;  %1235 = vmatprep.subr.mxu0 %v251_v20  ;;  %v86_v2 = vld [vmem:[%s2594_s0 + $0x240] sm:$0xff]  ;;  %v277_v5 = vld [vmem:[%s2593_s1 + $0x3b8] sm:$0xff]  ;;  %v96_v8 = vld [vmem:[%s2594_s0 + $0x290] sm:$0xff] }
  0x2e   :  { %1315 = vmatprep.subr.mxu1 %v283_v21  ;;  %1236 = vmatpush3.msra.mxu0 %v235_v22  ;;  %v229_v6 = vld [vmem:[%s2593_s1 + $0x238] sm:$0xff]  ;;  %v98_v9 = vld [vmem:[%s2594_s0 + $0x2a0] sm:$0xff]  ;;  %v95_v10 = vld [vmem:[%s2594_s0 + $0x288] sm:$0xff] }
  0x2f   :  { %1316 = vmatpush3.msra.mxu1 %v267_v23  ;;  %388 = vmatprep.mubr.f32.mxu0 %v42_v24  ;;  %v261_v7 = vld [vmem:[%s2593_s1 + $0x338] sm:$0xff]  ;;  %v244_v12 = vld [vmem:[%s2593_s1 + $0x2b0] sm:$0xff]  ;;  %v107_v17 = vld [vmem:[%s2594_s0 + $0x2e8] sm:$0xff] }
  0x30   :  { %533 = vmatprep.mubr.f32.mxu1 %v44_v25  ;;  %389 = vmatmul.mubr.f32.gmra.mxu0 %v41_v26  ;;  %v97_v11 = vld [vmem:[%s2594_s0 + $0x298] sm:$0xff]  ;;  %v276_v13 = vld [vmem:[%s2593_s1 + $0x3b0] sm:$0xff]  ;;  %v106_v19 = vld [vmem:[%s2594_s0 + $0x2e0] sm:$0xff] }
  0x31   :  { %534 = vmatmul.mubr.f32.gmra.mxu1 %v43_v27  ;;  %1237 = vmatprep.subr.mxu0 %v250_v28  ;;  %v228_v14 = vld [vmem:[%s2593_s1 + $0x230] sm:$0xff]  ;;  %v105_v16 = vld [vmem:[%s2594_s0 + $0x2d8] sm:$0xff]  ;;  %v243_v20 = vld [vmem:[%s2593_s1 + $0x2a8] sm:$0xff] }
  0x32   :  { %1317 = vmatprep.subr.mxu1 %v282_v29  ;;  %1238 = vmatpush3.msra.mxu0 %v234_v30  ;;  %v260_v15 = vld [vmem:[%s2593_s1 + $0x330] sm:$0xff]  ;;  %v275_v21 = vld [vmem:[%s2593_s1 + $0x3a8] sm:$0xff]  ;;  %v114_v24 = vld [vmem:[%s2594_s0 + $0x320] sm:$0xff] }
  0x33   :  { %1318 = vmatpush3.msra.mxu1 %v266_v31  ;;  %393 = vmatprep.mubr.f32.mxu0 %v51_v32  ;;  %v104_v18 = vld [vmem:[%s2594_s0 + $0x2d0] sm:$0xff]  ;;  %v227_v22 = vld [vmem:[%s2593_s1 + $0x228] sm:$0xff]  ;;  %v113_v26 = vld [vmem:[%s2594_s0 + $0x318] sm:$0xff] }
  0x34   :  { %538 = vmatprep.mubr.f32.mxu1 %v53_v33  ;;  %394 = vmatmul.mubr.f32.gmra.mxu0 %v50_v34  ;;  %v259_v23 = vld [vmem:[%s2593_s1 + $0x328] sm:$0xff]  ;;  %v116_v25 = vld [vmem:[%s2594_s0 + $0x330] sm:$0xff]  ;;  %v242_v28 = vld [vmem:[%s2593_s1 + $0x2a0] sm:$0xff] }
  0x35   :  { %539 = vmatmul.mubr.f32.gmra.mxu1 %v52_v35  ;;  %1239 = vmatprep.subr.mxu0 %v249_v36  ;;  %v115_v27 = vld [vmem:[%s2594_s0 + $0x328] sm:$0xff]  ;;  %v274_v29 = vld [vmem:[%s2593_s1 + $0x3a0] sm:$0xff]  ;;  %v125_v33 = vld [vmem:[%s2594_s0 + $0x378] sm:$0xff] }
  0x36   :  { %1319 = vmatprep.subr.mxu1 %v281_v37  ;;  %1240 = vmatpush3.msra.mxu0 %v233_v38  ;;  %v226_v30 = vld [vmem:[%s2593_s1 + $0x220] sm:$0xff]  ;;  %v123_v32 = vld [vmem:[%s2594_s0 + $0x368] sm:$0xff]  ;;  %v124_v35 = vld [vmem:[%s2594_s0 + $0x370] sm:$0xff] }
  0x37   :  { %1320 = vmatpush3.msra.mxu1 %v265_v39  ;;  %398 = vmatprep.mubr.f32.mxu0 %v60_v40  ;;  %v258_v31 = vld [vmem:[%s2593_s1 + $0x320] sm:$0xff]  ;;  %v241_v36 = vld [vmem:[%s2593_s1 + $0x298] sm:$0xff]  ;;  %v132_v40 = vld [vmem:[%s2594_s0 + $0x3b0] sm:$0xff] }
  0x38   :  { %543 = vmatprep.mubr.f32.mxu1 %v62_v41  ;;  %399 = vmatmul.mubr.f32.gmra.mxu0 %v59_v42  ;;  %v122_v34 = vld [vmem:[%s2594_s0 + $0x360] sm:$0xff]  ;;  %v273_v37 = vld [vmem:[%s2593_s1 + $0x398] sm:$0xff]  ;;  %v131_v42 = vld [vmem:[%s2594_s0 + $0x3a8] sm:$0xff] }
  0x39   :  { %544 = vmatmul.mubr.f32.gmra.mxu1 %v61_v43  ;;  %1241 = vmatprep.subr.mxu0 %v248_v44  ;;  %v225_v38 = vld [vmem:[%s2593_s1 + $0x218] sm:$0xff]  ;;  %v134_v41 = vld [vmem:[%s2594_s0 + $0x3c0] sm:$0xff]  ;;  %v240_v44 = vld [vmem:[%s2593_s1 + $0x290] sm:$0xff] }
  0x3a   :  { %1321 = vmatprep.subr.mxu1 %v280_v45  ;;  %1242 = vmatpush3.msra.mxu0 %v232_v46  ;;  %v257_v39 = vld [vmem:[%s2593_s1 + $0x318] sm:$0xff]  ;;  %v272_v45 = vld [vmem:[%s2593_s1 + $0x390] sm:$0xff] }
  0x3b   :  { %1322 = vmatpush3.msra.mxu1 %v264_v47  ;;  %403 = vmatprep.mubr.f32.mxu0 %v69_v48  ;;  %v133_v43 = vld [vmem:[%s2594_s0 + $0x3b8] sm:$0xff]  ;;  %v224_v46 = vld [vmem:[%s2593_s1 + $0x210] sm:$0xff] }
  0x3c   :  { %548 = vmatprep.mubr.f32.mxu1 %v71_v49  ;;  %404 = vmatmul.mubr.f32.gmra.mxu0 %v68_v50  ;;  %v256_v47 = vld [vmem:[%s2593_s1 + $0x310] sm:$0xff]  ;;  %v141_v48 = vld [vmem:[%s2594_s0 + $0x3f8] sm:$0xff]  ;;  %v143_v49 = vld [vmem:[%s2594_s0 + $0x408] sm:$0xff] }
  0x3d   :  { %549 = vmatmul.mubr.f32.gmra.mxu1 %v70_v51  ;;  %1243 = vmatprep.subr.mxu0 %v247_v52  ;;  %v140_v50 = vld [vmem:[%s2594_s0 + $0x3f0] sm:$0xff]  ;;  %v142_v51 = vld [vmem:[%s2594_s0 + $0x400] sm:$0xff]  ;;  %v239_v52 = vld [vmem:[%s2593_s1 + $0x288] sm:$0xff] }
  0x3e   :  { %1323 = vmatprep.subr.mxu1 %v279_v53  ;;  %1244 = vmatpush3.msra.mxu0 %v231_v54  ;;  %v271_v53 = vld [vmem:[%s2593_s1 + $0x388] sm:$0xff] }
  0x3f   :  { %1324 = vmatpush3.msra.mxu1 %v263_v55  ;;  %408 = vmatprep.mubr.f32.mxu0 %v78_v56  ;;  %v223_v54 = vld [vmem:[%s2593_s1 + $0x208] sm:$0xff]  ;;  %v150_v56 = vld [vmem:[%s2594_s0 + $0x440] sm:$0xff] }
  0x40   :  { %553 = vmatprep.mubr.f32.mxu1 %v80_v57  ;;  %409 = vmatmul.mubr.f32.gmra.mxu0 %v77_v58  ;;  %v255_v55 = vld [vmem:[%s2593_s1 + $0x308] sm:$0xff]  ;;  %v152_v57 = vld [vmem:[%s2594_s0 + $0x450] sm:$0xff]  ;;  %v149_v58 = vld [vmem:[%s2594_s0 + $0x438] sm:$0xff] }
  0x41   :  { %554 = vmatmul.mubr.f32.gmra.mxu1 %v79_v59  ;;  %1245 = vmatprep.subr.mxu0 %v246_v60  ;;  %v151_v59 = vld [vmem:[%s2594_s0 + $0x448] sm:$0xff]  ;;  %v238_v60 = vld [vmem:[%s2593_s1 + $0x280] sm:$0xff] }
  0x42   :  { %1325 = vmatprep.subr.mxu1 %v278_v61  ;;  %1246 = vmatpush3.msra.mxu0 %v230_v62  ;;  %v270_v61 = vld [vmem:[%s2593_s1 + $0x380] sm:$0xff] }
  0x43   :  { %1326 = vmatpush3.msra.mxu1 %v262_v63  ;;  %413 = vmatprep.mubr.f32.mxu0 %v87_v0  ;;  %v222_v62 = vld [vmem:[%s2593_s1 + $0x200] sm:$0xff]  ;;  %v19_v0 = vld [vmem:[%s2594_s0 + $0x28] sm:$0xff] }
  0x44   :  { %558 = vmatprep.mubr.f32.mxu1 %v89_v1  ;;  %414 = vmatmul.mubr.f32.gmra.mxu0 %v86_v2  ;;  %v254_v63 = vld [vmem:[%s2593_s1 + $0x300] sm:$0xff]  ;;  %v21_v1 = vld [vmem:[%s2594_s0 + $0x38] sm:$0xff] }
  0x45   :  { %559 = vmatmul.mubr.f32.gmra.mxu1 %v88_v3  ;;  %1247 = vmatprep.subr.mxu0 %v245_v4  ;;  %v18_v2 = vld [vmem:[%s2594_s0 + $0x20] sm:$0xff]  ;;  %v20_v3 = vld [vmem:[%s2594_s0 + $0x30] sm:$0xff]  ;;  %v301_v4 = vld [vmem:[%s2593_s1 + $0x478] sm:$0xff] }
  0x46   :  { %1327 = vmatprep.subr.mxu1 %v277_v5  ;;  %1248 = vmatpush3.msra.mxu0 %v229_v6  ;;  %v28_v5 = vld [vmem:[%s2594_s0 + $0x70] sm:$0xff]  ;;  %v30_v6 = vld [vmem:[%s2594_s0 + $0x80] sm:$0xff] }
  0x47   :  { %1328 = vmatpush3.msra.mxu1 %v261_v7  ;;  %418 = vmatprep.mubr.f32.mxu0 %v96_v8  ;;  %v27_v7 = vld [vmem:[%s2594_s0 + $0x68] sm:$0xff]  ;;  %v29_v8 = vld [vmem:[%s2594_s0 + $0x78] sm:$0xff] }
  0x48   :  { %563 = vmatprep.mubr.f32.mxu1 %v98_v9  ;;  %419 = vmatmul.mubr.f32.gmra.mxu0 %v95_v10  ;;  %v300_v9 = vld [vmem:[%s2593_s1 + $0x470] sm:$0xff]  ;;  %v37_v10 = vld [vmem:[%s2594_s0 + $0xb8] sm:$0xff] }
  0x49   :  { %564 = vmatmul.mubr.f32.gmra.mxu1 %v97_v11  ;;  %1249 = vmatprep.subr.mxu0 %v244_v12  ;;  %v39_v11 = vld [vmem:[%s2594_s0 + $0xc8] sm:$0xff]  ;;  %v36_v12 = vld [vmem:[%s2594_s0 + $0xb0] sm:$0xff] }
  0x4a   :  { %1329 = vmatprep.subr.mxu1 %v276_v13  ;;  %1250 = vmatpush3.msra.mxu0 %v228_v14  ;;  %v38_v13 = vld [vmem:[%s2594_s0 + $0xc0] sm:$0xff]  ;;  %v299_v14 = vld [vmem:[%s2593_s1 + $0x468] sm:$0xff] }
  0x4b   :  { %1330 = vmatpush3.msra.mxu1 %v260_v15  ;;  %423 = vmatprep.mubr.f32.mxu0 %v105_v16  ;;  %v46_v15 = vld [vmem:[%s2594_s0 + $0x100] sm:$0xff]  ;;  %v48_v16 = vld [vmem:[%s2594_s0 + $0x110] sm:$0xff] }
  0x4c   :  { %568 = vmatprep.mubr.f32.mxu1 %v107_v17  ;;  %424 = vmatmul.mubr.f32.gmra.mxu0 %v104_v18  ;;  %v45_v17 = vld [vmem:[%s2594_s0 + $0xf8] sm:$0xff]  ;;  %v47_v18 = vld [vmem:[%s2594_s0 + $0x108] sm:$0xff] }
  0x4d   :  { %569 = vmatmul.mubr.f32.gmra.mxu1 %v106_v19  ;;  %1251 = vmatprep.subr.mxu0 %v243_v20  ;;  %v298_v19 = vld [vmem:[%s2593_s1 + $0x460] sm:$0xff]  ;;  %v55_v20 = vld [vmem:[%s2594_s0 + $0x148] sm:$0xff] }
  0x4e   :  { %1331 = vmatprep.subr.mxu1 %v275_v21  ;;  %1252 = vmatpush3.msra.mxu0 %v227_v22  ;;  %v57_v21 = vld [vmem:[%s2594_s0 + $0x158] sm:$0xff]  ;;  %v54_v22 = vld [vmem:[%s2594_s0 + $0x140] sm:$0xff] }
  0x4f   :  { %1332 = vmatpush3.msra.mxu1 %v259_v23  ;;  %428 = vmatprep.mubr.f32.mxu0 %v114_v24  ;;  %v56_v23 = vld [vmem:[%s2594_s0 + $0x150] sm:$0xff]  ;;  %v297_v24 = vld [vmem:[%s2593_s1 + $0x458] sm:$0xff] }
  0x50   :  { %573 = vmatprep.mubr.f32.mxu1 %v116_v25  ;;  %429 = vmatmul.mubr.f32.gmra.mxu0 %v113_v26  ;;  %v64_v25 = vld [vmem:[%s2594_s0 + $0x190] sm:$0xff]  ;;  %v66_v26 = vld [vmem:[%s2594_s0 + $0x1a0] sm:$0xff] }
  0x51   :  { %574 = vmatmul.mubr.f32.gmra.mxu1 %v115_v27  ;;  %1253 = vmatprep.subr.mxu0 %v242_v28  ;;  %v63_v27 = vld [vmem:[%s2594_s0 + $0x188] sm:$0xff]  ;;  %v65_v28 = vld [vmem:[%s2594_s0 + $0x198] sm:$0xff] }
  0x52   :  { %1333 = vmatprep.subr.mxu1 %v274_v29  ;;  %1254 = vmatpush3.msra.mxu0 %v226_v30  ;;  %v296_v29 = vld [vmem:[%s2593_s1 + $0x450] sm:$0xff]  ;;  %v73_v30 = vld [vmem:[%s2594_s0 + $0x1d8] sm:$0xff] }
  0x53   :  { %1334 = vmatpush3.msra.mxu1 %v258_v31  ;;  %433 = vmatprep.mubr.f32.mxu0 %v123_v32  ;;  %v75_v31 = vld [vmem:[%s2594_s0 + $0x1e8] sm:$0xff]  ;;  %v72_v32 = vld [vmem:[%s2594_s0 + $0x1d0] sm:$0xff] }
  0x54   :  { %578 = vmatprep.mubr.f32.mxu1 %v125_v33  ;;  %434 = vmatmul.mubr.f32.gmra.mxu0 %v122_v34  ;;  %v74_v33 = vld [vmem:[%s2594_s0 + $0x1e0] sm:$0xff]  ;;  %v295_v34 = vld [vmem:[%s2593_s1 + $0x448] sm:$0xff] }
  0x55   :  { %579 = vmatmul.mubr.f32.gmra.mxu1 %v124_v35  ;;  %1255 = vmatprep.subr.mxu0 %v241_v36  ;;  %v82_v35 = vld [vmem:[%s2594_s0 + $0x220] sm:$0xff]  ;;  %v84_v36 = vld [vmem:[%s2594_s0 + $0x230] sm:$0xff] }
  0x56   :  { %1335 = vmatprep.subr.mxu1 %v273_v37  ;;  %1256 = vmatpush3.msra.mxu0 %v225_v38  ;;  %v81_v37 = vld [vmem:[%s2594_s0 + $0x218] sm:$0xff]  ;;  %v83_v38 = vld [vmem:[%s2594_s0 + $0x228] sm:$0xff] }
  0x57   :  { %1336 = vmatpush3.msra.mxu1 %v257_v39  ;;  %438 = vmatprep.mubr.f32.mxu0 %v132_v40  ;;  %v294_v39 = vld [vmem:[%s2593_s1 + $0x440] sm:$0xff]  ;;  %v91_v40 = vld [vmem:[%s2594_s0 + $0x268] sm:$0xff] }
  0x58   :  { %583 = vmatprep.mubr.f32.mxu1 %v134_v41  ;;  %439 = vmatmul.mubr.f32.gmra.mxu0 %v131_v42  ;;  %v93_v41 = vld [vmem:[%s2594_s0 + $0x278] sm:$0xff]  ;;  %v90_v42 = vld [vmem:[%s2594_s0 + $0x260] sm:$0xff] }
  0x59   :  { %584 = vmatmul.mubr.f32.gmra.mxu1 %v133_v43  ;;  %1257 = vmatprep.subr.mxu0 %v240_v44  ;;  %v92_v43 = vld [vmem:[%s2594_s0 + $0x270] sm:$0xff]  ;;  %v293_v44 = vld [vmem:[%s2593_s1 + $0x438] sm:$0xff] }
  0x5a   :  { %1337 = vmatprep.subr.mxu1 %v272_v45  ;;  %1258 = vmatpush3.msra.mxu0 %v224_v46  ;;  %v100_v45 = vld [vmem:[%s2594_s0 + $0x2b0] sm:$0xff]  ;;  %v102_v46 = vld [vmem:[%s2594_s0 + $0x2c0] sm:$0xff] }
  0x5b   :  { %1338 = vmatpush3.msra.mxu1 %v256_v47  ;;  %443 = vmatprep.mubr.f32.mxu0 %v141_v48  ;;  %v99_v47 = vld [vmem:[%s2594_s0 + $0x2a8] sm:$0xff]  ;;  %v101_v48 = vld [vmem:[%s2594_s0 + $0x2b8] sm:$0xff] }
  0x5c   :  { %588 = vmatprep.mubr.f32.mxu1 %v143_v49  ;;  %444 = vmatmul.mubr.f32.gmra.mxu0 %v140_v50  ;;  %v292_v49 = vld [vmem:[%s2593_s1 + $0x430] sm:$0xff]  ;;  %v109_v50 = vld [vmem:[%s2594_s0 + $0x2f8] sm:$0xff] }
  0x5d   :  { %589 = vmatmul.mubr.f32.gmra.mxu1 %v142_v51  ;;  %1259 = vmatprep.subr.mxu0 %v239_v52  ;;  %v111_v51 = vld [vmem:[%s2594_s0 + $0x308] sm:$0xff]  ;;  %v108_v52 = vld [vmem:[%s2594_s0 + $0x2f0] sm:$0xff] }
  0x5e   :  { %1339 = vmatprep.subr.mxu1 %v271_v53  ;;  %1260 = vmatpush3.msra.mxu0 %v223_v54  ;;  %v110_v53 = vld [vmem:[%s2594_s0 + $0x300] sm:$0xff]  ;;  %v291_v54 = vld [vmem:[%s2593_s1 + $0x428] sm:$0xff] }
  0x5f   :  { %1340 = vmatpush3.msra.mxu1 %v255_v55  ;;  %448 = vmatprep.mubr.f32.mxu0 %v150_v56  ;;  %v118_v55 = vld [vmem:[%s2594_s0 + $0x340] sm:$0xff]  ;;  %v120_v56 = vld [vmem:[%s2594_s0 + $0x350] sm:$0xff] }
  0x60   :  { %593 = vmatprep.mubr.f32.mxu1 %v152_v57  ;;  %449 = vmatmul.mubr.f32.gmra.mxu0 %v149_v58  ;;  %v117_v57 = vld [vmem:[%s2594_s0 + $0x338] sm:$0xff]  ;;  %v119_v58 = vld [vmem:[%s2594_s0 + $0x348] sm:$0xff] }
  0x61   :  { %594 = vmatmul.mubr.f32.gmra.mxu1 %v151_v59  ;;  %1261 = vmatprep.subr.mxu0 %v238_v60  ;;  %v290_v59 = vld [vmem:[%s2593_s1 + $0x420] sm:$0xff]  ;;  %v127_v60 = vld [vmem:[%s2594_s0 + $0x388] sm:$0xff] }
  0x62   :  { %1341 = vmatprep.subr.mxu1 %v270_v61  ;;  %1262 = vmatpush3.msra.mxu0 %v222_v62  ;;  %v129_v61 = vld [vmem:[%s2594_s0 + $0x398] sm:$0xff]  ;;  %v126_v62 = vld [vmem:[%s2594_s0 + $0x380] sm:$0xff] }
  0x63   :  { %1342 = vmatpush3.msra.mxu1 %v254_v63  ;;  %663 = vmatprep.mubr.f32.mxu0 %v19_v0  ;;  %v128_v63 = vld [vmem:[%s2594_s0 + $0x390] sm:$0xff]  ;;  %v289_v0 = vld [vmem:[%s2593_s1 + $0x418] sm:$0xff] }
  0x64   :  { %808 = vmatprep.mubr.f32.mxu1 %v21_v1  ;;  %664 = vmatmul.mubr.f32.vlgmr.msra.gmra.mxu0 %v18_v2  ;;  %v136_v1 = vld [vmem:[%s2594_s0 + $0x3d0] sm:$0xff]  ;;  %v138_v2 = vld [vmem:[%s2594_s0 + $0x3e0] sm:$0xff] }
  0x65   :  { %809 = vmatmul.mubr.f32.vlgmr.msra.gmra.mxu1 %v20_v3  ;;  %1423 = vmatprep.subr.mxu0 %v301_v4  ;;  %v135_v3 = vld [vmem:[%s2594_s0 + $0x3c8] sm:$0xff] }
  0x66   :  { %1479 = vmatprep.subr.mxu1 %v301_v4  ;;  %1424 = vmatpush3.msra.mxu0 %v301_v4 }
  0x67   :  { %1495 = vmatpush3.msra.mxu1 %v301_v4  ;;  %668 = vmatprep.mubr.f32.mxu0 %v28_v5  ;;  %v137_v4 = vld [vmem:[%s2594_s0 + $0x3d8] sm:$0xff]  ;;  %v288_v5 = vld [vmem:[%s2593_s1 + $0x410] sm:$0xff] }
  0x68   :  { %813 = vmatprep.mubr.f32.mxu1 %v30_v6  ;;  %669 = vmatmul.mubr.f32.gmra.mxu0 %v27_v7  ;;  %v145_v6 = vld [vmem:[%s2594_s0 + $0x418] sm:$0xff]  ;;  %v147_v7 = vld [vmem:[%s2594_s0 + $0x428] sm:$0xff] }
  0x69   :  { %814 = vmatmul.mubr.f32.gmra.mxu1 %v29_v8  ;;  %1425 = vmatprep.subr.mxu0 %v300_v9  ;;  %v144_v8 = vld [vmem:[%s2594_s0 + $0x410] sm:$0xff] }
  0x6a   :  { %1480 = vmatprep.subr.mxu1 %v300_v9  ;;  %1426 = vmatpush3.msra.mxu0 %v300_v9 }
  0x6b   :  { %1496 = vmatpush3.msra.mxu1 %v300_v9  ;;  %673 = vmatprep.mubr.f32.mxu0 %v37_v10  ;;  %v146_v9 = vld [vmem:[%s2594_s0 + $0x420] sm:$0xff]  ;;  %v287_v10 = vld [vmem:[%s2593_s1 + $0x408] sm:$0xff] }
  0x6c   :  { %818 = vmatprep.mubr.f32.mxu1 %v39_v11  ;;  %674 = vmatmul.mubr.f32.gmra.mxu0 %v36_v12  ;;  %v154_v11 = vld [vmem:[%s2594_s0 + $0x460] sm:$0xff]  ;;  %v156_v12 = vld [vmem:[%s2594_s0 + $0x470] sm:$0xff] }
  0x6d   :  { %819 = vmatmul.mubr.f32.gmra.mxu1 %v38_v13  ;;  %1427 = vmatprep.subr.mxu0 %v299_v14  ;;  %v153_v13 = vld [vmem:[%s2594_s0 + $0x458] sm:$0xff] }
  0x6e   :  { %1481 = vmatprep.subr.mxu1 %v299_v14  ;;  %1428 = vmatpush3.msra.mxu0 %v299_v14 }
  0x6f   :  { %1497 = vmatpush3.msra.mxu1 %v299_v14  ;;  %678 = vmatprep.mubr.f32.mxu0 %v46_v15  ;;  %v155_v14 = vld [vmem:[%s2594_s0 + $0x468] sm:$0xff]  ;;  %v286_v15 = vld [vmem:[%s2593_s1 + $0x400] sm:$0xff] }
  0x70   :  { %823 = vmatprep.mubr.f32.mxu1 %v48_v16  ;;  %679 = vmatmul.mubr.f32.gmra.mxu0 %v45_v17  ;;  %v22_v16 = vld [vmem:[%s2594_s0 + $0x40] sm:$0xff] }
  0x71   :  { %824 = vmatmul.mubr.f32.gmra.mxu1 %v47_v18  ;;  %1429 = vmatprep.subr.mxu0 %v298_v19  ;;  %v94_v17 = vld [vmem:[%s2594_s0 + $0x280] sm:$0xff]  ;;  %v31_v18 = vld [vmem:[%s2594_s0 + $0x88] sm:$0xff] }
  0x72   :  { %1482 = vmatprep.subr.mxu1 %v298_v19  ;;  %1430 = vmatpush3.msra.mxu0 %v298_v19 }
  0x73   :  { %1498 = vmatpush3.msra.mxu1 %v298_v19  ;;  %683 = vmatprep.mubr.f32.mxu0 %v55_v20  ;;  %v103_v19 = vld [vmem:[%s2594_s0 + $0x2c8] sm:$0xff]  ;;  %v40_v20 = vld [vmem:[%s2594_s0 + $0xd0] sm:$0xff] }
  0x74   :  { %828 = vmatprep.mubr.f32.mxu1 %v57_v21  ;;  %684 = vmatmul.mubr.f32.gmra.mxu0 %v54_v22  ;;  %v112_v21 = vld [vmem:[%s2594_s0 + $0x310] sm:$0xff]  ;;  %v49_v22 = vld [vmem:[%s2594_s0 + $0x118] sm:$0xff] }
  0x75   :  { %829 = vmatmul.mubr.f32.gmra.mxu1 %v56_v23  ;;  %1431 = vmatprep.subr.mxu0 %v297_v24  ;;  %v121_v23 = vld [vmem:[%s2594_s0 + $0x358] sm:$0xff] }
  0x76   :  { %1483 = vmatprep.subr.mxu1 %v297_v24  ;;  %1432 = vmatpush3.msra.mxu0 %v297_v24 }
  0x77   :  { %1499 = vmatpush3.msra.mxu1 %v297_v24  ;;  %688 = vmatprep.mubr.f32.mxu0 %v64_v25  ;;  %v58_v24 = vld [vmem:[%s2594_s0 + $0x160] sm:$0xff] }
  0x78   :  { %833 = vmatprep.mubr.f32.mxu1 %v66_v26  ;;  %689 = vmatmul.mubr.f32.gmra.mxu0 %v63_v27  ;;  %v130_v25 = vld [vmem:[%s2594_s0 + $0x3a0] sm:$0xff]  ;;  %v67_v26 = vld [vmem:[%s2594_s0 + $0x1a8] sm:$0xff] }
  0x79   :  { %834 = vmatmul.mubr.f32.gmra.mxu1 %v65_v28  ;;  %1433 = vmatprep.subr.mxu0 %v296_v29  ;;  %v139_v27 = vld [vmem:[%s2594_s0 + $0x3e8] sm:$0xff]  ;;  %v76_v28 = vld [vmem:[%s2594_s0 + $0x1f0] sm:$0xff] }
  0x7a   :  { %1484 = vmatprep.subr.mxu1 %v296_v29  ;;  %1434 = vmatpush3.msra.mxu0 %v296_v29 }
  0x7b   :  { %1500 = vmatpush3.msra.mxu1 %v296_v29  ;;  %693 = vmatprep.mubr.f32.mxu0 %v73_v30  ;;  %v148_v29 = vld [vmem:[%s2594_s0 + $0x430] sm:$0xff]  ;;  %v85_v30 = vld [vmem:[%s2594_s0 + $0x238] sm:$0xff] }
  0x7c   :  { %838 = vmatprep.mubr.f32.mxu1 %v75_v31  ;;  %694 = vmatmul.mubr.f32.gmra.mxu0 %v72_v32  ;;  %v157_v31 = vld [vmem:[%s2594_s0 + $0x478] sm:$0xff] }
  0x7d   :  { %839 = vmatmul.mubr.f32.gmra.mxu1 %v74_v33  ;;  %1435 = vmatprep.subr.mxu0 %v295_v34 }
  0x7e   :  { %1485 = vmatprep.subr.mxu1 %v295_v34  ;;  %1436 = vmatpush3.msra.mxu0 %v295_v34 }
  0x7f   :  { %1501 = vmatpush3.msra.mxu1 %v295_v34  ;;  %698 = vmatprep.mubr.f32.mxu0 %v82_v35  ;;  %v2398_v34 = vld [vmem:[%s2595_s2] ss:$0 sm:$0xff] }
  0x80   :  { %843 = vmatprep.mubr.f32.mxu1 %v84_v36  ;;  %699 = vmatmul.mubr.f32.gmra.mxu0 %v81_v37 }
  0x81   :  { %844 = vmatmul.mubr.f32.gmra.mxu1 %v83_v38  ;;  %1437 = vmatprep.subr.mxu0 %v294_v39 }
  0x82   :  { %1486 = vmatprep.subr.mxu1 %v294_v39  ;;  %1438 = vmatpush3.msra.mxu0 %v294_v39 }
  0x83   :  { %1502 = vmatpush3.msra.mxu1 %v294_v39  ;;  %703 = vmatprep.mubr.f32.mxu0 %v91_v40 }
  0x84   :  { %848 = vmatprep.mubr.f32.mxu1 %v93_v41  ;;  %704 = vmatmul.mubr.f32.gmra.mxu0 %v90_v42 }
  0x85   :  { %849 = vmatmul.mubr.f32.gmra.mxu1 %v92_v43  ;;  %1439 = vmatprep.subr.mxu0 %v293_v44 }
  0x86   :  { %1487 = vmatprep.subr.mxu1 %v293_v44  ;;  %1440 = vmatpush3.msra.mxu0 %v293_v44 }
  0x87   :  { %1503 = vmatpush3.msra.mxu1 %v293_v44  ;;  %708 = vmatprep.mubr.f32.mxu0 %v100_v45 }
  0x88   :  { %853 = vmatprep.mubr.f32.mxu1 %v102_v46  ;;  %709 = vmatmul.mubr.f32.gmra.mxu0 %v99_v47 }
  0x89   :  { %854 = vmatmul.mubr.f32.gmra.mxu1 %v101_v48  ;;  %1441 = vmatprep.subr.mxu0 %v292_v49 }
  0x8a   :  { %1488 = vmatprep.subr.mxu1 %v292_v49  ;;  %1442 = vmatpush3.msra.mxu0 %v292_v49 }
  0x8b   :  { %1504 = vmatpush3.msra.mxu1 %v292_v49  ;;  %713 = vmatprep.mubr.f32.mxu0 %v109_v50 }
  0x8c   :  { %858 = vmatprep.mubr.f32.mxu1 %v111_v51  ;;  %714 = vmatmul.mubr.f32.gmra.mxu0 %v108_v52 }
  0x8d   :  { %859 = vmatmul.mubr.f32.gmra.mxu1 %v110_v53  ;;  %1443 = vmatprep.subr.mxu0 %v291_v54 }
  0x8e   :  { %1489 = vmatprep.subr.mxu1 %v291_v54  ;;  %1444 = vmatpush3.msra.mxu0 %v291_v54 }
  0x8f   :  { %1505 = vmatpush3.msra.mxu1 %v291_v54  ;;  %718 = vmatprep.mubr.f32.mxu0 %v118_v55 }
  0x90   :  { %863 = vmatprep.mubr.f32.mxu1 %v120_v56  ;;  %719 = vmatmul.mubr.f32.gmra.mxu0 %v117_v57 }
  0x91   :  { %864 = vmatmul.mubr.f32.gmra.mxu1 %v119_v58  ;;  %1445 = vmatprep.subr.mxu0 %v290_v59 }
  0x92   :  { %1490 = vmatprep.subr.mxu1 %v290_v59  ;;  %1446 = vmatpush3.msra.mxu0 %v290_v59 }
  0x93   :  { %1506 = vmatpush3.msra.mxu1 %v290_v59  ;;  %723 = vmatprep.mubr.f32.mxu0 %v127_v60 }
  0x94   :  { %868 = vmatprep.mubr.f32.mxu1 %v129_v61  ;;  %724 = vmatmul.mubr.f32.gmra.mxu0 %v126_v62 }
  0x95   :  { %869 = vmatmul.mubr.f32.gmra.mxu1 %v128_v63  ;;  %1447 = vmatprep.subr.mxu0 %v289_v0 }
  0x96   :  { %1491 = vmatprep.subr.mxu1 %v289_v0  ;;  %1448 = vmatpush3.msra.mxu0 %v289_v0 }
  0x97   :  { %1507 = vmatpush3.msra.mxu1 %v289_v0  ;;  %728 = vmatprep.mubr.f32.mxu0 %v136_v1 }
  0x98   :  { %873 = vmatprep.mubr.f32.mxu1 %v138_v2  ;;  %729 = vmatmul.mubr.f32.gmra.mxu0 %v135_v3 }
  0x99   :  { %874 = vmatmul.mubr.f32.gmra.mxu1 %v137_v4  ;;  %1449 = vmatprep.subr.mxu0 %v288_v5 }
  0x9a   :  { %1492 = vmatprep.subr.mxu1 %v288_v5  ;;  %1450 = vmatpush3.msra.mxu0 %v288_v5 }
  0x9b   :  { %1508 = vmatpush3.msra.mxu1 %v288_v5  ;;  %733 = vmatprep.mubr.f32.mxu0 %v145_v6 }
  0x9c   :  { %878 = vmatprep.mubr.f32.mxu1 %v147_v7  ;;  %734 = vmatmul.mubr.f32.gmra.mxu0 %v144_v8 }
  0x9d   :  { %879 = vmatmul.mubr.f32.gmra.mxu1 %v146_v9  ;;  %1451 = vmatprep.subr.mxu0 %v287_v10 }
  0x9e   :  { %1493 = vmatprep.subr.mxu1 %v287_v10  ;;  %1452 = vmatpush3.msra.mxu0 %v287_v10 }
  0x9f   :  { %1509 = vmatpush3.msra.mxu1 %v287_v10  ;;  %738 = vmatprep.mubr.f32.mxu0 %v154_v11 }
  0xa0   :  { %883 = vmatprep.mubr.f32.mxu1 %v156_v12  ;;  %739 = vmatmul.mubr.f32.gmra.mxu0 %v153_v13 }
  0xa1   :  { %884 = vmatmul.mubr.f32.gmra.mxu1 %v155_v14  ;;  %1453 = vmatprep.subr.mxu0 %v286_v15 }
  0xa2   :  { %1494 = vmatprep.subr.mxu1 %v286_v15  ;;  %1454 = vmatpush3.msra.mxu0 %v286_v15 }
  0xa3   :  { %1510 = vmatpush3.msra.mxu1 %v286_v15  ;;  %1455 = vmatprep.mubr.f32.mxu0 %v22_v16 }
  0xa4   :  { %1467 = vmatprep.mubr.f32.mxu1 %v94_v17  ;;  %1456 = vmatmul.mubr.f32.vlgmr.msra.gmra.mxu0 %v31_v18 }
  0xa5   :  { %1468 = vmatmul.mubr.f32.vlgmr.msra.gmra.mxu1 %v103_v19  ;;  %1458 = vmatprep.mubr.f32.mxu0 %v40_v20 }
  0xa6   :  { %1470 = vmatprep.mubr.f32.mxu1 %v112_v21 }
  0xa8   :  { %1459 = vmatmul.mubr.f32.gmra.mxu0 %v49_v22 }
  0xa9   :  { %1471 = vmatmul.mubr.f32.gmra.mxu1 %v121_v23  ;;  %1461 = vmatprep.mubr.f32.mxu0 %v58_v24 }
  0xaa   :  { %1473 = vmatprep.mubr.f32.mxu1 %v130_v25 }
  0xac   :  { %1462 = vmatmul.mubr.f32.gmra.mxu0 %v67_v26 }
  0xad   :  { %1474 = vmatmul.mubr.f32.gmra.mxu1 %v139_v27  ;;  %1464 = vmatprep.mubr.f32.mxu0 %v76_v28 }
  0xae   :  { %1476 = vmatprep.mubr.f32.mxu1 %v148_v29 }
  0xb0   :  { %1465 = vmatmul.mubr.f32.gmra.mxu0 %v85_v30 }
  0xb1   :  { %1477 = vmatmul.mubr.f32.gmra.mxu1 %v157_v31 }
  0xe4   :  { %v1103_v32 = vpop.f32.mrf.mxu0 }
  0xe5   :  { %v1183_v33 = vpop.f32.mrf.mxu1 }
  0xe6   :  { %v1104_v35 = vpop.f32.mrf.mxu0 }
  0xe7   :  { %v1184_v36 = vpop.f32.mrf.mxu1  ;;  %v1105_v37 = vadd.f32 %v1104_v35, %v1103_v32 }
  0xe8   :  { %v1185_v38 = vadd.f32 %v1184_v36, %v1183_v33  ;;  %v1106_v39 = vpop.f32.mrf.mxu0 }
  0xe9   :  { %v1186_v40 = vpop.f32.mrf.mxu1  ;;  %v376_v41 = vadd.f32 %v1105_v37, %v2398_v34 }
  0xea   :  { %v1107_v42 = vpop.f32.mrf.mxu0 }
  0xeb   :  { %v1187_v43 = vpop.f32.mrf.mxu1  ;;  %v2401_v44 = vadd.f32 %v1185_v38, %v376_v41  ;;  %v1108_v45 = vadd.f32 %v1107_v42, %v1106_v39 }
  0xec   :  { %v1188_v46 = vadd.f32 %v1187_v43, %v1186_v40  ;;  %v1109_v47 = vpop.f32.mrf.mxu0 }
  0xed   :  { %v1189_v48 = vpop.f32.mrf.mxu1  ;;  %v381_v49 = vadd.f32 %v1108_v45, %v2398_v34 }
  0xee   :  { %v1110_v50 = vpop.f32.mrf.mxu0 }
  0xef   :  { %v1190_v51 = vpop.f32.mrf.mxu1  ;;  %v2404_v52 = vadd.f32 %v1188_v46, %v381_v49  ;;  %v1111_v53 = vadd.f32 %v1110_v50, %v1109_v47 }
  0xf0   :  { %v1191_v54 = vadd.f32 %v1190_v51, %v1189_v48  ;;  %v1112_v55 = vpop.f32.mrf.mxu0 }
  0xf1   :  { %v1192_v56 = vpop.f32.mrf.mxu1  ;;  %v386_v57 = vadd.f32 %v1111_v53, %v2398_v34 }
  0xf2   :  { %v1113_v58 = vpop.f32.mrf.mxu0 }
  0xf3   :  { %v1193_v59 = vpop.f32.mrf.mxu1  ;;  %v2407_v60 = vadd.f32 %v1191_v54, %v386_v57  ;;  %v1114_v61 = vadd.f32 %v1113_v58, %v1112_v55 }
  0xf4   :  { %v1194_v62 = vadd.f32 %v1193_v59, %v1192_v56  ;;  %v1115_v63 = vpop.f32.mrf.mxu0 }
  0xf5   :  { %v1195_v0 = vpop.f32.mrf.mxu1  ;;  %v391_v1 = vadd.f32 %v1114_v61, %v2398_v34 }
  0xf6   :  { %v1116_v2 = vpop.f32.mrf.mxu0 }
  0xf7   :  { %v1196_v3 = vpop.f32.mrf.mxu1  ;;  %v2410_v4 = vadd.f32 %v1194_v62, %v391_v1  ;;  %v1117_v5 = vadd.f32 %v1116_v2, %v1115_v63 }
  0xf8   :  { %v1197_v6 = vadd.f32 %v1196_v3, %v1195_v0  ;;  %v1118_v7 = vpop.f32.mrf.mxu0 }
  0xf9   :  { %v1198_v8 = vpop.f32.mrf.mxu1  ;;  %v396_v9 = vadd.f32 %v1117_v5, %v2398_v34 }
  0xfa   :  { %v1119_v10 = vpop.f32.mrf.mxu0 }
  0xfb   :  { %v1199_v11 = vpop.f32.mrf.mxu1  ;;  %v2413_v12 = vadd.f32 %v1197_v6, %v396_v9  ;;  %v1120_v13 = vadd.f32 %v1119_v10, %v1118_v7 }
  0xfc   :  { %v1200_v14 = vadd.f32 %v1199_v11, %v1198_v8  ;;  %v1121_v15 = vpop.f32.mrf.mxu0 }
  0xfd   :  { %v1201_v16 = vpop.f32.mrf.mxu1  ;;  %v401_v17 = vadd.f32 %v1120_v13, %v2398_v34 }
  0xfe   :  { %v1122_v18 = vpop.f32.mrf.mxu0 }
  0xff   :  { %v1202_v19 = vpop.f32.mrf.mxu1  ;;  %v2416_v20 = vadd.f32 %v1200_v14, %v401_v17  ;;  %v1123_v21 = vadd.f32 %v1122_v18, %v1121_v15 }
 0x100   :  { %v1203_v22 = vadd.f32 %v1202_v19, %v1201_v16  ;;  %v1124_v23 = vpop.f32.mrf.mxu0 }
 0x101   :  { %v1204_v24 = vpop.f32.mrf.mxu1  ;;  %v406_v25 = vadd.f32 %v1123_v21, %v2398_v34 }
 0x102   :  { %v1125_v26 = vpop.f32.mrf.mxu0 }
 0x103   :  { %v1205_v27 = vpop.f32.mrf.mxu1  ;;  %v2419_v28 = vadd.f32 %v1203_v22, %v406_v25  ;;  %v1126_v29 = vadd.f32 %v1125_v26, %v1124_v23 }
 0x104   :  { %v1206_v30 = vadd.f32 %v1205_v27, %v1204_v24  ;;  %v1127_v31 = vpop.f32.mrf.mxu0 }
 0x105   :  { %2597 = vst [vmem:[#allocation2_spill] sm:$0xff] %v2419_v28  ;;  %v1207_v32 = vpop.f32.mrf.mxu1  ;;  %v411_v33 = vadd.f32 %v1126_v29, %v2398_v34 }
 0x106   :  { %v1128_v35 = vpop.f32.mrf.mxu0 }
 0x107   :  { %v1208_v36 = vpop.f32.mrf.mxu1  ;;  %v2422_v37 = vadd.f32 %v1206_v30, %v411_v33  ;;  %v1129_v38 = vadd.f32 %v1128_v35, %v1127_v31 }
 0x108   :  { %v1209_v39 = vadd.f32 %v1208_v36, %v1207_v32  ;;  %v1130_v40 = vpop.f32.mrf.mxu0 }
 0x109   :  { %2598 = vst [vmem:[#allocation3_spill] sm:$0xff] %v2422_v37  ;;  %v1210_v41 = vpop.f32.mrf.mxu1  ;;  %v416_v42 = vadd.f32 %v1129_v38, %v2398_v34 }
 0x10a   :  { %v1131_v43 = vpop.f32.mrf.mxu0 }
 0x10b   :  { %v1211_v45 = vpop.f32.mrf.mxu1  ;;  %v2425_v46 = vadd.f32 %v1209_v39, %v416_v42  ;;  %v1132_v47 = vadd.f32 %v1131_v43, %v1130_v40 }
 0x10c   :  { %v1212_v48 = vadd.f32 %v1211_v45, %v1210_v41  ;;  %v1133_v49 = vpop.f32.mrf.mxu0 }
 0x10d   :  { %v1213_v50 = vpop.f32.mrf.mxu1  ;;  %v421_v51 = vadd.f32 %v1132_v47, %v2398_v34 }
 0x10e   :  { %v1134_v53 = vpop.f32.mrf.mxu0 }
 0x10f   :  { %v1214_v54 = vpop.f32.mrf.mxu1  ;;  %v2428_v55 = vadd.f32 %v1212_v48, %v421_v51  ;;  %v1135_v56 = vadd.f32 %v1134_v53, %v1133_v49 }
 0x110   :  { %v1215_v57 = vadd.f32 %v1214_v54, %v1213_v50  ;;  %v1136_v58 = vpop.f32.mrf.mxu0 }
 0x111   :  { %v1216_v59 = vpop.f32.mrf.mxu1  ;;  %v426_v61 = vadd.f32 %v1135_v56, %v2398_v34 }
 0x112   :  { %v1137_v62 = vpop.f32.mrf.mxu0 }
 0x113   :  { %v1217_v63 = vpop.f32.mrf.mxu1  ;;  %v2431_v0 = vadd.f32 %v1215_v57, %v426_v61  ;;  %v1138_v1 = vadd.f32 %v1137_v62, %v1136_v58 }
 0x114   :  { %v1218_v2 = vadd.f32 %v1217_v63, %v1216_v59  ;;  %v1139_v3 = vpop.f32.mrf.mxu0 }
 0x115   :  { %2599 = vst [vmem:[#allocation4_spill] sm:$0xff] %v2431_v0  ;;  %v1219_v5 = vpop.f32.mrf.mxu1  ;;  %v431_v6 = vadd.f32 %v1138_v1, %v2398_v34 }
 0x116   :  { %v1140_v7 = vpop.f32.mrf.mxu0 }
 0x117   :  { %v1220_v8 = vpop.f32.mrf.mxu1  ;;  %v2434_v9 = vadd.f32 %v1218_v2, %v431_v6  ;;  %v1141_v10 = vadd.f32 %v1140_v7, %v1139_v3 }
 0x118   :  { %v1221_v11 = vadd.f32 %v1220_v8, %v1219_v5  ;;  %v1142_v13 = vpop.f32.mrf.mxu0 }
 0x119   :  { %2600 = vst [vmem:[#allocation5_spill] sm:$0xff] %v2434_v9  ;;  %v1222_v14 = vpop.f32.mrf.mxu1  ;;  %v436_v15 = vadd.f32 %v1141_v10, %v2398_v34 }
 0x11a   :  { %v1143_v16 = vpop.f32.mrf.mxu0 }
 0x11b   :  { %v1223_v17 = vpop.f32.mrf.mxu1  ;;  %v2437_v18 = vadd.f32 %v1221_v11, %v436_v15  ;;  %v1144_v19 = vadd.f32 %v1143_v16, %v1142_v13 }
 0x11c   :  { %v1224_v21 = vadd.f32 %v1223_v17, %v1222_v14  ;;  %v1145_v22 = vpop.f32.mrf.mxu0 }
 0x11d   :  { %2601 = vst [vmem:[#allocation6_spill] sm:$0xff] %v2437_v18  ;;  %v1225_v23 = vpop.f32.mrf.mxu1  ;;  %v441_v24 = vadd.f32 %v1144_v19, %v2398_v34 }
 0x11e   :  { %v1146_v25 = vpop.f32.mrf.mxu0 }
 0x11f   :  { %v1226_v26 = vpop.f32.mrf.mxu1  ;;  %v2440_v27 = vadd.f32 %v1224_v21, %v441_v24  ;;  %v1147_v29 = vadd.f32 %v1146_v25, %v1145_v22 }
 0x120   :  { %v1227_v30 = vadd.f32 %v1226_v26, %v1225_v23  ;;  %v1148_v31 = vpop.f32.mrf.mxu0 }
 0x121   :  { %2602 = vst [vmem:[#allocation7_spill] sm:$0xff] %v2440_v27  ;;  %v1228_v32 = vpop.f32.mrf.mxu1  ;;  %v446_v33 = vadd.f32 %v1147_v29, %v2398_v34 }
 0x122   :  { %v1149_v35 = vpop.f32.mrf.mxu0 }
 0x123   :  { %v1229_v36 = vpop.f32.mrf.mxu1  ;;  %v2443_v38 = vadd.f32 %v1227_v30, %v446_v33  ;;  %v1150_v39 = vadd.f32 %v1149_v35, %v1148_v31 }
 0x124   :  { %v1230_v40 = vadd.f32 %v1229_v36, %v1228_v32  ;;  %v1263_v41 = vpop.f32.mrf.mxu0 }
 0x125   :  { %2603 = vst [vmem:[#allocation8_spill] sm:$0xff] %v2443_v38  ;;  %v2445_v42 = vpop.f32.mrf.mxu1  ;;  %v451_v43 = vadd.f32 %v1150_v39, %v2398_v34 }
 0x126   :  { %v1264_v45 = vpop.f32.mrf.mxu0 }
 0x127   :  { %v1344_v47 = vpop.f32.mrf.mxu1  ;;  %v2448_v48 = vadd.f32 %v1230_v40, %v451_v43  ;;  %v1265_v38 = vadd.f32 %v1264_v45, %v1263_v41 }
 0x128   :  { %v1266_v49 = vpop.f32.mrf.mxu0  ;;  %v1345_v9 = vadd.f32 %v1344_v47, %v2445_v42 }
 0x129   :  { %2604 = vst [vmem:[#allocation9_spill] sm:$0xff] %v2448_v48  ;;  %v2450_v50 = vpop.f32.mrf.mxu1  ;;  %v666_v27 = vadd.f32 %v1265_v38, %v2401_v44 }
 0x12a   :  { %v1267_v51 = vpop.f32.mrf.mxu0 }
 0x12b   :  { %v1347_v53 = vpop.f32.mrf.mxu1  ;;  %v1268_v48 = vadd.f32 %v1267_v51, %v1266_v49 }
 0x12c   :  { %v1269_v54 = vpop.f32.mrf.mxu0  ;;  %v1348_v49 = vadd.f32 %v1347_v53, %v2450_v50 }
 0x12d   :  { %v2452_v56 = vpop.f32.mrf.mxu1  ;;  %v671_v41 = vadd.f32 %v1268_v48, %v2404_v52 }
 0x12e   :  { %v1270_v57 = vpop.f32.mrf.mxu0 }
 0x12f   :  { %v2454_v58 = vpop.f32.mrf.mxu1 }
 0x130   :  { %v1272_v59 = vpop.f32.mrf.mxu0  ;;  %v1351_v42 = vadd.f32 %v2454_v58, %v2452_v56 }
 0x131   :  { %v2456_v61 = vpop.f32.mrf.mxu1 }
 0x132   :  { %v1273_v62 = vpop.f32.mrf.mxu0 }
 0x133   :  { %v2458_v34 = vpop.f32.mrf.mxu1 }
 0x134   :  { %v1275_v63 = vpop.f32.mrf.mxu0  ;;  %v1354_v50 = vadd.f32 %v2458_v34, %v2456_v61 }
 0x135   :  { %v2460_v1 = vpop.f32.mrf.mxu1 }
 0x136   :  { %v1276_v2 = vpop.f32.mrf.mxu0 }
 0x137   :  { %v2462_v3 = vpop.f32.mrf.mxu1  ;;  %v1277_v0 = vadd.f32 %v1276_v2, %v1275_v63  ;;  %v816_v63 = vadd.f32 %v1348_v49, %v671_v41 }
 0x138   :  { %v1278_v5 = vpop.f32.mrf.mxu0 }
 0x139   :  { %v2464_v6 = vpop.f32.mrf.mxu1  ;;  %v686_v52 = vadd.f32 %v1277_v0, %v2413_v12 }
 0x13a   :  { %v1279_v7 = vpop.f32.mrf.mxu0 }
 0x13b   :  { %v2466_v8 = vpop.f32.mrf.mxu1  ;;  %v1280_v28 = vadd.f32 %v1279_v7, %v1278_v5 }
 0x13c   :  { %v1281_v10 = vpop.f32.mrf.mxu0 }
 0x13d   :  { %v2468_v11 = vpop.f32.mrf.mxu1  ;;  %v691_v47 = vadd.f32 %v1280_v28, %v2416_v20  ;;  %v2616_v28 = vld [vmem:[#allocation5_spill] sm:$0xff] }
 0x13e   :  { %2605 = vst [vmem:[#allocation10_spill] sm:$0xff] %v2468_v11  ;;  %v1282_v13 = vpop.f32.mrf.mxu0 }
 0x13f   :  { %v2470_v14 = vpop.f32.mrf.mxu1 }
 0x140   :  { %2606 = vst [vmem:[#allocation11_spill] sm:$0xff] %v2470_v14  ;;  %v2472_v15 = vpop.f32.mrf.mxu0 }
 0x141   :  { %2607 = vst [vmem:[#allocation12_spill] sm:$0xff] %v2472_v15  ;;  %v2474_v16 = vpop.f32.mrf.mxu1 }
 0x142   :  { %2608 = vst [vmem:[#allocation13_spill] sm:$0xff] %v2474_v16  ;;  %v2476_v17 = vpop.f32.mrf.mxu0 }
 0x143   :  { %2609 = vst [vmem:[#allocation14_spill] sm:$0xff] %v2476_v17  ;;  %v2478_v19 = vpop.f32.mrf.mxu1  ;;  %v1274_v17 = vadd.f32 %v1273_v62, %v1272_v59  ;;  %v811_v59 = vadd.f32 %v1345_v9, %v666_v27  ;;  %v1357_v9 = vadd.f32 %v2462_v3, %v2460_v1  ;;  %v1360_v27 = vadd.f32 %v2466_v8, %v2464_v6  ;;  %v2618_v1 = vld [vmem:[#allocation2_spill] sm:$0xff]  ;;  %v2619_v6 = vld [vmem:[#allocation4_spill] sm:$0xff] }
 0x144   :  { %2610 = vst [vmem:[#allocation15_spill] sm:$0xff] %v2478_v19  ;;  %v1287_v21 = vpop.f32.mrf.mxu0 }
 0x145   :  { %v2480_v22 = vpop.f32.mrf.mxu1  ;;  %v681_v44 = vadd.f32 %v1274_v17, %v2410_v4 }
 0x146   :  { %2611 = vst [vmem:[#allocation16_spill] sm:$0xff] %v2480_v22  ;;  %v1288_v23 = vpop.f32.mrf.mxu0 }
 0x147   :  { %v1368_v24 = vpop.f32.mrf.mxu1  ;;  %v1289_v51 = vadd.f32 %v1288_v23, %v1287_v21  ;;  %v826_v61 = vadd.f32 %v1354_v50, %v681_v44 }
 0x148   :  { %v1290_v25 = vpop.f32.mrf.mxu0 }
 0x149   :  { %v1370_v26 = vpop.f32.mrf.mxu1  ;;  %v706_v12 = vadd.f32 %v1289_v51, %v2425_v46 }
 0x14a   :  { %v1291_v29 = vpop.f32.mrf.mxu0  ;;  %v2621_v23 = vld [vmem:[#allocation14_spill] sm:$0xff] }
 0x14b   :  { %v1371_v30 = vpop.f32.mrf.mxu1  ;;  %v1292_v22 = vadd.f32 %v1291_v29, %v1290_v25 }
 0x14c   :  { %v1293_v31 = vpop.f32.mrf.mxu0  ;;  %v1372_v20 = vadd.f32 %v1371_v30, %v1370_v26 }
 0x14d   :  { %v2482_v32 = vpop.f32.mrf.mxu1  ;;  %v711_v48 = vadd.f32 %v1292_v22, %v2428_v55  ;;  %v2617_v2 = vld [vmem:[#allocation16_spill] sm:$0xff] }
 0x14e   :  { %2612 = vst [vmem:[#allocation17_spill] sm:$0xff] %v2482_v32  ;;  %v1294_v33 = vpop.f32.mrf.mxu0  ;;  %v1271_v32 = vadd.f32 %v1270_v57, %v1269_v54  ;;  %v1369_v5 = vadd.f32 %v1368_v24, %v2617_v2 }
 0x14f   :  { %v2484_v35 = vpop.f32.mrf.mxu1  ;;  %v1295_v53 = vadd.f32 %v1294_v33, %v1293_v31  ;;  %v856_v7 = vadd.f32 %v1372_v20, %v711_v48 }
 0x150   :  { %2613 = vst [vmem:[#allocation18_spill] sm:$0xff] %v2484_v35  ;;  %v1296_v36 = vpop.f32.mrf.mxu0  ;;  %v851_v29 = vadd.f32 %v1369_v5, %v706_v12  ;;  %v2632_v5 = vld [vmem:[#allocation8_spill] sm:$0xff] }
 0x151   :  { %v1376_v39 = vpop.f32.mrf.mxu1  ;;  %v716_v8 = vadd.f32 %v1295_v53, %v2619_v6  ;;  %v2626_v53 = vld [vmem:[#allocation3_spill] sm:$0xff] }
 0x152   :  { %v1297_v40 = vpop.f32.mrf.mxu0 }
 0x153   :  { %v1377_v43 = vpop.f32.mrf.mxu1  ;;  %v1298_v38 = vadd.f32 %v1297_v40, %v1296_v36 }
 0x154   :  { %v1299_v14 = vpop.f32.mrf.mxu0  ;;  %v1378_v46 = vadd.f32 %v1377_v43, %v1376_v39  ;;  %v2625_v43 = vld [vmem:[#allocation6_spill] sm:$0xff] }
 0x155   :  { %v2486_v11 = vpop.f32.mrf.mxu1  ;;  %v721_v55 = vadd.f32 %v1298_v38, %v2616_v28  ;;  %v2622_v24 = vld [vmem:[#allocation17_spill] sm:$0xff] }
 0x156   :  { %2614 = vst [vmem:[#allocation19_spill] sm:$0xff] %v2486_v11  ;;  %v1300_v19 = vpop.f32.mrf.mxu0 }
 0x157   :  { %v2488_v16 = vpop.f32.mrf.mxu1  ;;  %v1301_v17 = vadd.f32 %v1300_v19, %v1299_v14  ;;  %v2623_v30 = vld [vmem:[#allocation18_spill] sm:$0xff]  ;;  %v866_v41 = vadd.f32 %v1378_v46, %v721_v55 }
 0x158   :  { %2615 = vst [vmem:[#allocation20_spill] sm:$0xff] %v2488_v16  ;;  %v1302_v37 = vpop.f32.mrf.mxu0  ;;  %v676_v16 = vadd.f32 %v1271_v32, %v2407_v60  ;;  %v1283_v60 = vadd.f32 %v1282_v13, %v1281_v10  ;;  %v836_v10 = vadd.f32 %v1360_v27, %v691_v47  ;;  %v2518_v13 = vadd.f32 %v1357_v9, %v686_v52  ;;  %v2624_v32 = vld [vmem:[#allocation7_spill] sm:$0xff] }
 0x159   :  { %v2490_v18 = vpop.f32.mrf.mxu1  ;;  %v1375_v31 = vadd.f32 %v2623_v30, %v2622_v24  ;;  %v726_v51 = vadd.f32 %v1301_v17, %v2625_v43 }
 0x15a   :  { %v1303_v35 = vpop.f32.mrf.mxu0  ;;  %v821_v34 = vadd.f32 %v1351_v42, %v676_v16  ;;  %v2521_v3 = vadd.f32 %v1283_v60, %v2618_v1 }
 0x15b   :  { %v1383_v15 = vpop.f32.mrf.mxu1  ;;  %v1304_v0 = vadd.f32 %v1303_v35, %v1302_v37  ;;  %v2620_v37 = vld [vmem:[#allocation12_spill] sm:$0xff]  ;;  %v861_v47 = vadd.f32 %v1375_v31, %v716_v8 }
 0x15c   :  { %v1305_v45 = vpop.f32.mrf.mxu0  ;;  %v1286_v25 = vadd.f32 %v2621_v23, %v2620_v37  ;;  %v1384_v44 = vadd.f32 %v1383_v15, %v2490_v18  ;;  %v2633_v37 = vld [vmem:[#allocation10_spill] sm:$0xff]  ;;  %v2634_v23 = vld [vmem:[#allocation11_spill] sm:$0xff] }
 0x15d   :  { %v2495_v11 = vpop.f32.mrf.mxu1  ;;  %v731_v33 = vadd.f32 %v1304_v0, %v2624_v32 }
 0x15e   :  { %v1306_v54 = vpop.f32.mrf.mxu0 }
 0x15f   :  { %v2500_v57 = vpop.f32.mrf.mxu1  ;;  %v1307_v38 = vadd.f32 %v1306_v54, %v1305_v45  ;;  %v2628_v18 = vld [vmem:[#allocation20_spill] sm:$0xff]  ;;  %v2629_v45 = vld [vmem:[#allocation9_spill] sm:$0xff]  ;;  %v876_v12 = vadd.f32 %v1384_v44, %v731_v33 }
 0x160   :  { %v1308_v4 = vpop.f32.mrf.mxu0 }
 0x161   :  { %v2509_v62 = vpop.f32.mrf.mxu1 }
 0x162   :  { %v1309_v56 = vpop.f32.mrf.mxu0 }
 0x163   :  { %v1389_v58 = vpop.f32.mrf.mxu1  ;;  %v1310_v35 = vadd.f32 %v1309_v56, %v1308_v4  ;;  %v701_v4 = vadd.f32 %v1286_v25, %v2626_v53  ;;  %v2630_v56 = vld [vmem:[#allocation13_spill] sm:$0xff]  ;;  %v1363_v25 = vadd.f32 %v2634_v23, %v2633_v37 }
 0x164   :  { %v1457_v21 = vpop.f32.mrf.mxu0  ;;  %v1390_v1 = vadd.f32 %v1389_v58, %v2509_v62  ;;  %v1387_v62 = vadd.f32 %v2500_v57, %v2495_v11 }
 0x165   :  { %v1469_v22 = vpop.f32.mrf.mxu1  ;;  %v961_v26 = vadd.f32 %v1457_v21, %v816_v63  ;;  %v2627_v63 = vld [vmem:[#allocation19_spill] sm:$0xff]  ;;  %v741_v54 = vadd.f32 %v1310_v35, %v2629_v45  ;;  %v841_v11 = vadd.f32 %v1363_v25, %v2521_v3 }
 0x166   :  { %v1001_v16 = vadd.f32 %v1469_v22, %v856_v7  ;;  %v955_v36 = vpop.f32.mrf.mxu0  ;;  %v1381_v15 = vadd.f32 %v2628_v18, %v2627_v63  ;;  %v736_v7 = vadd.f32 %v1307_v38, %v2632_v5 }
 0x167   :  { %v995_v40 = vpop.f32.mrf.mxu1  ;;  %v1035_v49 = vmax.f32 %v961_v26, 0.0  ;;  %v956_v14 = vadd.f32 %v955_v36, %v811_v59 }
 0x168   :  { %v1043_v39 = vmax.f32 %v1001_v16, 0.0  ;;  %v996_v19 = vadd.f32 %v995_v40, %v851_v29  ;;  %v1460_v42 = vpop.f32.mrf.mxu0  ;;  %v871_v46 = vadd.f32 %v1381_v15, %v726_v51  ;;  %v886_v29 = vadd.f32 %v1390_v1, %v741_v54 }
 0x169   :  { %v1472_v52 = vpop.f32.mrf.mxu1  ;;  %1051 = vst [vmem:[%s2596_s3 + $0x8] sm:$0xff] %v1035_v49  ;;  %v1034_v48 = vmax.f32 %v956_v14, 0.0  ;;  %v971_v59 = vadd.f32 %v1460_v42, %v826_v61  ;;  %v2631_v61 = vld [vmem:[#allocation15_spill] sm:$0xff]  ;;  %v881_v57 = vadd.f32 %v1387_v62, %v736_v7 }
 0x16a   :  { %1059 = vst [vmem:[%s2596_s3 + $0x48] sm:$0xff] %v1043_v39  ;;  %v1042_v50 = vmax.f32 %v996_v19, 0.0  ;;  %v1011_v60 = vadd.f32 %v1472_v52, %v866_v41  ;;  %v965_v9 = vpop.f32.mrf.mxu0  ;;  %v1366_v2 = vadd.f32 %v2631_v61, %v2630_v56 }
 0x16b   :  { %v1005_v27 = vpop.f32.mrf.mxu1  ;;  %1050 = vst [vmem:[%s2596_s3] sm:$0xff] %v1034_v48  ;;  %v1037_v20 = vmax.f32 %v971_v59, 0.0  ;;  %v966_v55 = vadd.f32 %v965_v9, %v821_v34 }
 0x16c   :  { %1058 = vst [vmem:[%s2596_s3 + $0x40] sm:$0xff] %v1042_v50  ;;  %v1045_v28 = vmax.f32 %v1011_v60, 0.0  ;;  %v1006_v0 = vadd.f32 %v1005_v27, %v861_v47  ;;  %v1463_v6 = vpop.f32.mrf.mxu0  ;;  %v846_v16 = vadd.f32 %v1366_v2, %v701_v4 }
 0x16d   :  { %v1475_v8 = vpop.f32.mrf.mxu1  ;;  %1053 = vst [vmem:[%s2596_s3 + $0x18] sm:$0xff] %v1037_v20  ;;  %v1036_v34 = vmax.f32 %v966_v55, 0.0  ;;  %v981_v21 = vadd.f32 %v1463_v6, %v836_v10 }
 0x16e   :  { %1061 = vst [vmem:[%s2596_s3 + $0x58] sm:$0xff] %v1045_v28  ;;  %v1044_v17 = vmax.f32 %v1006_v0, 0.0  ;;  %v1021_v22 = vadd.f32 %v1475_v8, %v876_v12  ;;  %v975_v58 = vpop.f32.mrf.mxu0 }
 0x16f   :  { %v1015_v26 = vpop.f32.mrf.mxu1  ;;  %1052 = vst [vmem:[%s2596_s3 + $0x10] sm:$0xff] %v1036_v34  ;;  %v1039_v10 = vmax.f32 %v981_v21, 0.0  ;;  %v976_v30 = vadd.f32 %v975_v58, %v2518_v13 }
 0x170   :  { %1060 = vst [vmem:[%s2596_s3 + $0x50] sm:$0xff] %v1044_v17  ;;  %v1047_v24 = vmax.f32 %v1021_v22, 0.0  ;;  %v1016_v31 = vadd.f32 %v1015_v26, %v871_v46  ;;  %v1466_v32 = vpop.f32.mrf.mxu0 }
 0x171   :  { %v1478_v33 = vpop.f32.mrf.mxu1  ;;  %1055 = vst [vmem:[%s2596_s3 + $0x28] sm:$0xff] %v1039_v10  ;;  %v1038_v35 = vmax.f32 %v976_v30, 0.0  ;;  %v991_v40 = vadd.f32 %v1466_v32, %v846_v16 }
 0x172   :  { %1063 = vst [vmem:[%s2596_s3 + $0x68] sm:$0xff] %v1047_v24  ;;  %v1046_v36 = vmax.f32 %v1016_v31, 0.0  ;;  %v1031_v41 = vadd.f32 %v1478_v33, %v886_v29  ;;  %v985_v49 = vpop.f32.mrf.mxu0 }
 0x173   :  { %v1025_v13 = vpop.f32.mrf.mxu1  ;;  %1054 = vst [vmem:[%s2596_s3 + $0x20] sm:$0xff] %v1038_v35  ;;  %v1041_v3 = vmax.f32 %v991_v40, 0.0  ;;  %v986_v14 = vadd.f32 %v985_v49, %v841_v11 }
 0x174   :  { %1062 = vst [vmem:[%s2596_s3 + $0x60] sm:$0xff] %v1046_v36  ;;  %v1049_v39 = vmax.f32 %v1031_v41, 0.0  ;;  %v1026_v19 = vadd.f32 %v1025_v13, %v881_v57 }
 0x175   :  { %1057 = vst [vmem:[%s2596_s3 + $0x38] sm:$0xff] %v1041_v3  ;;  %v1040_v43 = vmax.f32 %v986_v14, 0.0 }
 0x176   :  { %1065 = vst [vmem:[%s2596_s3 + $0x78] sm:$0xff] %v1049_v39  ;;  %v1048_v51 = vmax.f32 %v1026_v19, 0.0 }
 0x177   :  { %1056 = vst [vmem:[%s2596_s3 + $0x30] sm:$0xff] %v1040_v43 }
 0x178   :  { %1064 = vst [vmem:[%s2596_s3 + $0x70] sm:$0xff] %v1048_v51 }

// kernel: pcae_forward.9
= control target key start
LH: loop header
LB: loop body
LE: loop exit
PB: predicated region body
PF: predicated region fallthrough
CT: control target
= control target key end

     0   :  { %s5009_s18 = smov 0   ;;  %s7381_s0 = inlined_call_operand.vmem [shape: f32[2,4,128], index: 0, kind: input, shape index: {}]   ;;  %s7382_s1 = inlined_call_operand.vmem [shape: f32[24,128,24], index: 1, kind: input, shape index: {}]   ;;  %s7383_s2 = inlined_call_operand.vmem [shape: f32[24,1,24], index: 2, kind: input, shape index: {}]   ;;  %s7384_s3 = inlined_call_operand.vmem [shape: f32[2,24,1], index: 3, kind: input, shape index: {}]   ;;  %s7385_s4 = inlined_call_operand.vmem [shape: f32[24,121], index: 4, kind: input, shape index: {}]   ;;  %s7386_s5 = inlined_call_operand.vmem [shape: f32[2,24,144], index: 5, kind: output, shape index: {}]  }
   0x1 LB: > { %s3513_s19 = sadd.s32 4294967295, %s4969_s18   ;;  %p3517_p0 = scmp.ge.s32.totalorder %s4969_s18, 1  ;;  %s4969_s18 = sphi %s5009_s18, %s15_s18  }
   0x2   : > { %p196_p1 = scmp.lt.s32.totalorder %s4969_s18, 3 }
   0x4   : > { %p197_p2 = pnand %p3517_p0, %p196_p1 }
   0x6   : > { %200 = sbr.rel (%p197_p2) target bundleno = 1074 (0x432), region = 40 }
   0xb   : > { %v258_v0 = vld [vmem:[%s7382_s1 + $0x78] sm:$0xff]  ;;  %v4971_v2 = vmov 0.0   ;;  %v257_v3 = vld [vmem:[%s7382_s1 + $0x70] sm:$0xff]  ;;  %v256_v5 = vld [vmem:[%s7382_s1 + $0x68] sm:$0xff]  ;;  %p228_p3 = scmp.lt.s32.totalorder %s3513_s19, 1  ;;  %vm4972_vm0 = vmmov 0  }
   0xc   : > { %v274_v1 = vld [vmem:[%s7382_s1 + $0xf8] sm:$0xff]  ;;  %3955 = vmatprep.subr.mxu0 %v4971_v2  ;;  %3990 = vmatprep.subr.mxu1 %v4971_v2  ;;  %v273_v4 = vld [vmem:[%s7382_s1 + $0xf0] sm:$0xff]  ;;  %v272_v6 = vld [vmem:[%s7382_s1 + $0xe8] sm:$0xff]  ;;  %s4974_s22 = smov 6   ;;  %vm2475_vm1 = vcmask 191672   ;;  %s4975_s6 = smov 7  }
   0xd   : > { %3956 = vmatpush3.msra.mxu0 %v258_v0  ;;  %3991 = vmatpush3.msra.mxu1 %v274_v1  ;;  %v255_v7 = vld [vmem:[%s7382_s1 + $0x60] sm:$0xff]  ;;  %v254_v9 = vld [vmem:[%s7382_s1 + $0x58] sm:$0xff]  ;;  %v253_v11 = vld [vmem:[%s7382_s1 + $0x50] sm:$0xff]  ;;  %s7394_s19 = smov (!%p228_p3, %s3513_s19), 1  ;;  %vm2811_vm2 = vcmask 183296   ;;  %vm3299_vm3 = vcmask 1041409  }
   0xe   : > { %3957 = vmatprep.subr.mxu0 %v4971_v2  ;;  %3992 = vmatprep.subr.mxu1 %v4971_v2  ;;  %v271_v8 = vld [vmem:[%s7382_s1 + $0xe0] sm:$0xff]  ;;  %v270_v10 = vld [vmem:[%s7382_s1 + $0xd8] sm:$0xff]  ;;  %v269_v12 = vld [vmem:[%s7382_s1 + $0xd0] sm:$0xff]  ;;  %s3518_s30 = sshll.u32 %s7394_s19, 2  ;;  %s4795_s17 = smul.u32 24, %s7394_s19  ;;  %vm3302_vm4 = vcmask 1042434  }
   0xf   : > { %3958 = vmatpush3.msra.mxu0 %v257_v3  ;;  %3993 = vmatpush3.msra.mxu1 %v273_v4  ;;  %v252_v13 = vld [vmem:[%s7382_s1 + $0x48] sm:$0xff]  ;;  %v251_v15 = vld [vmem:[%s7382_s1 + $0x40] sm:$0xff]  ;;  %v250_v17 = vld [vmem:[%s7382_s1 + $0x38] sm:$0xff]  ;;  %s5145_s12 = scalar_lea.vmem %s7381_s0, %s3518_s30  ;;  %vm3305_vm5 = vcmask 1043459   ;;  %vm3308_vm6 = vcmask 1044484   ;;  %vm3311_vm7 = vcmask 1045509  }
  0x10   : > { %3959 = vmatprep.subr.mxu0 %v4971_v2  ;;  %3994 = vmatprep.subr.mxu1 %v4971_v2  ;;  %v268_v14 = vld [vmem:[%s7382_s1 + $0xc8] sm:$0xff]  ;;  %v267_v16 = vld [vmem:[%s7382_s1 + $0xc0] sm:$0xff]  ;;  %v266_v18 = vld [vmem:[%s7382_s1 + $0xb8] sm:$0xff]  ;;  %s236_s21 = scalar_lea.vmem %s7384_s3, %s4795_s17  ;;  %vm3314_vm8 = vcmask 1046534   ;;  %vm3317_vm9 = vcmask 1047559   ;;  %s4977_s9 = smov 121  }
  0x11   : > { %3960 = vmatpush3.msra.mxu0 %v256_v5  ;;  %3995 = vmatpush3.msra.mxu1 %v272_v6  ;;  %v249_v19 = vld [vmem:[%s7382_s1 + $0x30] sm:$0xff]  ;;  %v248_v21 = vld [vmem:[%s7382_s1 + $0x28] sm:$0xff]  ;;  %v247_v23 = vld [vmem:[%s7382_s1 + $0x20] sm:$0xff]  ;;  %s4978_s10 = smov 122   ;;  %s4796_s11 = smul.u32 48, %s7394_s19  ;;  %vm3440_vm10 = vcmask 130048  }
  0x12   : > { %3961 = vmatprep.subr.mxu0 %v4971_v2  ;;  %3996 = vmatprep.subr.mxu1 %v4971_v2  ;;  %v265_v20 = vld [vmem:[%s7382_s1 + $0xb0] sm:$0xff]  ;;  %v264_v22 = vld [vmem:[%s7382_s1 + $0xa8] sm:$0xff]  ;;  %v263_v24 = vld [vmem:[%s7382_s1 + $0xa0] sm:$0xff]  ;;  %vm3431_vm11 = vcmask 7168   ;;  %vm3435_vm12 = vcmask 56320  }
  0x13   : > { %3962 = vmatpush3.msra.mxu0 %v255_v7  ;;  %3997 = vmatpush3.msra.mxu1 %v271_v8  ;;  %v246_v25 = vld [vmem:[%s7382_s1 + $0x18] sm:$0xff]  ;;  %v245_v27 = vld [vmem:[%s7382_s1 + $0x10] sm:$0xff]  ;;  %v244_v29 = vld [vmem:[%s7382_s1 + $0x8] sm:$0xff]  ;;  %s241_s15 = scalar_lea.vmem %s7386_s5, %s4796_s11 }
  0x14   : > { %3963 = vmatprep.subr.mxu0 %v4971_v2  ;;  %3998 = vmatprep.subr.mxu1 %v4971_v2  ;;  %v262_v26 = vld [vmem:[%s7382_s1 + $0x98] sm:$0xff]  ;;  %v261_v28 = vld [vmem:[%s7382_s1 + $0x90] sm:$0xff]  ;;  %v260_v30 = vld [vmem:[%s7382_s1 + $0x88] sm:$0xff] }
  0x15   : > { %3964 = vmatpush3.msra.mxu0 %v254_v9  ;;  %3999 = vmatpush3.msra.mxu1 %v270_v10  ;;  %v243_v31 = vld [vmem:[%s7382_s1] sm:$0xff]  ;;  %v290_v34 = vld [vmem:[%s7382_s1 + $0x178] sm:$0xff]  ;;  %v289_v36 = vld [vmem:[%s7382_s1 + $0x170] sm:$0xff] }
  0x16   : > { %3965 = vmatprep.subr.mxu0 %v4971_v2  ;;  %4000 = vmatprep.subr.mxu1 %v4971_v2  ;;  %v259_v32 = vld [vmem:[%s7382_s1 + $0x80] sm:$0xff]  ;;  %v306_v35 = vld [vmem:[%s7382_s1 + $0x1f8] sm:$0xff]  ;;  %v305_v37 = vld [vmem:[%s7382_s1 + $0x1f0] sm:$0xff] }
  0x17   : > { %3966 = vmatpush3.msra.mxu0 %v253_v11  ;;  %4001 = vmatpush3.msra.mxu1 %v269_v12  ;;  %v5158_v33 = vld [vmem:[%s5145_s12] sm:$0xf]  ;;  %v288_v38 = vld [vmem:[%s7382_s1 + $0x168] sm:$0xff]  ;;  %v286_v42 = vld [vmem:[%s7382_s1 + $0x158] sm:$0xff] }
  0x18   : > { %3967 = vmatprep.subr.mxu0 %v4971_v2  ;;  %4002 = vmatprep.subr.mxu1 %v4971_v2  ;;  %v304_v39 = vld [vmem:[%s7382_s1 + $0x1e8] sm:$0xff]  ;;  %v287_v40 = vld [vmem:[%s7382_s1 + $0x160] sm:$0xff]  ;;  %v302_v43 = vld [vmem:[%s7382_s1 + $0x1d8] sm:$0xff] }
  0x19   : > { %3968 = vmatpush3.msra.mxu0 %v252_v13  ;;  %4003 = vmatpush3.msra.mxu1 %v268_v14  ;;  %v303_v41 = vld [vmem:[%s7382_s1 + $0x1e0] sm:$0xff]  ;;  %v285_v44 = vld [vmem:[%s7382_s1 + $0x150] sm:$0xff]  ;;  %v284_v46 = vld [vmem:[%s7382_s1 + $0x148] sm:$0xff] }
  0x1a   : > { %3969 = vmatprep.subr.mxu0 %v4971_v2  ;;  %4004 = vmatprep.subr.mxu1 %v4971_v2  ;;  %v301_v45 = vld [vmem:[%s7382_s1 + $0x1d0] sm:$0xff]  ;;  %v300_v47 = vld [vmem:[%s7382_s1 + $0x1c8] sm:$0xff]  ;;  %v283_v48 = vld [vmem:[%s7382_s1 + $0x140] sm:$0xff] }
  0x1b   : > { %3970 = vmatpush3.msra.mxu0 %v251_v15  ;;  %4005 = vmatpush3.msra.mxu1 %v267_v16  ;;  %v299_v49 = vld [vmem:[%s7382_s1 + $0x1c0] sm:$0xff]  ;;  %v282_v50 = vld [vmem:[%s7382_s1 + $0x138] sm:$0xff]  ;;  %v281_v52 = vld [vmem:[%s7382_s1 + $0x130] sm:$0xff] }
  0x1c   : > { %3971 = vmatprep.subr.mxu0 %v4971_v2  ;;  %4006 = vmatprep.subr.mxu1 %v4971_v2  ;;  %v298_v51 = vld [vmem:[%s7382_s1 + $0x1b8] sm:$0xff]  ;;  %v297_v53 = vld [vmem:[%s7382_s1 + $0x1b0] sm:$0xff]  ;;  %v280_v54 = vld [vmem:[%s7382_s1 + $0x128] sm:$0xff] }
  0x1d   : > { %3972 = vmatpush3.msra.mxu0 %v250_v17  ;;  %4007 = vmatpush3.msra.mxu1 %v266_v18  ;;  %v296_v55 = vld [vmem:[%s7382_s1 + $0x1a8] sm:$0xff]  ;;  %v279_v56 = vld [vmem:[%s7382_s1 + $0x120] sm:$0xff]  ;;  %v278_v58 = vld [vmem:[%s7382_s1 + $0x118] sm:$0xff] }
  0x1e   : > { %3973 = vmatprep.subr.mxu0 %v4971_v2  ;;  %4008 = vmatprep.subr.mxu1 %v4971_v2  ;;  %v295_v57 = vld [vmem:[%s7382_s1 + $0x1a0] sm:$0xff]  ;;  %v294_v59 = vld [vmem:[%s7382_s1 + $0x198] sm:$0xff]  ;;  %v277_v60 = vld [vmem:[%s7382_s1 + $0x110] sm:$0xff] }
  0x1f   : > { %3974 = vmatpush3.msra.mxu0 %v249_v19  ;;  %4009 = vmatpush3.msra.mxu1 %v265_v20  ;;  %v293_v61 = vld [vmem:[%s7382_s1 + $0x190] sm:$0xff]  ;;  %v276_v62 = vld [vmem:[%s7382_s1 + $0x108] sm:$0xff]  ;;  %v275_v0 = vld [vmem:[%s7382_s1 + $0x100] sm:$0xff] }
  0x20   : > { %3975 = vmatprep.subr.mxu0 %v4971_v2  ;;  %4010 = vmatprep.subr.mxu1 %v4971_v2  ;;  %v292_v63 = vld [vmem:[%s7382_s1 + $0x188] sm:$0xff]  ;;  %v291_v1 = vld [vmem:[%s7382_s1 + $0x180] sm:$0xff]  ;;  %v322_v3 = vld [vmem:[%s7382_s1 + $0x278] sm:$0xff] }
  0x21   : > { %3976 = vmatpush3.msra.mxu0 %v248_v21  ;;  %4011 = vmatpush3.msra.mxu1 %v264_v22  ;;  %v338_v4 = vld [vmem:[%s7382_s1 + $0x2f8] sm:$0xff]  ;;  %v321_v5 = vld [vmem:[%s7382_s1 + $0x270] sm:$0xff]  ;;  %v320_v7 = vld [vmem:[%s7382_s1 + $0x268] sm:$0xff] }
  0x22   : > { %3977 = vmatprep.subr.mxu0 %v4971_v2  ;;  %4012 = vmatprep.subr.mxu1 %v4971_v2  ;;  %v337_v6 = vld [vmem:[%s7382_s1 + $0x2f0] sm:$0xff]  ;;  %v336_v8 = vld [vmem:[%s7382_s1 + $0x2e8] sm:$0xff]  ;;  %v319_v9 = vld [vmem:[%s7382_s1 + $0x260] sm:$0xff] }
  0x23   : > { %3978 = vmatpush3.msra.mxu0 %v247_v23  ;;  %4013 = vmatpush3.msra.mxu1 %v263_v24  ;;  %v335_v10 = vld [vmem:[%s7382_s1 + $0x2e0] sm:$0xff]  ;;  %v318_v11 = vld [vmem:[%s7382_s1 + $0x258] sm:$0xff]  ;;  %v317_v13 = vld [vmem:[%s7382_s1 + $0x250] sm:$0xff] }
  0x24   : > { %3979 = vmatprep.subr.mxu0 %v4971_v2  ;;  %4014 = vmatprep.subr.mxu1 %v4971_v2  ;;  %v334_v12 = vld [vmem:[%s7382_s1 + $0x2d8] sm:$0xff]  ;;  %v333_v14 = vld [vmem:[%s7382_s1 + $0x2d0] sm:$0xff]  ;;  %v316_v15 = vld [vmem:[%s7382_s1 + $0x248] sm:$0xff] }
  0x25   : > { %3980 = vmatpush3.msra.mxu0 %v246_v25  ;;  %4015 = vmatpush3.msra.mxu1 %v262_v26  ;;  %v332_v16 = vld [vmem:[%s7382_s1 + $0x2c8] sm:$0xff]  ;;  %v315_v17 = vld [vmem:[%s7382_s1 + $0x240] sm:$0xff]  ;;  %v314_v19 = vld [vmem:[%s7382_s1 + $0x238] sm:$0xff] }
  0x26   : > { %3981 = vmatprep.subr.mxu0 %v4971_v2  ;;  %4016 = vmatprep.subr.mxu1 %v4971_v2  ;;  %v331_v18 = vld [vmem:[%s7382_s1 + $0x2c0] sm:$0xff]  ;;  %v330_v20 = vld [vmem:[%s7382_s1 + $0x2b8] sm:$0xff]  ;;  %v313_v21 = vld [vmem:[%s7382_s1 + $0x230] sm:$0xff] }
  0x27   : > { %3982 = vmatpush3.msra.mxu0 %v245_v27  ;;  %4017 = vmatpush3.msra.mxu1 %v261_v28  ;;  %v329_v22 = vld [vmem:[%s7382_s1 + $0x2b0] sm:$0xff]  ;;  %v312_v23 = vld [vmem:[%s7382_s1 + $0x228] sm:$0xff]  ;;  %v311_v25 = vld [vmem:[%s7382_s1 + $0x220] sm:$0xff] }
  0x28   : > { %3983 = vmatprep.subr.mxu0 %v4971_v2  ;;  %4018 = vmatprep.subr.mxu1 %v4971_v2  ;;  %v328_v24 = vld [vmem:[%s7382_s1 + $0x2a8] sm:$0xff]  ;;  %v327_v26 = vld [vmem:[%s7382_s1 + $0x2a0] sm:$0xff]  ;;  %v310_v27 = vld [vmem:[%s7382_s1 + $0x218] sm:$0xff] }
  0x29   : > { %3984 = vmatpush3.msra.mxu0 %v244_v29  ;;  %4019 = vmatpush3.msra.mxu1 %v260_v30  ;;  %v326_v28 = vld [vmem:[%s7382_s1 + $0x298] sm:$0xff]  ;;  %v309_v29 = vld [vmem:[%s7382_s1 + $0x210] sm:$0xff] }
  0x2a   : > { %3985 = vmatprep.subr.mxu0 %v4971_v2  ;;  %4020 = vmatprep.subr.mxu1 %v4971_v2  ;;  %v325_v30 = vld [vmem:[%s7382_s1 + $0x290] sm:$0xff] }
  0x2b   : > { %3986 = vmatpush3.msra.mxu0 %v243_v31  ;;  %3987 = vmatprep.mubr.msk.f32.mxu0 %vm4972_vm0, %v4971_v2  ;;  %v308_v31 = vld [vmem:[%s7382_s1 + $0x208] sm:$0xff] }
  0x2c   : > { %4021 = vmatpush3.msra.mxu1 %v259_v32  ;;  %4022 = vmatprep.mubr.msk.f32.mxu1 %vm4972_vm0, %v4971_v2  ;;  %v324_v32 = vld [vmem:[%s7382_s1 + $0x288] sm:$0xff] }
  0x2d   : > { %3988 = vmatmul.mubr.f32.vlgmr.msra.gmra.mxu0 %v5158_v33  ;;  %4023 = vmatmul.mubr.f32.vlgmr.msra.gmra.mxu1 %v5158_v33 }
  0x2e   : > { %4025 = vmatprep.subr.mxu0 %v4971_v2  ;;  %4060 = vmatprep.subr.mxu1 %v4971_v2 }
  0x2f   : > { %4026 = vmatpush3.msra.mxu0 %v290_v34  ;;  %4061 = vmatpush3.msra.mxu1 %v306_v35  ;;  %v307_v34 = vld [vmem:[%s7382_s1 + $0x200] sm:$0xff] }
  0x30   : > { %4027 = vmatprep.subr.mxu0 %v4971_v2  ;;  %4062 = vmatprep.subr.mxu1 %v4971_v2  ;;  %v323_v35 = vld [vmem:[%s7382_s1 + $0x280] sm:$0xff] }
  0x31   : > { %4028 = vmatpush3.msra.mxu0 %v289_v36  ;;  %4063 = vmatpush3.msra.mxu1 %v305_v37  ;;  %v354_v36 = vld [vmem:[%s7382_s1 + $0x378] sm:$0xff] }
  0x32   : > { %4029 = vmatprep.subr.mxu0 %v4971_v2  ;;  %4064 = vmatprep.subr.mxu1 %v4971_v2  ;;  %v370_v37 = vld [vmem:[%s7382_s1 + $0x3f8] sm:$0xff] }
  0x33   : > { %4030 = vmatpush3.msra.mxu0 %v288_v38  ;;  %4065 = vmatpush3.msra.mxu1 %v304_v39  ;;  %v353_v38 = vld [vmem:[%s7382_s1 + $0x370] sm:$0xff] }
  0x34   : > { %4031 = vmatprep.subr.mxu0 %v4971_v2  ;;  %4066 = vmatprep.subr.mxu1 %v4971_v2  ;;  %v369_v39 = vld [vmem:[%s7382_s1 + $0x3f0] sm:$0xff] }
  0x35   : > { %4032 = vmatpush3.msra.mxu0 %v287_v40  ;;  %4067 = vmatpush3.msra.mxu1 %v303_v41  ;;  %v352_v40 = vld [vmem:[%s7382_s1 + $0x368] sm:$0xff] }
  0x36   : > { %4033 = vmatprep.subr.mxu0 %v4971_v2  ;;  %4068 = vmatprep.subr.mxu1 %v4971_v2  ;;  %v368_v41 = vld [vmem:[%s7382_s1 + $0x3e8] sm:$0xff] }
  0x37   : > { %4034 = vmatpush3.msra.mxu0 %v286_v42  ;;  %4069 = vmatpush3.msra.mxu1 %v302_v43  ;;  %v351_v42 = vld [vmem:[%s7382_s1 + $0x360] sm:$0xff] }
  0x38   : > { %4035 = vmatprep.subr.mxu0 %v4971_v2  ;;  %4070 = vmatprep.subr.mxu1 %v4971_v2  ;;  %v367_v43 = vld [vmem:[%s7382_s1 + $0x3e0] sm:$0xff] }
  0x39   : > { %4036 = vmatpush3.msra.mxu0 %v285_v44  ;;  %4071 = vmatpush3.msra.mxu1 %v301_v45  ;;  %v350_v44 = vld [vmem:[%s7382_s1 + $0x358] sm:$0xff] }
  0x3a   : > { %4037 = vmatprep.subr.mxu0 %v4971_v2  ;;  %4072 = vmatprep.subr.mxu1 %v4971_v2  ;;  %v366_v45 = vld [vmem:[%s7382_s1 + $0x3d8] sm:$0xff] }
  0x3b   : > { %4038 = vmatpush3.msra.mxu0 %v284_v46  ;;  %4073 = vmatpush3.msra.mxu1 %v300_v47  ;;  %v349_v46 = vld [vmem:[%s7382_s1 + $0x350] sm:$0xff] }
  0x3c   : > { %4039 = vmatprep.subr.mxu0 %v4971_v2  ;;  %4074 = vmatprep.subr.mxu1 %v4971_v2  ;;  %v365_v47 = vld [vmem:[%s7382_s1 + $0x3d0] sm:$0xff] }
  0x3d   : > { %4040 = vmatpush3.msra.mxu0 %v283_v48  ;;  %4075 = vmatpush3.msra.mxu1 %v299_v49  ;;  %v348_v48 = vld [vmem:[%s7382_s1 + $0x348] sm:$0xff] }
  0x3e   : > { %4041 = vmatprep.subr.mxu0 %v4971_v2  ;;  %4076 = vmatprep.subr.mxu1 %v4971_v2  ;;  %v364_v49 = vld [vmem:[%s7382_s1 + $0x3c8] sm:$0xff] }
  0x3f   : > { %4042 = vmatpush3.msra.mxu0 %v282_v50  ;;  %4077 = vmatpush3.msra.mxu1 %v298_v51  ;;  %v347_v50 = vld [vmem:[%s7382_s1 + $0x340] sm:$0xff] }
  0x40   : > { %4043 = vmatprep.subr.mxu0 %v4971_v2  ;;  %4078 = vmatprep.subr.mxu1 %v4971_v2  ;;  %v363_v51 = vld [vmem:[%s7382_s1 + $0x3c0] sm:$0xff] }
  0x41   : > { %4044 = vmatpush3.msra.mxu0 %v281_v52  ;;  %4079 = vmatpush3.msra.mxu1 %v297_v53  ;;  %v346_v52 = vld [vmem:[%s7382_s1 + $0x338] sm:$0xff] }
  0x42   : > { %4045 = vmatprep.subr.mxu0 %v4971_v2  ;;  %4080 = vmatprep.subr.mxu1 %v4971_v2  ;;  %v362_v53 = vld [vmem:[%s7382_s1 + $0x3b8] sm:$0xff] }
  0x43   : > { %4046 = vmatpush3.msra.mxu0 %v280_v54  ;;  %4081 = vmatpush3.msra.mxu1 %v296_v55  ;;  %v345_v54 = vld [vmem:[%s7382_s1 + $0x330] sm:$0xff] }
  0x44   : > { %4047 = vmatprep.subr.mxu0 %v4971_v2  ;;  %4082 = vmatprep.subr.mxu1 %v4971_v2  ;;  %v361_v55 = vld [vmem:[%s7382_s1 + $0x3b0] sm:$0xff] }
  0x45   : > { %4048 = vmatpush3.msra.mxu0 %v279_v56  ;;  %4083 = vmatpush3.msra.mxu1 %v295_v57  ;;  %v344_v56 = vld [vmem:[%s7382_s1 + $0x328] sm:$0xff] }
  0x46   : > { %4049 = vmatprep.subr.mxu0 %v4971_v2  ;;  %4084 = vmatprep.subr.mxu1 %v4971_v2  ;;  %v360_v57 = vld [vmem:[%s7382_s1 + $0x3a8] sm:$0xff] }
  0x47   : > { %4050 = vmatpush3.msra.mxu0 %v278_v58  ;;  %4085 = vmatpush3.msra.mxu1 %v294_v59  ;;  %v343_v58 = vld [vmem:[%s7382_s1 + $0x320] sm:$0xff] }
  0x48   : > { %4051 = vmatprep.subr.mxu0 %v4971_v2  ;;  %4086 = vmatprep.subr.mxu1 %v4971_v2  ;;  %v359_v59 = vld [vmem:[%s7382_s1 + $0x3a0] sm:$0xff] }
  0x49   : > { %4052 = vmatpush3.msra.mxu0 %v277_v60  ;;  %4087 = vmatpush3.msra.mxu1 %v293_v61  ;;  %v342_v60 = vld [vmem:[%s7382_s1 + $0x318] sm:$0xff] }
  0x4a   : > { %4053 = vmatprep.subr.mxu0 %v4971_v2  ;;  %4088 = vmatprep.subr.mxu1 %v4971_v2  ;;  %v358_v61 = vld [vmem:[%s7382_s1 + $0x398] sm:$0xff] }
  0x4b   : > { %4054 = vmatpush3.msra.mxu0 %v276_v62  ;;  %4089 = vmatpush3.msra.mxu1 %v292_v63  ;;  %v341_v62 = vld [vmem:[%s7382_s1 + $0x310] sm:$0xff] }
  0x4c   : > { %4055 = vmatprep.subr.mxu0 %v4971_v2  ;;  %4090 = vmatprep.subr.mxu1 %v4971_v2  ;;  %v357_v63 = vld [vmem:[%s7382_s1 + $0x390] sm:$0xff] }
  0x4d   : > { %4056 = vmatpush3.msra.mxu0 %v275_v0  ;;  %4057 = vmatprep.mubr.msk.f32.mxu0 %vm4972_vm0, %v4971_v2  ;;  %v340_v0 = vld [vmem:[%s7382_s1 + $0x308] sm:$0xff] }
  0x4e   : > { %4091 = vmatpush3.msra.mxu1 %v291_v1  ;;  %4092 = vmatprep.mubr.msk.f32.mxu1 %vm4972_vm0, %v4971_v2  ;;  %v356_v1 = vld [vmem:[%s7382_s1 + $0x388] sm:$0xff] }
  0x4f   : > { %4058 = vmatmul.mubr.f32.vlgmr.msra.gmra.mxu0 %v5158_v33  ;;  %4093 = vmatmul.mubr.f32.vlgmr.msra.gmra.mxu1 %v5158_v33 }
  0x50   : > { %4095 = vmatprep.subr.mxu0 %v4971_v2  ;;  %4130 = vmatprep.subr.mxu1 %v4971_v2 }
  0x51   : > { %4096 = vmatpush3.msra.mxu0 %v322_v3  ;;  %4131 = vmatpush3.msra.mxu1 %v338_v4  ;;  %v339_v3 = vld [vmem:[%s7382_s1 + $0x300] sm:$0xff] }
  0x52   : > { %4097 = vmatprep.subr.mxu0 %v4971_v2  ;;  %4132 = vmatprep.subr.mxu1 %v4971_v2  ;;  %v355_v4 = vld [vmem:[%s7382_s1 + $0x380] sm:$0xff] }
  0x53   : > { %4098 = vmatpush3.msra.mxu0 %v321_v5  ;;  %4133 = vmatpush3.msra.mxu1 %v337_v6  ;;  %v386_v5 = vld [vmem:[%s7382_s1 + $0x478] sm:$0xff] }
  0x54   : > { %4099 = vmatprep.subr.mxu0 %v4971_v2  ;;  %4134 = vmatprep.subr.mxu1 %v4971_v2  ;;  %v402_v6 = vld [vmem:[%s7382_s1 + $0x4f8] sm:$0xff] }
  0x55   : > { %4100 = vmatpush3.msra.mxu0 %v320_v7  ;;  %4135 = vmatpush3.msra.mxu1 %v336_v8  ;;  %v385_v7 = vld [vmem:[%s7382_s1 + $0x470] sm:$0xff] }
  0x56   : > { %4101 = vmatprep.subr.mxu0 %v4971_v2  ;;  %4136 = vmatprep.subr.mxu1 %v4971_v2  ;;  %v401_v8 = vld [vmem:[%s7382_s1 + $0x4f0] sm:$0xff] }
  0x57   : > { %4102 = vmatpush3.msra.mxu0 %v319_v9  ;;  %4137 = vmatpush3.msra.mxu1 %v335_v10  ;;  %v384_v9 = vld [vmem:[%s7382_s1 + $0x468] sm:$0xff] }
  0x58   : > { %4103 = vmatprep.subr.mxu0 %v4971_v2  ;;  %4138 = vmatprep.subr.mxu1 %v4971_v2  ;;  %v400_v10 = vld [vmem:[%s7382_s1 + $0x4e8] sm:$0xff] }
  0x59   : > { %4104 = vmatpush3.msra.mxu0 %v318_v11  ;;  %4139 = vmatpush3.msra.mxu1 %v334_v12  ;;  %v383_v11 = vld [vmem:[%s7382_s1 + $0x460] sm:$0xff] }
  0x5a   : > { %4105 = vmatprep.subr.mxu0 %v4971_v2  ;;  %4140 = vmatprep.subr.mxu1 %v4971_v2  ;;  %v399_v12 = vld [vmem:[%s7382_s1 + $0x4e0] sm:$0xff] }
  0x5b   : > { %4106 = vmatpush3.msra.mxu0 %v317_v13  ;;  %4141 = vmatpush3.msra.mxu1 %v333_v14  ;;  %v382_v13 = vld [vmem:[%s7382_s1 + $0x458] sm:$0xff] }
  0x5c   : > { %4107 = vmatprep.subr.mxu0 %v4971_v2  ;;  %4142 = vmatprep.subr.mxu1 %v4971_v2  ;;  %v398_v14 = vld [vmem:[%s7382_s1 + $0x4d8] sm:$0xff] }
  0x5d   : > { %4108 = vmatpush3.msra.mxu0 %v316_v15  ;;  %4143 = vmatpush3.msra.mxu1 %v332_v16  ;;  %v381_v15 = vld [vmem:[%s7382_s1 + $0x450] sm:$0xff] }
  0x5e   : > { %4109 = vmatprep.subr.mxu0 %v4971_v2  ;;  %4144 = vmatprep.subr.mxu1 %v4971_v2  ;;  %v397_v16 = vld [vmem:[%s7382_s1 + $0x4d0] sm:$0xff] }
  0x5f   : > { %4110 = vmatpush3.msra.mxu0 %v315_v17  ;;  %4145 = vmatpush3.msra.mxu1 %v331_v18  ;;  %v380_v17 = vld [vmem:[%s7382_s1 + $0x448] sm:$0xff] }
  0x60   : > { %4111 = vmatprep.subr.mxu0 %v4971_v2  ;;  %4146 = vmatprep.subr.mxu1 %v4971_v2  ;;  %v396_v18 = vld [vmem:[%s7382_s1 + $0x4c8] sm:$0xff] }
  0x61   : > { %4112 = vmatpush3.msra.mxu0 %v314_v19  ;;  %4147 = vmatpush3.msra.mxu1 %v330_v20  ;;  %v379_v19 = vld [vmem:[%s7382_s1 + $0x440] sm:$0xff] }
  0x62   : > { %4113 = vmatprep.subr.mxu0 %v4971_v2  ;;  %4148 = vmatprep.subr.mxu1 %v4971_v2  ;;  %v395_v20 = vld [vmem:[%s7382_s1 + $0x4c0] sm:$0xff] }
  0x63   : > { %4114 = vmatpush3.msra.mxu0 %v313_v21  ;;  %4149 = vmatpush3.msra.mxu1 %v329_v22  ;;  %v378_v21 = vld [vmem:[%s7382_s1 + $0x438] sm:$0xff] }
  0x64   : > { %4115 = vmatprep.subr.mxu0 %v4971_v2  ;;  %4150 = vmatprep.subr.mxu1 %v4971_v2  ;;  %v394_v22 = vld [vmem:[%s7382_s1 + $0x4b8] sm:$0xff] }
  0x65   : > { %4116 = vmatpush3.msra.mxu0 %v312_v23  ;;  %4151 = vmatpush3.msra.mxu1 %v328_v24  ;;  %v377_v23 = vld [vmem:[%s7382_s1 + $0x430] sm:$0xff] }
  0x66   : > { %4117 = vmatprep.subr.mxu0 %v4971_v2  ;;  %4152 = vmatprep.subr.mxu1 %v4971_v2  ;;  %v393_v24 = vld [vmem:[%s7382_s1 + $0x4b0] sm:$0xff] }
  0x67   : > { %4118 = vmatpush3.msra.mxu0 %v311_v25  ;;  %4153 = vmatpush3.msra.mxu1 %v327_v26  ;;  %v376_v25 = vld [vmem:[%s7382_s1 + $0x428] sm:$0xff] }
  0x68   : > { %4119 = vmatprep.subr.mxu0 %v4971_v2  ;;  %4154 = vmatprep.subr.mxu1 %v4971_v2  ;;  %v392_v26 = vld [vmem:[%s7382_s1 + $0x4a8] sm:$0xff] }
  0x69   : > { %4120 = vmatpush3.msra.mxu0 %v310_v27  ;;  %4155 = vmatpush3.msra.mxu1 %v326_v28  ;;  %v375_v27 = vld [vmem:[%s7382_s1 + $0x420] sm:$0xff] }
  0x6a   : > { %4121 = vmatprep.subr.mxu0 %v4971_v2  ;;  %4156 = vmatprep.subr.mxu1 %v4971_v2  ;;  %v391_v28 = vld [vmem:[%s7382_s1 + $0x4a0] sm:$0xff] }
  0x6b   : > { %4122 = vmatpush3.msra.mxu0 %v309_v29  ;;  %4157 = vmatpush3.msra.mxu1 %v325_v30  ;;  %v374_v29 = vld [vmem:[%s7382_s1 + $0x418] sm:$0xff] }
  0x6c   : > { %4123 = vmatprep.subr.mxu0 %v4971_v2  ;;  %4158 = vmatprep.subr.mxu1 %v4971_v2  ;;  %v390_v30 = vld [vmem:[%s7382_s1 + $0x498] sm:$0xff] }
  0x6d   : > { %4124 = vmatpush3.msra.mxu0 %v308_v31  ;;  %4159 = vmatpush3.msra.mxu1 %v324_v32  ;;  %v373_v31 = vld [vmem:[%s7382_s1 + $0x410] sm:$0xff] }
  0x6e   : > { %4125 = vmatprep.subr.mxu0 %v4971_v2  ;;  %4160 = vmatprep.subr.mxu1 %v4971_v2  ;;  %v389_v32 = vld [vmem:[%s7382_s1 + $0x490] sm:$0xff] }
  0x6f   : > { %4126 = vmatpush3.msra.mxu0 %v307_v34  ;;  %4127 = vmatprep.mubr.msk.f32.mxu0 %vm4972_vm0, %v4971_v2  ;;  %v372_v34 = vld [vmem:[%s7382_s1 + $0x408] sm:$0xff] }
  0x70   : > { %4161 = vmatpush3.msra.mxu1 %v323_v35  ;;  %4162 = vmatprep.mubr.msk.f32.mxu1 %vm4972_vm0, %v4971_v2  ;;  %v388_v35 = vld [vmem:[%s7382_s1 + $0x488] sm:$0xff] }
  0x71   : > { %4128 = vmatmul.mubr.f32.vlgmr.msra.gmra.mxu0 %v5158_v33  ;;  %4163 = vmatmul.mubr.f32.vlgmr.msra.gmra.mxu1 %v5158_v33 }
  0x72   : > { %4165 = vmatprep.subr.mxu0 %v4971_v2  ;;  %4200 = vmatprep.subr.mxu1 %v4971_v2 }
  0x73   : > { %4166 = vmatpush3.msra.mxu0 %v354_v36  ;;  %4201 = vmatpush3.msra.mxu1 %v370_v37  ;;  %v371_v36 = vld [vmem:[%s7382_s1 + $0x400] sm:$0xff] }
  0x74   : > { %4167 = vmatprep.subr.mxu0 %v4971_v2  ;;  %4202 = vmatprep.subr.mxu1 %v4971_v2  ;;  %v387_v37 = vld [vmem:[%s7382_s1 + $0x480] sm:$0xff] }
  0x75   : > { %4168 = vmatpush3.msra.mxu0 %v353_v38  ;;  %4203 = vmatpush3.msra.mxu1 %v369_v39  ;;  %v418_v38 = vld [vmem:[%s7382_s1 + $0x578] sm:$0xff] }
  0x76   : > { %4169 = vmatprep.subr.mxu0 %v4971_v2  ;;  %4204 = vmatprep.subr.mxu1 %v4971_v2  ;;  %v434_v39 = vld [vmem:[%s7382_s1 + $0x5f8] sm:$0xff] }
  0x77   : > { %4170 = vmatpush3.msra.mxu0 %v352_v40  ;;  %4205 = vmatpush3.msra.mxu1 %v368_v41  ;;  %v417_v40 = vld [vmem:[%s7382_s1 + $0x570] sm:$0xff] }
  0x78   : > { %4171 = vmatprep.subr.mxu0 %v4971_v2  ;;  %4206 = vmatprep.subr.mxu1 %v4971_v2  ;;  %v433_v41 = vld [vmem:[%s7382_s1 + $0x5f0] sm:$0xff] }
  0x79   : > { %4172 = vmatpush3.msra.mxu0 %v351_v42  ;;  %4207 = vmatpush3.msra.mxu1 %v367_v43  ;;  %v416_v42 = vld [vmem:[%s7382_s1 + $0x568] sm:$0xff] }
  0x7a   : > { %4173 = vmatprep.subr.mxu0 %v4971_v2  ;;  %4208 = vmatprep.subr.mxu1 %v4971_v2  ;;  %v432_v43 = vld [vmem:[%s7382_s1 + $0x5e8] sm:$0xff] }
  0x7b   : > { %4174 = vmatpush3.msra.mxu0 %v350_v44  ;;  %4209 = vmatpush3.msra.mxu1 %v366_v45  ;;  %v415_v44 = vld [vmem:[%s7382_s1 + $0x560] sm:$0xff] }
  0x7c   : > { %4175 = vmatprep.subr.mxu0 %v4971_v2  ;;  %4210 = vmatprep.subr.mxu1 %v4971_v2  ;;  %v431_v45 = vld [vmem:[%s7382_s1 + $0x5e0] sm:$0xff] }
  0x7d   : > { %4176 = vmatpush3.msra.mxu0 %v349_v46  ;;  %4211 = vmatpush3.msra.mxu1 %v365_v47  ;;  %v414_v46 = vld [vmem:[%s7382_s1 + $0x558] sm:$0xff] }
  0x7e   : > { %4177 = vmatprep.subr.mxu0 %v4971_v2  ;;  %4212 = vmatprep.subr.mxu1 %v4971_v2  ;;  %v430_v47 = vld [vmem:[%s7382_s1 + $0x5d8] sm:$0xff] }
  0x7f   : > { %4178 = vmatpush3.msra.mxu0 %v348_v48  ;;  %4213 = vmatpush3.msra.mxu1 %v364_v49  ;;  %v413_v48 = vld [vmem:[%s7382_s1 + $0x550] sm:$0xff] }
  0x80   : > { %4179 = vmatprep.subr.mxu0 %v4971_v2  ;;  %4214 = vmatprep.subr.mxu1 %v4971_v2  ;;  %v429_v49 = vld [vmem:[%s7382_s1 + $0x5d0] sm:$0xff] }
  0x81   : > { %4180 = vmatpush3.msra.mxu0 %v347_v50  ;;  %4215 = vmatpush3.msra.mxu1 %v363_v51  ;;  %v412_v50 = vld [vmem:[%s7382_s1 + $0x548] sm:$0xff] }
  0x82   : > { %4181 = vmatprep.subr.mxu0 %v4971_v2  ;;  %4216 = vmatprep.subr.mxu1 %v4971_v2  ;;  %v428_v51 = vld [vmem:[%s7382_s1 + $0x5c8] sm:$0xff] }
  0x83   : > { %4182 = vmatpush3.msra.mxu0 %v346_v52  ;;  %4217 = vmatpush3.msra.mxu1 %v362_v53  ;;  %v411_v52 = vld [vmem:[%s7382_s1 + $0x540] sm:$0xff] }
  0x84   : > { %4183 = vmatprep.subr.mxu0 %v4971_v2  ;;  %4218 = vmatprep.subr.mxu1 %v4971_v2  ;;  %v427_v53 = vld [vmem:[%s7382_s1 + $0x5c0] sm:$0xff] }
  0x85   : > { %4184 = vmatpush3.msra.mxu0 %v345_v54  ;;  %4219 = vmatpush3.msra.mxu1 %v361_v55  ;;  %v410_v54 = vld [vmem:[%s7382_s1 + $0x538] sm:$0xff] }
  0x86   : > { %4185 = vmatprep.subr.mxu0 %v4971_v2  ;;  %4220 = vmatprep.subr.mxu1 %v4971_v2  ;;  %v426_v55 = vld [vmem:[%s7382_s1 + $0x5b8] sm:$0xff] }
  0x87   : > { %4186 = vmatpush3.msra.mxu0 %v344_v56  ;;  %4221 = vmatpush3.msra.mxu1 %v360_v57  ;;  %v409_v56 = vld [vmem:[%s7382_s1 + $0x530] sm:$0xff] }
  0x88   : > { %4187 = vmatprep.subr.mxu0 %v4971_v2  ;;  %4222 = vmatprep.subr.mxu1 %v4971_v2  ;;  %v425_v57 = vld [vmem:[%s7382_s1 + $0x5b0] sm:$0xff] }
  0x89   : > { %4188 = vmatpush3.msra.mxu0 %v343_v58  ;;  %4223 = vmatpush3.msra.mxu1 %v359_v59  ;;  %v408_v58 = vld [vmem:[%s7382_s1 + $0x528] sm:$0xff] }
  0x8a   : > { %4189 = vmatprep.subr.mxu0 %v4971_v2  ;;  %4224 = vmatprep.subr.mxu1 %v4971_v2  ;;  %v424_v59 = vld [vmem:[%s7382_s1 + $0x5a8] sm:$0xff] }
  0x8b   : > { %4190 = vmatpush3.msra.mxu0 %v342_v60  ;;  %4225 = vmatpush3.msra.mxu1 %v358_v61  ;;  %v407_v60 = vld [vmem:[%s7382_s1 + $0x520] sm:$0xff] }
  0x8c   : > { %4191 = vmatprep.subr.mxu0 %v4971_v2  ;;  %4226 = vmatprep.subr.mxu1 %v4971_v2  ;;  %v423_v61 = vld [vmem:[%s7382_s1 + $0x5a0] sm:$0xff] }
  0x8d   : > { %4192 = vmatpush3.msra.mxu0 %v341_v62  ;;  %4227 = vmatpush3.msra.mxu1 %v357_v63  ;;  %v406_v62 = vld [vmem:[%s7382_s1 + $0x518] sm:$0xff] }
  0x8e   : > { %4193 = vmatprep.subr.mxu0 %v4971_v2  ;;  %4228 = vmatprep.subr.mxu1 %v4971_v2  ;;  %v422_v63 = vld [vmem:[%s7382_s1 + $0x598] sm:$0xff] }
  0x8f   : > { %4194 = vmatpush3.msra.mxu0 %v340_v0  ;;  %4229 = vmatpush3.msra.mxu1 %v356_v1  ;;  %v405_v0 = vld [vmem:[%s7382_s1 + $0x510] sm:$0xff] }
  0x90   : > { %4195 = vmatprep.subr.mxu0 %v4971_v2  ;;  %4230 = vmatprep.subr.mxu1 %v4971_v2  ;;  %v421_v1 = vld [vmem:[%s7382_s1 + $0x590] sm:$0xff] }
  0x91   : > { %4196 = vmatpush3.msra.mxu0 %v339_v3  ;;  %4197 = vmatprep.mubr.msk.f32.mxu0 %vm4972_vm0, %v4971_v2  ;;  %v404_v3 = vld [vmem:[%s7382_s1 + $0x508] sm:$0xff] }
  0x92   : > { %4231 = vmatpush3.msra.mxu1 %v355_v4  ;;  %4232 = vmatprep.mubr.msk.f32.mxu1 %vm4972_vm0, %v4971_v2  ;;  %v420_v4 = vld [vmem:[%s7382_s1 + $0x588] sm:$0xff] }
  0x93   : > { %4198 = vmatmul.mubr.f32.vlgmr.msra.gmra.mxu0 %v5158_v33  ;;  %4233 = vmatmul.mubr.f32.vlgmr.msra.gmra.mxu1 %v5158_v33 }
  0x94   : > { %4235 = vmatprep.subr.mxu0 %v4971_v2  ;;  %4270 = vmatprep.subr.mxu1 %v4971_v2 }
  0x95   : > { %4236 = vmatpush3.msra.mxu0 %v386_v5  ;;  %4271 = vmatpush3.msra.mxu1 %v402_v6  ;;  %v403_v5 = vld [vmem:[%s7382_s1 + $0x500] sm:$0xff] }
  0x96   : > { %4237 = vmatprep.subr.mxu0 %v4971_v2  ;;  %4272 = vmatprep.subr.mxu1 %v4971_v2  ;;  %v419_v6 = vld [vmem:[%s7382_s1 + $0x580] sm:$0xff] }
  0x97   : > { %4238 = vmatpush3.msra.mxu0 %v385_v7  ;;  %4273 = vmatpush3.msra.mxu1 %v401_v8  ;;  %v450_v7 = vld [vmem:[%s7382_s1 + $0x678] sm:$0xff] }
  0x98   : > { %4239 = vmatprep.subr.mxu0 %v4971_v2  ;;  %4274 = vmatprep.subr.mxu1 %v4971_v2  ;;  %v466_v8 = vld [vmem:[%s7382_s1 + $0x6f8] sm:$0xff] }
  0x99   : > { %4240 = vmatpush3.msra.mxu0 %v384_v9  ;;  %4275 = vmatpush3.msra.mxu1 %v400_v10  ;;  %v449_v9 = vld [vmem:[%s7382_s1 + $0x670] sm:$0xff] }
  0x9a   : > { %4241 = vmatprep.subr.mxu0 %v4971_v2  ;;  %4276 = vmatprep.subr.mxu1 %v4971_v2  ;;  %v465_v10 = vld [vmem:[%s7382_s1 + $0x6f0] sm:$0xff] }
  0x9b   : > { %4242 = vmatpush3.msra.mxu0 %v383_v11  ;;  %4277 = vmatpush3.msra.mxu1 %v399_v12  ;;  %v464_v11 = vld [vmem:[%s7382_s1 + $0x6e8] sm:$0xff]  ;;  %v447_v12 = vld [vmem:[%s7382_s1 + $0x660] sm:$0xff] }
  0x9c   : > { %4243 = vmatprep.subr.mxu0 %v4971_v2  ;;  %4278 = vmatprep.subr.mxu1 %v4971_v2 }
  0x9d   : > { %4244 = vmatpush3.msra.mxu0 %v382_v13  ;;  %4279 = vmatpush3.msra.mxu1 %v398_v14  ;;  %v463_v13 = vld [vmem:[%s7382_s1 + $0x6e0] sm:$0xff]  ;;  %v446_v14 = vld [vmem:[%s7382_s1 + $0x658] sm:$0xff] }
  0x9e   : > { %4245 = vmatprep.subr.mxu0 %v4971_v2  ;;  %4280 = vmatprep.subr.mxu1 %v4971_v2 }
  0x9f   : > { %4246 = vmatpush3.msra.mxu0 %v381_v15  ;;  %4281 = vmatpush3.msra.mxu1 %v397_v16  ;;  %v462_v15 = vld [vmem:[%s7382_s1 + $0x6d8] sm:$0xff]  ;;  %v445_v16 = vld [vmem:[%s7382_s1 + $0x650] sm:$0xff] }
  0xa0   : > { %4247 = vmatprep.subr.mxu0 %v4971_v2  ;;  %4282 = vmatprep.subr.mxu1 %v4971_v2 }
  0xa1   : > { %4248 = vmatpush3.msra.mxu0 %v380_v17  ;;  %4283 = vmatpush3.msra.mxu1 %v396_v18  ;;  %v461_v17 = vld [vmem:[%s7382_s1 + $0x6d0] sm:$0xff]  ;;  %v444_v18 = vld [vmem:[%s7382_s1 + $0x648] sm:$0xff] }
  0xa2   : > { %4249 = vmatprep.subr.mxu0 %v4971_v2  ;;  %4284 = vmatprep.subr.mxu1 %v4971_v2 }
  0xa3   : > { %4250 = vmatpush3.msra.mxu0 %v379_v19  ;;  %4285 = vmatpush3.msra.mxu1 %v395_v20  ;;  %v460_v19 = vld [vmem:[%s7382_s1 + $0x6c8] sm:$0xff]  ;;  %v443_v20 = vld [vmem:[%s7382_s1 + $0x640] sm:$0xff] }
  0xa4   : > { %4251 = vmatprep.subr.mxu0 %v4971_v2  ;;  %4286 = vmatprep.subr.mxu1 %v4971_v2 }
  0xa5   : > { %4252 = vmatpush3.msra.mxu0 %v378_v21  ;;  %4287 = vmatpush3.msra.mxu1 %v394_v22  ;;  %v459_v21 = vld [vmem:[%s7382_s1 + $0x6c0] sm:$0xff]  ;;  %v442_v22 = vld [vmem:[%s7382_s1 + $0x638] sm:$0xff] }
  0xa6   : > { %4253 = vmatprep.subr.mxu0 %v4971_v2  ;;  %4288 = vmatprep.subr.mxu1 %v4971_v2 }
  0xa7   : > { %4254 = vmatpush3.msra.mxu0 %v377_v23  ;;  %4289 = vmatpush3.msra.mxu1 %v393_v24  ;;  %v458_v23 = vld [vmem:[%s7382_s1 + $0x6b8] sm:$0xff]  ;;  %v441_v24 = vld [vmem:[%s7382_s1 + $0x630] sm:$0xff] }
  0xa8   : > { %4255 = vmatprep.subr.mxu0 %v4971_v2  ;;  %4290 = vmatprep.subr.mxu1 %v4971_v2 }
  0xa9   : > { %4256 = vmatpush3.msra.mxu0 %v376_v25  ;;  %4291 = vmatpush3.msra.mxu1 %v392_v26  ;;  %v457_v25 = vld [vmem:[%s7382_s1 + $0x6b0] sm:$0xff]  ;;  %v440_v26 = vld [vmem:[%s7382_s1 + $0x628] sm:$0xff] }
  0xaa   : > { %4257 = vmatprep.subr.mxu0 %v4971_v2  ;;  %4292 = vmatprep.subr.mxu1 %v4971_v2 }
  0xab   : > { %4258 = vmatpush3.msra.mxu0 %v375_v27  ;;  %4293 = vmatpush3.msra.mxu1 %v391_v28  ;;  %v456_v27 = vld [vmem:[%s7382_s1 + $0x6a8] sm:$0xff]  ;;  %v439_v28 = vld [vmem:[%s7382_s1 + $0x620] sm:$0xff] }
  0xac   : > { %4259 = vmatprep.subr.mxu0 %v4971_v2  ;;  %4294 = vmatprep.subr.mxu1 %v4971_v2 }
  0xad   : > { %4260 = vmatpush3.msra.mxu0 %v374_v29  ;;  %4295 = vmatpush3.msra.mxu1 %v390_v30  ;;  %v455_v29 = vld [vmem:[%s7382_s1 + $0x6a0] sm:$0xff] }
  0xae   : > { %4261 = vmatprep.subr.mxu0 %v4971_v2  ;;  %4296 = vmatprep.subr.mxu1 %v4971_v2 }
  0xaf   : > { %4262 = vmatpush3.msra.mxu0 %v373_v31  ;;  %4297 = vmatpush3.msra.mxu1 %v389_v32  ;;  %v438_v32 = vld [vmem:[%s7382_s1 + $0x618] sm:$0xff] }
  0xb0   : > { %4263 = vmatprep.subr.mxu0 %v4971_v2  ;;  %4298 = vmatprep.subr.mxu1 %v4971_v2 }
  0xb1   : > { %4264 = vmatpush3.msra.mxu0 %v372_v34  ;;  %4299 = vmatpush3.msra.mxu1 %v388_v35  ;;  %v454_v34 = vld [vmem:[%s7382_s1 + $0x698] sm:$0xff] }
  0xb2   : > { %4265 = vmatprep.subr.mxu0 %v4971_v2  ;;  %4300 = vmatprep.subr.mxu1 %v4971_v2 }
  0xb3   : > { %4266 = vmatpush3.msra.mxu0 %v371_v36  ;;  %4267 = vmatprep.mubr.msk.f32.mxu0 %vm4972_vm0, %v4971_v2 }
  0xb4   : > { %4301 = vmatpush3.msra.mxu1 %v387_v37  ;;  %4302 = vmatprep.mubr.msk.f32.mxu1 %vm4972_vm0, %v4971_v2  ;;  %v437_v37 = vld [vmem:[%s7382_s1 + $0x610] sm:$0xff] }
  0xb5   : > { %4268 = vmatmul.mubr.f32.vlgmr.msra.gmra.mxu0 %v5158_v33  ;;  %4303 = vmatmul.mubr.f32.vlgmr.msra.gmra.mxu1 %v5158_v33 }
  0xb6   : > { %4305 = vmatprep.subr.mxu0 %v4971_v2  ;;  %4340 = vmatprep.subr.mxu1 %v4971_v2 }
  0xb7   : > { %4306 = vmatpush3.msra.mxu0 %v418_v38  ;;  %4341 = vmatpush3.msra.mxu1 %v434_v39  ;;  %v453_v38 = vld [vmem:[%s7382_s1 + $0x690] sm:$0xff]  ;;  %v436_v39 = vld [vmem:[%s7382_s1 + $0x608] sm:$0xff] }
  0xb8   : > { %4307 = vmatprep.subr.mxu0 %v4971_v2  ;;  %4342 = vmatprep.subr.mxu1 %v4971_v2 }
  0xb9   : > { %4308 = vmatpush3.msra.mxu0 %v417_v40  ;;  %4343 = vmatpush3.msra.mxu1 %v433_v41  ;;  %v452_v40 = vld [vmem:[%s7382_s1 + $0x688] sm:$0xff]  ;;  %v435_v41 = vld [vmem:[%s7382_s1 + $0x600] sm:$0xff] }
  0xba   : > { %4309 = vmatprep.subr.mxu0 %v4971_v2  ;;  %4344 = vmatprep.subr.mxu1 %v4971_v2 }
  0xbb   : > { %4310 = vmatpush3.msra.mxu0 %v416_v42  ;;  %4345 = vmatpush3.msra.mxu1 %v432_v43  ;;  %v451_v42 = vld [vmem:[%s7382_s1 + $0x680] sm:$0xff]  ;;  %v482_v43 = vld [vmem:[%s7382_s1 + $0x778] sm:$0xff] }
  0xbc   : > { %4311 = vmatprep.subr.mxu0 %v4971_v2  ;;  %4346 = vmatprep.subr.mxu1 %v4971_v2 }
  0xbd   : > { %4312 = vmatpush3.msra.mxu0 %v415_v44  ;;  %4347 = vmatpush3.msra.mxu1 %v431_v45  ;;  %v498_v44 = vld [vmem:[%s7382_s1 + $0x7f8] sm:$0xff]  ;;  %v5979_v45 = vld [vmem:[%s5145_s12] sm:$0xf] }
  0xbe   : > { %4313 = vmatprep.subr.mxu0 %v4971_v2  ;;  %4348 = vmatprep.subr.mxu1 %v4971_v2 }
  0xbf   : > { %4314 = vmatpush3.msra.mxu0 %v414_v46  ;;  %4349 = vmatpush3.msra.mxu1 %v430_v47  ;;  %v481_v46 = vld [vmem:[%s7382_s1 + $0x770] sm:$0xff] }
  0xc0   : > { %4315 = vmatprep.subr.mxu0 %v4971_v2  ;;  %4350 = vmatprep.subr.mxu1 %v4971_v2  ;;  %v497_v47 = vld [vmem:[%s7382_s1 + $0x7f0] sm:$0xff] }
  0xc1   : > { %4316 = vmatpush3.msra.mxu0 %v413_v48  ;;  %4351 = vmatpush3.msra.mxu1 %v429_v49  ;;  %v480_v48 = vld [vmem:[%s7382_s1 + $0x768] sm:$0xff] }
  0xc2   : > { %4317 = vmatprep.subr.mxu0 %v4971_v2  ;;  %4352 = vmatprep.subr.mxu1 %v4971_v2  ;;  %v496_v49 = vld [vmem:[%s7382_s1 + $0x7e8] sm:$0xff] }
  0xc3   : > { %4318 = vmatpush3.msra.mxu0 %v412_v50  ;;  %4353 = vmatpush3.msra.mxu1 %v428_v51  ;;  %v479_v50 = vld [vmem:[%s7382_s1 + $0x760] sm:$0xff] }
  0xc4   : > { %4319 = vmatprep.subr.mxu0 %v4971_v2  ;;  %4354 = vmatprep.subr.mxu1 %v4971_v2  ;;  %v495_v51 = vld [vmem:[%s7382_s1 + $0x7e0] sm:$0xff] }
  0xc5   : > { %4320 = vmatpush3.msra.mxu0 %v411_v52  ;;  %4355 = vmatpush3.msra.mxu1 %v427_v53  ;;  %v478_v52 = vld [vmem:[%s7382_s1 + $0x758] sm:$0xff] }
  0xc6   : > { %4321 = vmatprep.subr.mxu0 %v4971_v2  ;;  %4356 = vmatprep.subr.mxu1 %v4971_v2  ;;  %v494_v53 = vld [vmem:[%s7382_s1 + $0x7d8] sm:$0xff] }
  0xc7   : > { %4322 = vmatpush3.msra.mxu0 %v410_v54  ;;  %4357 = vmatpush3.msra.mxu1 %v426_v55  ;;  %v477_v54 = vld [vmem:[%s7382_s1 + $0x750] sm:$0xff] }
  0xc8   : > { %4323 = vmatprep.subr.mxu0 %v4971_v2  ;;  %4358 = vmatprep.subr.mxu1 %v4971_v2  ;;  %v493_v55 = vld [vmem:[%s7382_s1 + $0x7d0] sm:$0xff] }
  0xc9   : > { %4324 = vmatpush3.msra.mxu0 %v409_v56  ;;  %4359 = vmatpush3.msra.mxu1 %v425_v57  ;;  %v476_v56 = vld [vmem:[%s7382_s1 + $0x748] sm:$0xff] }
  0xca   : > { %4325 = vmatprep.subr.mxu0 %v4971_v2  ;;  %4360 = vmatprep.subr.mxu1 %v4971_v2  ;;  %v492_v57 = vld [vmem:[%s7382_s1 + $0x7c8] sm:$0xff] }
  0xcb   : > { %4326 = vmatpush3.msra.mxu0 %v408_v58  ;;  %4361 = vmatpush3.msra.mxu1 %v424_v59  ;;  %v475_v58 = vld [vmem:[%s7382_s1 + $0x740] sm:$0xff] }
  0xcc   : > { %4327 = vmatprep.subr.mxu0 %v4971_v2  ;;  %4362 = vmatprep.subr.mxu1 %v4971_v2  ;;  %v491_v59 = vld [vmem:[%s7382_s1 + $0x7c0] sm:$0xff] }
  0xcd   : > { %4328 = vmatpush3.msra.mxu0 %v407_v60  ;;  %4363 = vmatpush3.msra.mxu1 %v423_v61  ;;  %v474_v60 = vld [vmem:[%s7382_s1 + $0x738] sm:$0xff] }
  0xce   : > { %4329 = vmatprep.subr.mxu0 %v4971_v2  ;;  %4364 = vmatprep.subr.mxu1 %v4971_v2  ;;  %v490_v61 = vld [vmem:[%s7382_s1 + $0x7b8] sm:$0xff] }
  0xcf   : > { %4330 = vmatpush3.msra.mxu0 %v406_v62  ;;  %4365 = vmatpush3.msra.mxu1 %v422_v63  ;;  %v473_v62 = vld [vmem:[%s7382_s1 + $0x730] sm:$0xff] }
  0xd0   : > { %4331 = vmatprep.subr.mxu0 %v4971_v2  ;;  %4366 = vmatprep.subr.mxu1 %v4971_v2  ;;  %v489_v63 = vld [vmem:[%s7382_s1 + $0x7b0] sm:$0xff] }
  0xd1   : > { %4332 = vmatpush3.msra.mxu0 %v405_v0  ;;  %4367 = vmatpush3.msra.mxu1 %v421_v1  ;;  %v472_v0 = vld [vmem:[%s7382_s1 + $0x728] sm:$0xff] }
  0xd2   : > { %4333 = vmatprep.subr.mxu0 %v4971_v2  ;;  %4368 = vmatprep.subr.mxu1 %v4971_v2  ;;  %v488_v1 = vld [vmem:[%s7382_s1 + $0x7a8] sm:$0xff] }
  0xd3   : > { %4334 = vmatpush3.msra.mxu0 %v404_v3  ;;  %4369 = vmatpush3.msra.mxu1 %v420_v4  ;;  %v471_v3 = vld [vmem:[%s7382_s1 + $0x720] sm:$0xff] }
  0xd4   : > { %4335 = vmatprep.subr.mxu0 %v4971_v2  ;;  %4370 = vmatprep.subr.mxu1 %v4971_v2  ;;  %v487_v4 = vld [vmem:[%s7382_s1 + $0x7a0] sm:$0xff] }
  0xd5   : > { %4336 = vmatpush3.msra.mxu0 %v403_v5  ;;  %4337 = vmatprep.mubr.msk.f32.mxu0 %vm4972_vm0, %v4971_v2 }
  0xd6   : > { %4371 = vmatpush3.msra.mxu1 %v419_v6  ;;  %4372 = vmatprep.mubr.msk.f32.mxu1 %vm4972_vm0, %v4971_v2 }
  0xd7   : > { %4338 = vmatmul.mubr.f32.vlgmr.msra.gmra.mxu0 %v5158_v33  ;;  %4373 = vmatmul.mubr.f32.vlgmr.msra.gmra.mxu1 %v5158_v33  ;;  %v448_v33 = vld [vmem:[%s7382_s1 + $0x668] sm:$0xff] }
  0xd8   : > { %4375 = vmatprep.subr.mxu0 %v4971_v2  ;;  %4410 = vmatprep.subr.mxu1 %v4971_v2 }
  0xd9   : > { %4376 = vmatpush3.msra.mxu0 %v450_v7  ;;  %4411 = vmatpush3.msra.mxu1 %v466_v8  ;;  %v470_v7 = vld [vmem:[%s7382_s1 + $0x718] sm:$0xff] }
  0xda   : > { %4377 = vmatprep.subr.mxu0 %v4971_v2  ;;  %4412 = vmatprep.subr.mxu1 %v4971_v2  ;;  %v486_v8 = vld [vmem:[%s7382_s1 + $0x798] sm:$0xff] }
  0xdb   : > { %4378 = vmatpush3.msra.mxu0 %v449_v9  ;;  %4413 = vmatpush3.msra.mxu1 %v465_v10 }
  0xdc   : > { %4379 = vmatprep.subr.mxu0 %v4971_v2  ;;  %4414 = vmatprep.subr.mxu1 %v4971_v2 }
  0xdd   : > { %4380 = vmatpush3.msra.mxu0 %v448_v33  ;;  %4415 = vmatpush3.msra.mxu1 %v464_v11  ;;  %v469_v33 = vld [vmem:[%s7382_s1 + $0x710] sm:$0xff] }
  0xde   : > { %4381 = vmatprep.subr.mxu0 %v4971_v2  ;;  %4416 = vmatprep.subr.mxu1 %v4971_v2  ;;  %v485_v11 = vld [vmem:[%s7382_s1 + $0x790] sm:$0xff] }
  0xdf   : > { %4382 = vmatpush3.msra.mxu0 %v447_v12  ;;  %4417 = vmatpush3.msra.mxu1 %v463_v13  ;;  %v468_v12 = vld [vmem:[%s7382_s1 + $0x708] sm:$0xff] }
  0xe0   : > { %4383 = vmatprep.subr.mxu0 %v4971_v2  ;;  %4418 = vmatprep.subr.mxu1 %v4971_v2  ;;  %v484_v13 = vld [vmem:[%s7382_s1 + $0x788] sm:$0xff] }
  0xe1   : > { %4384 = vmatpush3.msra.mxu0 %v446_v14  ;;  %4419 = vmatpush3.msra.mxu1 %v462_v15  ;;  %v467_v14 = vld [vmem:[%s7382_s1 + $0x700] sm:$0xff] }
  0xe2   : > { %4385 = vmatprep.subr.mxu0 %v4971_v2  ;;  %4420 = vmatprep.subr.mxu1 %v4971_v2  ;;  %v483_v15 = vld [vmem:[%s7382_s1 + $0x780] sm:$0xff] }
  0xe3   : > { %4386 = vmatpush3.msra.mxu0 %v445_v16  ;;  %4421 = vmatpush3.msra.mxu1 %v461_v17  ;;  %v514_v16 = vld [vmem:[%s7382_s1 + $0x878] sm:$0xff] }
  0xe4   : > { %4387 = vmatprep.subr.mxu0 %v4971_v2  ;;  %4422 = vmatprep.subr.mxu1 %v4971_v2  ;;  %v530_v17 = vld [vmem:[%s7382_s1 + $0x8f8] sm:$0xff] }
  0xe5   : > { %4388 = vmatpush3.msra.mxu0 %v444_v18  ;;  %4423 = vmatpush3.msra.mxu1 %v460_v19  ;;  %v513_v18 = vld [vmem:[%s7382_s1 + $0x870] sm:$0xff] }
  0xe6   : > { %4389 = vmatprep.subr.mxu0 %v4971_v2  ;;  %4424 = vmatprep.subr.mxu1 %v4971_v2  ;;  %v529_v19 = vld [vmem:[%s7382_s1 + $0x8f0] sm:$0xff] }
  0xe7   : > { %4390 = vmatpush3.msra.mxu0 %v443_v20  ;;  %4425 = vmatpush3.msra.mxu1 %v459_v21  ;;  %v512_v20 = vld [vmem:[%s7382_s1 + $0x868] sm:$0xff] }
  0xe8   : > { %4391 = vmatprep.subr.mxu0 %v4971_v2  ;;  %4426 = vmatprep.subr.mxu1 %v4971_v2  ;;  %v528_v21 = vld [vmem:[%s7382_s1 + $0x8e8] sm:$0xff] }
  0xe9   : > { %4392 = vmatpush3.msra.mxu0 %v442_v22  ;;  %4427 = vmatpush3.msra.mxu1 %v458_v23  ;;  %v511_v22 = vld [vmem:[%s7382_s1 + $0x860] sm:$0xff] }
  0xea   : > { %4393 = vmatprep.subr.mxu0 %v4971_v2  ;;  %4428 = vmatprep.subr.mxu1 %v4971_v2  ;;  %v527_v23 = vld [vmem:[%s7382_s1 + $0x8e0] sm:$0xff] }
  0xeb   : > { %4394 = vmatpush3.msra.mxu0 %v441_v24  ;;  %4429 = vmatpush3.msra.mxu1 %v457_v25  ;;  %v510_v24 = vld [vmem:[%s7382_s1 + $0x858] sm:$0xff] }
  0xec   : > { %4395 = vmatprep.subr.mxu0 %v4971_v2  ;;  %4430 = vmatprep.subr.mxu1 %v4971_v2  ;;  %v526_v25 = vld [vmem:[%s7382_s1 + $0x8d8] sm:$0xff] }
  0xed   : > { %4396 = vmatpush3.msra.mxu0 %v440_v26  ;;  %4431 = vmatpush3.msra.mxu1 %v456_v27  ;;  %v5930_v30 = vpop.f32.mrf.mxu0  ;;  %v5932_v31 = vpop.f32.mrf.mxu1  ;;  %v509_v26 = vld [vmem:[%s7382_s1 + $0x850] sm:$0xff] }
  0xee   : > { %4397 = vmatprep.subr.mxu0 %v4971_v2  ;;  %4432 = vmatprep.subr.mxu1 %v4971_v2  ;;  %v525_v27 = vld [vmem:[%s7382_s1 + $0x8d0] sm:$0xff] }
  0xef   : > { %4398 = vmatpush3.msra.mxu0 %v439_v28  ;;  %4433 = vmatpush3.msra.mxu1 %v455_v29  ;;  %v3989_v35 = vpop.f32.mrf.mxu0  ;;  %v4024_v36 = vpop.f32.mrf.mxu1  ;;  %v508_v28 = vld [vmem:[%s7382_s1 + $0x848] sm:$0xff] }
  0xf0   : > { %4399 = vmatprep.subr.mxu0 %v4971_v2  ;;  %4434 = vmatprep.subr.mxu1 %v4971_v2  ;;  %v524_v29 = vld [vmem:[%s7382_s1 + $0x8c8] sm:$0xff]  ;;  %v506_v35 = vld [vmem:[%s7382_s1 + $0x838] sm:$0xff] }
  0xf1   : > { %4400 = vmatpush3.msra.mxu0 %v438_v32  ;;  %4435 = vmatpush3.msra.mxu1 %v454_v34  ;;  %v507_v32 = vld [vmem:[%s7382_s1 + $0x840] sm:$0xff]  ;;  %v522_v36 = vld [vmem:[%s7382_s1 + $0x8b8] sm:$0xff] }
  0xf2   : > { %4401 = vmatprep.subr.mxu0 %v4971_v2  ;;  %4436 = vmatprep.subr.mxu1 %v4971_v2  ;;  %v523_v34 = vld [vmem:[%s7382_s1 + $0x8c0] sm:$0xff] }
  0xf3   : > { %4402 = vmatpush3.msra.mxu0 %v437_v37  ;;  %4437 = vmatpush3.msra.mxu1 %v453_v38  ;;  %v505_v37 = vld [vmem:[%s7382_s1 + $0x830] sm:$0xff] }
  0xf4   : > { %4403 = vmatprep.subr.mxu0 %v4971_v2  ;;  %4438 = vmatprep.subr.mxu1 %v4971_v2  ;;  %v521_v38 = vld [vmem:[%s7382_s1 + $0x8b0] sm:$0xff] }
  0xf5   : > { %4404 = vmatpush3.msra.mxu0 %v436_v39  ;;  %4439 = vmatpush3.msra.mxu1 %v452_v40  ;;  %v504_v39 = vld [vmem:[%s7382_s1 + $0x828] sm:$0xff] }
  0xf6   : > { %4405 = vmatprep.subr.mxu0 %v4971_v2  ;;  %4440 = vmatprep.subr.mxu1 %v4971_v2  ;;  %v520_v40 = vld [vmem:[%s7382_s1 + $0x8a8] sm:$0xff] }
  0xf7   : > { %4406 = vmatpush3.msra.mxu0 %v435_v41  ;;  %4407 = vmatprep.mubr.msk.f32.mxu0 %vm4972_vm0, %v4971_v2  ;;  %v503_v41 = vld [vmem:[%s7382_s1 + $0x820] sm:$0xff] }
  0xf8   : > { %4441 = vmatpush3.msra.mxu1 %v451_v42  ;;  %4442 = vmatprep.mubr.msk.f32.mxu1 %vm4972_vm0, %v4971_v2  ;;  %v519_v42 = vld [vmem:[%s7382_s1 + $0x8a0] sm:$0xff] }
  0xf9   : > { %4408 = vmatmul.mubr.f32.vlgmr.msra.gmra.mxu0 %v5979_v45  ;;  %4443 = vmatmul.mubr.f32.vlgmr.msra.gmra.mxu1 %v5979_v45 }
  0xfa   : > { %4445 = vmatprep.subr.mxu0 %v4971_v2  ;;  %4480 = vmatprep.subr.mxu1 %v4971_v2 }
  0xfb   : > { %4446 = vmatpush3.msra.mxu0 %v482_v43  ;;  %4481 = vmatpush3.msra.mxu1 %v498_v44 }
  0xfc   : > { %4447 = vmatprep.subr.mxu0 %v4971_v2  ;;  %4482 = vmatprep.subr.mxu1 %v4971_v2 }
  0xfd   : > { %4448 = vmatpush3.msra.mxu0 %v481_v46  ;;  %4483 = vmatpush3.msra.mxu1 %v497_v47  ;;  %v502_v46 = vld [vmem:[%s7382_s1 + $0x818] sm:$0xff] }
  0xfe   : > { %4449 = vmatprep.subr.mxu0 %v4971_v2  ;;  %4484 = vmatprep.subr.mxu1 %v4971_v2  ;;  %v518_v47 = vld [vmem:[%s7382_s1 + $0x898] sm:$0xff] }
  0xff   : > { %4450 = vmatpush3.msra.mxu0 %v480_v48  ;;  %4485 = vmatpush3.msra.mxu1 %v496_v49 }
 0x100   : > { %4451 = vmatprep.subr.mxu0 %v4971_v2  ;;  %4486 = vmatprep.subr.mxu1 %v4971_v2 }
 0x101   : > { %4452 = vmatpush3.msra.mxu0 %v479_v50  ;;  %4487 = vmatpush3.msra.mxu1 %v495_v51  ;;  %v501_v50 = vld [vmem:[%s7382_s1 + $0x810] sm:$0xff] }
 0x102   : > { %4453 = vmatprep.subr.mxu0 %v4971_v2  ;;  %4488 = vmatprep.subr.mxu1 %v4971_v2  ;;  %v517_v51 = vld [vmem:[%s7382_s1 + $0x890] sm:$0xff] }
 0x103   : > { %4454 = vmatpush3.msra.mxu0 %v478_v52  ;;  %4489 = vmatpush3.msra.mxu1 %v494_v53  ;;  %v500_v52 = vld [vmem:[%s7382_s1 + $0x808] sm:$0xff] }
 0x104   : > { %4455 = vmatprep.subr.mxu0 %v4971_v2  ;;  %4490 = vmatprep.subr.mxu1 %v4971_v2  ;;  %v516_v53 = vld [vmem:[%s7382_s1 + $0x888] sm:$0xff] }
 0x105   : > { %4456 = vmatpush3.msra.mxu0 %v477_v54  ;;  %4491 = vmatpush3.msra.mxu1 %v493_v55  ;;  %v499_v54 = vld [vmem:[%s7382_s1 + $0x800] sm:$0xff] }
 0x106   : > { %4457 = vmatprep.subr.mxu0 %v4971_v2  ;;  %4492 = vmatprep.subr.mxu1 %v4971_v2  ;;  %v515_v55 = vld [vmem:[%s7382_s1 + $0x880] sm:$0xff] }
 0x107   : > { %4458 = vmatpush3.msra.mxu0 %v476_v56  ;;  %4493 = vmatpush3.msra.mxu1 %v492_v57  ;;  %v546_v56 = vld [vmem:[%s7382_s1 + $0x978] sm:$0xff] }
 0x108   : > { %4459 = vmatprep.subr.mxu0 %v4971_v2  ;;  %4494 = vmatprep.subr.mxu1 %v4971_v2  ;;  %v562_v57 = vld [vmem:[%s7382_s1 + $0x9f8] sm:$0xff] }
 0x109   : > { %4460 = vmatpush3.msra.mxu0 %v475_v58  ;;  %4495 = vmatpush3.msra.mxu1 %v491_v59  ;;  %v545_v58 = vld [vmem:[%s7382_s1 + $0x970] sm:$0xff] }
 0x10a   : > { %4461 = vmatprep.subr.mxu0 %v4971_v2  ;;  %4496 = vmatprep.subr.mxu1 %v4971_v2  ;;  %v561_v59 = vld [vmem:[%s7382_s1 + $0x9f0] sm:$0xff] }
 0x10b   : > { %4462 = vmatpush3.msra.mxu0 %v474_v60  ;;  %4497 = vmatpush3.msra.mxu1 %v490_v61  ;;  %v544_v60 = vld [vmem:[%s7382_s1 + $0x968] sm:$0xff] }
 0x10c   : > { %4463 = vmatprep.subr.mxu0 %v4971_v2  ;;  %4498 = vmatprep.subr.mxu1 %v4971_v2  ;;  %v560_v61 = vld [vmem:[%s7382_s1 + $0x9e8] sm:$0xff] }
 0x10d   : > { %4464 = vmatpush3.msra.mxu0 %v473_v62  ;;  %4499 = vmatpush3.msra.mxu1 %v489_v63  ;;  %v543_v62 = vld [vmem:[%s7382_s1 + $0x960] sm:$0xff] }
 0x10e   : > { %4465 = vmatprep.subr.mxu0 %v4971_v2  ;;  %4500 = vmatprep.subr.mxu1 %v4971_v2  ;;  %v559_v63 = vld [vmem:[%s7382_s1 + $0x9e0] sm:$0xff] }
 0x10f   : > { %4466 = vmatpush3.msra.mxu0 %v472_v0  ;;  %4501 = vmatpush3.msra.mxu1 %v488_v1  ;;  %v6071_v5 = vpop.f32.mrf.mxu0  ;;  %v6073_v6 = vpop.f32.mrf.mxu1  ;;  %v542_v0 = vld [vmem:[%s7382_s1 + $0x958] sm:$0xff] }
 0x110   : > { %4467 = vmatprep.subr.mxu0 %v4971_v2  ;;  %4502 = vmatprep.subr.mxu1 %v4971_v2  ;;  %v558_v1 = vld [vmem:[%s7382_s1 + $0x9d8] sm:$0xff] }
 0x111   : > { %4468 = vmatpush3.msra.mxu0 %v471_v3  ;;  %4503 = vmatpush3.msra.mxu1 %v487_v4  ;;  %v4059_v9 = vpop.f32.mrf.mxu0  ;;  %v4094_v10 = vpop.f32.mrf.mxu1  ;;  %v541_v3 = vld [vmem:[%s7382_s1 + $0x950] sm:$0xff] }
 0x112   : > { %4469 = vmatprep.subr.mxu0 %v4971_v2  ;;  %4504 = vmatprep.subr.mxu1 %v4971_v2  ;;  %v557_v4 = vld [vmem:[%s7382_s1 + $0x9d0] sm:$0xff]  ;;  %v539_v9 = vld [vmem:[%s7382_s1 + $0x940] sm:$0xff] }
 0x113   : > { %4470 = vmatpush3.msra.mxu0 %v470_v7  ;;  %4505 = vmatpush3.msra.mxu1 %v486_v8  ;;  %v540_v7 = vld [vmem:[%s7382_s1 + $0x948] sm:$0xff]  ;;  %v555_v10 = vld [vmem:[%s7382_s1 + $0x9c0] sm:$0xff] }
 0x114   : > { %4471 = vmatprep.subr.mxu0 %v4971_v2  ;;  %4506 = vmatprep.subr.mxu1 %v4971_v2  ;;  %v556_v8 = vld [vmem:[%s7382_s1 + $0x9c8] sm:$0xff] }
 0x115   : > { %4472 = vmatpush3.msra.mxu0 %v469_v33  ;;  %4507 = vmatpush3.msra.mxu1 %v485_v11  ;;  %v538_v33 = vld [vmem:[%s7382_s1 + $0x938] sm:$0xff] }
 0x116   : > { %4473 = vmatprep.subr.mxu0 %v4971_v2  ;;  %4508 = vmatprep.subr.mxu1 %v4971_v2  ;;  %v554_v11 = vld [vmem:[%s7382_s1 + $0x9b8] sm:$0xff] }
 0x117   : > { %4474 = vmatpush3.msra.mxu0 %v468_v12  ;;  %4509 = vmatpush3.msra.mxu1 %v484_v13  ;;  %v537_v12 = vld [vmem:[%s7382_s1 + $0x930] sm:$0xff] }
 0x118   : > { %4475 = vmatprep.subr.mxu0 %v4971_v2  ;;  %4510 = vmatprep.subr.mxu1 %v4971_v2  ;;  %v553_v13 = vld [vmem:[%s7382_s1 + $0x9b0] sm:$0xff] }
 0x119   : > { %4476 = vmatpush3.msra.mxu0 %v467_v14  ;;  %4477 = vmatprep.mubr.msk.f32.mxu0 %vm4972_vm0, %v4971_v2  ;;  %v536_v14 = vld [vmem:[%s7382_s1 + $0x928] sm:$0xff] }
 0x11a   : > { %4511 = vmatpush3.msra.mxu1 %v483_v15  ;;  %4512 = vmatprep.mubr.msk.f32.mxu1 %vm4972_vm0, %v4971_v2  ;;  %v552_v15 = vld [vmem:[%s7382_s1 + $0x9a8] sm:$0xff] }
 0x11b   : > { %4478 = vmatmul.mubr.f32.vlgmr.msra.gmra.mxu0 %v5979_v45  ;;  %4513 = vmatmul.mubr.f32.vlgmr.msra.gmra.mxu1 %v5979_v45 }
 0x11c   : > { %4515 = vmatprep.subr.mxu0 %v4971_v2  ;;  %4550 = vmatprep.subr.mxu1 %v4971_v2 }
 0x11d   : > { %4516 = vmatpush3.msra.mxu0 %v514_v16  ;;  %4551 = vmatpush3.msra.mxu1 %v530_v17  ;;  %v535_v16 = vld [vmem:[%s7382_s1 + $0x920] sm:$0xff] }
 0x11e   : > { %4517 = vmatprep.subr.mxu0 %v4971_v2  ;;  %4552 = vmatprep.subr.mxu1 %v4971_v2  ;;  %v551_v17 = vld [vmem:[%s7382_s1 + $0x9a0] sm:$0xff] }
 0x11f   : > { %4518 = vmatpush3.msra.mxu0 %v513_v18  ;;  %4553 = vmatpush3.msra.mxu1 %v529_v19 }
 0x120   : > { %4519 = vmatprep.subr.mxu0 %v4971_v2  ;;  %4554 = vmatprep.subr.mxu1 %v4971_v2 }
 0x121   : > { %4520 = vmatpush3.msra.mxu0 %v512_v20  ;;  %4555 = vmatpush3.msra.mxu1 %v528_v21  ;;  %v534_v20 = vld [vmem:[%s7382_s1 + $0x918] sm:$0xff] }
 0x122   : > { %4521 = vmatprep.subr.mxu0 %v4971_v2  ;;  %4556 = vmatprep.subr.mxu1 %v4971_v2  ;;  %v550_v21 = vld [vmem:[%s7382_s1 + $0x998] sm:$0xff] }
 0x123   : > { %4522 = vmatpush3.msra.mxu0 %v511_v22  ;;  %4557 = vmatpush3.msra.mxu1 %v527_v23 }
 0x124   : > { %4523 = vmatprep.subr.mxu0 %v4971_v2  ;;  %4558 = vmatprep.subr.mxu1 %v4971_v2 }
 0x125   : > { %4524 = vmatpush3.msra.mxu0 %v510_v24  ;;  %4559 = vmatpush3.msra.mxu1 %v526_v25  ;;  %v533_v24 = vld [vmem:[%s7382_s1 + $0x910] sm:$0xff] }
 0x126   : > { %4525 = vmatprep.subr.mxu0 %v4971_v2  ;;  %4560 = vmatprep.subr.mxu1 %v4971_v2  ;;  %v549_v25 = vld [vmem:[%s7382_s1 + $0x990] sm:$0xff] }
 0x127   : > { %4526 = vmatpush3.msra.mxu0 %v509_v26  ;;  %4561 = vmatpush3.msra.mxu1 %v525_v27  ;;  %v532_v26 = vld [vmem:[%s7382_s1 + $0x908] sm:$0xff] }
 0x128   : > { %4527 = vmatprep.subr.mxu0 %v4971_v2  ;;  %4562 = vmatprep.subr.mxu1 %v4971_v2  ;;  %v548_v27 = vld [vmem:[%s7382_s1 + $0x988] sm:$0xff] }
 0x129   : > { %4528 = vmatpush3.msra.mxu0 %v508_v28  ;;  %4563 = vmatpush3.msra.mxu1 %v524_v29  ;;  %v531_v28 = vld [vmem:[%s7382_s1 + $0x900] sm:$0xff] }
 0x12a   : > { %4529 = vmatprep.subr.mxu0 %v4971_v2  ;;  %4564 = vmatprep.subr.mxu1 %v4971_v2  ;;  %v547_v29 = vld [vmem:[%s7382_s1 + $0x980] sm:$0xff] }
 0x12b   : > { %4530 = vmatpush3.msra.mxu0 %v507_v32  ;;  %4565 = vmatpush3.msra.mxu1 %v523_v34  ;;  %v578_v32 = vld [vmem:[%s7382_s1 + $0xa78] sm:$0xff] }
 0x12c   : > { %4531 = vmatprep.subr.mxu0 %v4971_v2  ;;  %4566 = vmatprep.subr.mxu1 %v4971_v2  ;;  %v594_v34 = vld [vmem:[%s7382_s1 + $0xaf8] sm:$0xff] }
 0x12d   : > { %4532 = vmatpush3.msra.mxu0 %v506_v35  ;;  %4567 = vmatpush3.msra.mxu1 %v522_v36  ;;  %v577_v35 = vld [vmem:[%s7382_s1 + $0xa70] sm:$0xff] }
 0x12e   : > { %4533 = vmatprep.subr.mxu0 %v4971_v2  ;;  %4568 = vmatprep.subr.mxu1 %v4971_v2  ;;  %v593_v36 = vld [vmem:[%s7382_s1 + $0xaf0] sm:$0xff] }
 0x12f   : > { %4534 = vmatpush3.msra.mxu0 %v505_v37  ;;  %4569 = vmatpush3.msra.mxu1 %v521_v38  ;;  %v576_v37 = vld [vmem:[%s7382_s1 + $0xa68] sm:$0xff] }
 0x130   : > { %4535 = vmatprep.subr.mxu0 %v4971_v2  ;;  %4570 = vmatprep.subr.mxu1 %v4971_v2  ;;  %v592_v38 = vld [vmem:[%s7382_s1 + $0xae8] sm:$0xff] }
 0x131   : > { %4536 = vmatpush3.msra.mxu0 %v504_v39  ;;  %4571 = vmatpush3.msra.mxu1 %v520_v40  ;;  %v6209_v43 = vpop.f32.mrf.mxu0  ;;  %v6211_v44 = vpop.f32.mrf.mxu1  ;;  %v575_v39 = vld [vmem:[%s7382_s1 + $0xa60] sm:$0xff] }
 0x132   : > { %4537 = vmatprep.subr.mxu0 %v4971_v2  ;;  %4572 = vmatprep.subr.mxu1 %v4971_v2  ;;  %v591_v40 = vld [vmem:[%s7382_s1 + $0xae0] sm:$0xff] }
 0x133   : > { %4538 = vmatpush3.msra.mxu0 %v503_v41  ;;  %4573 = vmatpush3.msra.mxu1 %v519_v42  ;;  %v4129_v48 = vpop.f32.mrf.mxu0  ;;  %v4164_v49 = vpop.f32.mrf.mxu1  ;;  %v574_v41 = vld [vmem:[%s7382_s1 + $0xa58] sm:$0xff] }
 0x134   : > { %4539 = vmatprep.subr.mxu0 %v4971_v2  ;;  %4574 = vmatprep.subr.mxu1 %v4971_v2  ;;  %v590_v42 = vld [vmem:[%s7382_s1 + $0xad8] sm:$0xff]  ;;  %v572_v48 = vld [vmem:[%s7382_s1 + $0xa48] sm:$0xff] }
 0x135   : > { %4540 = vmatpush3.msra.mxu0 %v502_v46  ;;  %4575 = vmatpush3.msra.mxu1 %v518_v47  ;;  %v573_v46 = vld [vmem:[%s7382_s1 + $0xa50] sm:$0xff]  ;;  %v588_v49 = vld [vmem:[%s7382_s1 + $0xac8] sm:$0xff] }
 0x136   : > { %4541 = vmatprep.subr.mxu0 %v4971_v2  ;;  %4576 = vmatprep.subr.mxu1 %v4971_v2  ;;  %v589_v47 = vld [vmem:[%s7382_s1 + $0xad0] sm:$0xff] }
 0x137   : > { %4542 = vmatpush3.msra.mxu0 %v501_v50  ;;  %4577 = vmatpush3.msra.mxu1 %v517_v51  ;;  %v571_v50 = vld [vmem:[%s7382_s1 + $0xa40] sm:$0xff] }
 0x138   : > { %4543 = vmatprep.subr.mxu0 %v4971_v2  ;;  %4578 = vmatprep.subr.mxu1 %v4971_v2  ;;  %v587_v51 = vld [vmem:[%s7382_s1 + $0xac0] sm:$0xff] }
 0x139   : > { %4544 = vmatpush3.msra.mxu0 %v500_v52  ;;  %4579 = vmatpush3.msra.mxu1 %v516_v53  ;;  %v570_v52 = vld [vmem:[%s7382_s1 + $0xa38] sm:$0xff] }
 0x13a   : > { %4545 = vmatprep.subr.mxu0 %v4971_v2  ;;  %4580 = vmatprep.subr.mxu1 %v4971_v2  ;;  %v586_v53 = vld [vmem:[%s7382_s1 + $0xab8] sm:$0xff] }
 0x13b   : > { %4546 = vmatpush3.msra.mxu0 %v499_v54  ;;  %4547 = vmatprep.mubr.msk.f32.mxu0 %vm4972_vm0, %v4971_v2  ;;  %v569_v54 = vld [vmem:[%s7382_s1 + $0xa30] sm:$0xff] }
 0x13c   : > { %4581 = vmatpush3.msra.mxu1 %v515_v55  ;;  %4582 = vmatprep.mubr.msk.f32.mxu1 %vm4972_vm0, %v4971_v2  ;;  %v585_v55 = vld [vmem:[%s7382_s1 + $0xab0] sm:$0xff] }
 0x13d   : > { %4548 = vmatmul.mubr.f32.vlgmr.msra.gmra.mxu0 %v5979_v45  ;;  %4583 = vmatmul.mubr.f32.vlgmr.msra.gmra.mxu1 %v5979_v45 }
 0x13e   : > { %4585 = vmatprep.subr.mxu0 %v4971_v2  ;;  %4620 = vmatprep.subr.mxu1 %v4971_v2 }
 0x13f   : > { %4586 = vmatpush3.msra.mxu0 %v546_v56  ;;  %4621 = vmatpush3.msra.mxu1 %v562_v57  ;;  %v568_v56 = vld [vmem:[%s7382_s1 + $0xa28] sm:$0xff] }
 0x140   : > { %4587 = vmatprep.subr.mxu0 %v4971_v2  ;;  %4622 = vmatprep.subr.mxu1 %v4971_v2  ;;  %v584_v57 = vld [vmem:[%s7382_s1 + $0xaa8] sm:$0xff] }
 0x141   : > { %4588 = vmatpush3.msra.mxu0 %v545_v58  ;;  %4623 = vmatpush3.msra.mxu1 %v561_v59  ;;  %v567_v58 = vld [vmem:[%s7382_s1 + $0xa20] sm:$0xff] }
 0x142   : > { %4589 = vmatprep.subr.mxu0 %v4971_v2  ;;  %4624 = vmatprep.subr.mxu1 %v4971_v2  ;;  %v583_v59 = vld [vmem:[%s7382_s1 + $0xaa0] sm:$0xff] }
 0x143   : > { %4590 = vmatpush3.msra.mxu0 %v544_v60  ;;  %4625 = vmatpush3.msra.mxu1 %v560_v61 }
 0x144   : > { %4591 = vmatprep.subr.mxu0 %v4971_v2  ;;  %4626 = vmatprep.subr.mxu1 %v4971_v2 }
 0x145   : > { %4592 = vmatpush3.msra.mxu0 %v543_v62  ;;  %4627 = vmatpush3.msra.mxu1 %v559_v63  ;;  %v566_v62 = vld [vmem:[%s7382_s1 + $0xa18] sm:$0xff] }
 0x146   : > { %4593 = vmatprep.subr.mxu0 %v4971_v2  ;;  %4628 = vmatprep.subr.mxu1 %v4971_v2  ;;  %v582_v63 = vld [vmem:[%s7382_s1 + $0xa98] sm:$0xff] }
 0x147   : > { %4594 = vmatpush3.msra.mxu0 %v542_v0  ;;  %4629 = vmatpush3.msra.mxu1 %v558_v1 }
 0x148   : > { %4595 = vmatprep.subr.mxu0 %v4971_v2  ;;  %4630 = vmatprep.subr.mxu1 %v4971_v2 }
 0x149   : > { %4596 = vmatpush3.msra.mxu0 %v541_v3  ;;  %4631 = vmatpush3.msra.mxu1 %v557_v4  ;;  %v565_v3 = vld [vmem:[%s7382_s1 + $0xa10] sm:$0xff] }
 0x14a   : > { %4597 = vmatprep.subr.mxu0 %v4971_v2  ;;  %4632 = vmatprep.subr.mxu1 %v4971_v2  ;;  %v581_v4 = vld [vmem:[%s7382_s1 + $0xa90] sm:$0xff] }
 0x14b   : > { %4598 = vmatpush3.msra.mxu0 %v540_v7  ;;  %4633 = vmatpush3.msra.mxu1 %v556_v8  ;;  %v564_v7 = vld [vmem:[%s7382_s1 + $0xa08] sm:$0xff] }
 0x14c   : > { %4599 = vmatprep.subr.mxu0 %v4971_v2  ;;  %4634 = vmatprep.subr.mxu1 %v4971_v2  ;;  %v580_v8 = vld [vmem:[%s7382_s1 + $0xa88] sm:$0xff] }
 0x14d   : > { %4600 = vmatpush3.msra.mxu0 %v539_v9  ;;  %4635 = vmatpush3.msra.mxu1 %v555_v10  ;;  %v563_v9 = vld [vmem:[%s7382_s1 + $0xa00] sm:$0xff] }
 0x14e   : > { %4601 = vmatprep.subr.mxu0 %v4971_v2  ;;  %4636 = vmatprep.subr.mxu1 %v4971_v2  ;;  %v579_v10 = vld [vmem:[%s7382_s1 + $0xa80] sm:$0xff] }
 0x14f   : > { %4602 = vmatpush3.msra.mxu0 %v538_v33  ;;  %4637 = vmatpush3.msra.mxu1 %v554_v11  ;;  %v610_v33 = vld [vmem:[%s7382_s1 + $0xb78] sm:$0xff] }
 0x150   : > { %4603 = vmatprep.subr.mxu0 %v4971_v2  ;;  %4638 = vmatprep.subr.mxu1 %v4971_v2  ;;  %v626_v11 = vld [vmem:[%s7382_s1 + $0xbf8] sm:$0xff] }
 0x151   : > { %4604 = vmatpush3.msra.mxu0 %v537_v12  ;;  %4639 = vmatpush3.msra.mxu1 %v553_v13  ;;  %v609_v12 = vld [vmem:[%s7382_s1 + $0xb70] sm:$0xff] }
 0x152   : > { %4605 = vmatprep.subr.mxu0 %v4971_v2  ;;  %4640 = vmatprep.subr.mxu1 %v4971_v2  ;;  %v625_v13 = vld [vmem:[%s7382_s1 + $0xbf0] sm:$0xff] }
 0x153   : > { %4606 = vmatpush3.msra.mxu0 %v536_v14  ;;  %4641 = vmatpush3.msra.mxu1 %v552_v15  ;;  %v6347_v18 = vpop.f32.mrf.mxu0  ;;  %v6349_v19 = vpop.f32.mrf.mxu1  ;;  %v624_v14 = vld [vmem:[%s7382_s1 + $0xbe8] sm:$0xff]  ;;  %v607_v15 = vld [vmem:[%s7382_s1 + $0xb60] sm:$0xff] }
 0x154   : > { %4607 = vmatprep.subr.mxu0 %v4971_v2  ;;  %4642 = vmatprep.subr.mxu1 %v4971_v2 }
 0x155   : > { %4608 = vmatpush3.msra.mxu0 %v535_v16  ;;  %4643 = vmatpush3.msra.mxu1 %v551_v17  ;;  %v4199_v22 = vpop.f32.mrf.mxu0  ;;  %v4234_v23 = vpop.f32.mrf.mxu1  ;;  %v623_v16 = vld [vmem:[%s7382_s1 + $0xbe0] sm:$0xff]  ;;  %v606_v17 = vld [vmem:[%s7382_s1 + $0xb58] sm:$0xff] }
 0x156   : > { %4609 = vmatprep.subr.mxu0 %v4971_v2  ;;  %4644 = vmatprep.subr.mxu1 %v4971_v2  ;;  %v621_v22 = vld [vmem:[%s7382_s1 + $0xbd0] sm:$0xff]  ;;  %v604_v23 = vld [vmem:[%s7382_s1 + $0xb48] sm:$0xff] }
 0x157   : > { %4610 = vmatpush3.msra.mxu0 %v534_v20  ;;  %4645 = vmatpush3.msra.mxu1 %v550_v21  ;;  %v622_v20 = vld [vmem:[%s7382_s1 + $0xbd8] sm:$0xff]  ;;  %v605_v21 = vld [vmem:[%s7382_s1 + $0xb50] sm:$0xff] }
 0x158   : > { %4611 = vmatprep.subr.mxu0 %v4971_v2  ;;  %4646 = vmatprep.subr.mxu1 %v4971_v2 }
 0x159   : > { %4612 = vmatpush3.msra.mxu0 %v533_v24  ;;  %4647 = vmatpush3.msra.mxu1 %v549_v25  ;;  %v620_v24 = vld [vmem:[%s7382_s1 + $0xbc8] sm:$0xff]  ;;  %v603_v25 = vld [vmem:[%s7382_s1 + $0xb40] sm:$0xff] }
 0x15a   : > { %4613 = vmatprep.subr.mxu0 %v4971_v2  ;;  %4648 = vmatprep.subr.mxu1 %v4971_v2 }
 0x15b   : > { %4614 = vmatpush3.msra.mxu0 %v532_v26  ;;  %4649 = vmatpush3.msra.mxu1 %v548_v27  ;;  %v619_v26 = vld [vmem:[%s7382_s1 + $0xbc0] sm:$0xff]  ;;  %v602_v27 = vld [vmem:[%s7382_s1 + $0xb38] sm:$0xff] }
 0x15c   : > { %4615 = vmatprep.subr.mxu0 %v4971_v2  ;;  %4650 = vmatprep.subr.mxu1 %v4971_v2 }
 0x15d   : > { %4616 = vmatpush3.msra.mxu0 %v531_v28  ;;  %4617 = vmatprep.mubr.msk.f32.mxu0 %vm4972_vm0, %v4971_v2  ;;  %v618_v28 = vld [vmem:[%s7382_s1 + $0xbb8] sm:$0xff] }
 0x15e   : > { %4651 = vmatpush3.msra.mxu1 %v547_v29  ;;  %4652 = vmatprep.mubr.msk.f32.mxu1 %vm4972_vm0, %v4971_v2  ;;  %v601_v29 = vld [vmem:[%s7382_s1 + $0xb30] sm:$0xff] }
 0x15f   : > { %4618 = vmatmul.mubr.f32.vlgmr.msra.gmra.mxu0 %v5979_v45  ;;  %4653 = vmatmul.mubr.f32.vlgmr.msra.gmra.mxu1 %v5979_v45 }
 0x160   : > { %4655 = vmatprep.subr.mxu0 %v4971_v2  ;;  %4690 = vmatprep.subr.mxu1 %v4971_v2 }
 0x161   : > { %4656 = vmatpush3.msra.mxu0 %v578_v32  ;;  %4691 = vmatpush3.msra.mxu1 %v594_v34  ;;  %v617_v32 = vld [vmem:[%s7382_s1 + $0xbb0] sm:$0xff]  ;;  %v600_v34 = vld [vmem:[%s7382_s1 + $0xb28] sm:$0xff] }
 0x162   : > { %4657 = vmatprep.subr.mxu0 %v4971_v2  ;;  %4692 = vmatprep.subr.mxu1 %v4971_v2 }
 0x163   : > { %4658 = vmatpush3.msra.mxu0 %v577_v35  ;;  %4693 = vmatpush3.msra.mxu1 %v593_v36  ;;  %v616_v35 = vld [vmem:[%s7382_s1 + $0xba8] sm:$0xff]  ;;  %v599_v36 = vld [vmem:[%s7382_s1 + $0xb20] sm:$0xff] }
 0x164   : > { %4659 = vmatprep.subr.mxu0 %v4971_v2  ;;  %4694 = vmatprep.subr.mxu1 %v4971_v2 }
 0x165   : > { %4660 = vmatpush3.msra.mxu0 %v576_v37  ;;  %4695 = vmatpush3.msra.mxu1 %v592_v38  ;;  %v615_v37 = vld [vmem:[%s7382_s1 + $0xba0] sm:$0xff] }
 0x166   : > { %4661 = vmatprep.subr.mxu0 %v4971_v2  ;;  %4696 = vmatprep.subr.mxu1 %v4971_v2 }
 0x167   : > { %4662 = vmatpush3.msra.mxu0 %v575_v39  ;;  %4697 = vmatpush3.msra.mxu1 %v591_v40  ;;  %v598_v40 = vld [vmem:[%s7382_s1 + $0xb18] sm:$0xff] }
 0x168   : > { %4663 = vmatprep.subr.mxu0 %v4971_v2  ;;  %4698 = vmatprep.subr.mxu1 %v4971_v2 }
 0x169   : > { %4664 = vmatpush3.msra.mxu0 %v574_v41  ;;  %4699 = vmatpush3.msra.mxu1 %v590_v42  ;;  %v614_v41 = vld [vmem:[%s7382_s1 + $0xb98] sm:$0xff] }
 0x16a   : > { %4665 = vmatprep.subr.mxu0 %v4971_v2  ;;  %4700 = vmatprep.subr.mxu1 %v4971_v2 }
 0x16b   : > { %4666 = vmatpush3.msra.mxu0 %v573_v46  ;;  %4701 = vmatpush3.msra.mxu1 %v589_v47  ;;  %v597_v47 = vld [vmem:[%s7382_s1 + $0xb10] sm:$0xff] }
 0x16c   : > { %4667 = vmatprep.subr.mxu0 %v4971_v2  ;;  %4702 = vmatprep.subr.mxu1 %v4971_v2 }
 0x16d   : > { %4668 = vmatpush3.msra.mxu0 %v572_v48  ;;  %4703 = vmatpush3.msra.mxu1 %v588_v49  ;;  %v613_v48 = vld [vmem:[%s7382_s1 + $0xb90] sm:$0xff]  ;;  %v596_v49 = vld [vmem:[%s7382_s1 + $0xb08] sm:$0xff] }
 0x16e   : > { %4669 = vmatprep.subr.mxu0 %v4971_v2  ;;  %4704 = vmatprep.subr.mxu1 %v4971_v2 }
 0x16f   : > { %4670 = vmatpush3.msra.mxu0 %v571_v50  ;;  %4705 = vmatpush3.msra.mxu1 %v587_v51  ;;  %v612_v50 = vld [vmem:[%s7382_s1 + $0xb88] sm:$0xff]  ;;  %v595_v51 = vld [vmem:[%s7382_s1 + $0xb00] sm:$0xff] }
 0x170   : > { %4671 = vmatprep.subr.mxu0 %v4971_v2  ;;  %4706 = vmatprep.subr.mxu1 %v4971_v2 }
 0x171   : > { %4672 = vmatpush3.msra.mxu0 %v570_v52  ;;  %4707 = vmatpush3.msra.mxu1 %v586_v53  ;;  %v611_v52 = vld [vmem:[%s7382_s1 + $0xb80] sm:$0xff] }
 0x172   : > { %4673 = vmatprep.subr.mxu0 %v4971_v2  ;;  %4708 = vmatprep.subr.mxu1 %v4971_v2  ;;  %v4962_v53 = vld [vmem:[%s5145_s12] sm:$0xf] }
 0x173   : > { %4674 = vmatpush3.msra.mxu0 %v569_v54  ;;  %4709 = vmatpush3.msra.mxu1 %v585_v55 }
 0x174   : > { %4675 = vmatprep.subr.mxu0 %v4971_v2  ;;  %4710 = vmatprep.subr.mxu1 %v4971_v2 }
 0x175   : > { %4676 = vmatpush3.msra.mxu0 %v568_v56  ;;  %4711 = vmatpush3.msra.mxu1 %v584_v57  ;;  %v6485_v60 = vpop.f32.mrf.mxu0  ;;  %v6487_v61 = vpop.f32.mrf.mxu1 }
 0x176   : > { %4677 = vmatprep.subr.mxu0 %v4971_v2  ;;  %4712 = vmatprep.subr.mxu1 %v4971_v2 }
 0x177   : > { %4678 = vmatpush3.msra.mxu0 %v567_v58  ;;  %4713 = vmatpush3.msra.mxu1 %v583_v59  ;;  %v4269_v0 = vpop.f32.mrf.mxu0  ;;  %v4304_v1 = vpop.f32.mrf.mxu1 }
 0x178   : > { %4679 = vmatprep.subr.mxu0 %v4971_v2  ;;  %4714 = vmatprep.subr.mxu1 %v4971_v2 }
 0x179   : > { %4680 = vmatpush3.msra.mxu0 %v566_v62  ;;  %4715 = vmatpush3.msra.mxu1 %v582_v63 }
 0x17a   : > { %4681 = vmatprep.subr.mxu0 %v4971_v2  ;;  %4716 = vmatprep.subr.mxu1 %v4971_v2 }
 0x17b   : > { %4682 = vmatpush3.msra.mxu0 %v565_v3  ;;  %4717 = vmatpush3.msra.mxu1 %v581_v4 }
 0x17c   : > { %4683 = vmatprep.subr.mxu0 %v4971_v2  ;;  %4718 = vmatprep.subr.mxu1 %v4971_v2 }
 0x17d   : > { %4684 = vmatpush3.msra.mxu0 %v564_v7  ;;  %4719 = vmatpush3.msra.mxu1 %v580_v8  ;;  %v6682_v7 = vld [vmem:[%s236_s21] sm:$0xff]  ;;  %v6684_v8 = vld [vmem:[%s236_s21 + $0x8] sm:$0xff] }
 0x17e   : > { %4685 = vmatprep.subr.mxu0 %v4971_v2  ;;  %4720 = vmatprep.subr.mxu1 %v4971_v2 }
 0x17f   : > { %4686 = vmatpush3.msra.mxu0 %v563_v9  ;;  %4687 = vmatprep.mubr.msk.f32.mxu0 %vm4972_vm0, %v4971_v2  ;;  %v6686_v9 = vld [vmem:[%s236_s21 + $0x10] sm:$0xff] }
 0x180   : > { %4721 = vmatpush3.msra.mxu1 %v579_v10  ;;  %4722 = vmatprep.mubr.msk.f32.mxu1 %vm4972_vm0, %v4971_v2  ;;  %v3010_v10 = vrot.slane %v6682_v7, 1 }
 0x181   : > { %4688 = vmatmul.mubr.f32.vlgmr.msra.gmra.mxu0 %v5979_v45  ;;  %4723 = vmatmul.mubr.f32.vlgmr.msra.gmra.mxu1 %v5979_v45  ;;  %v608_v45 = vld [vmem:[%s7382_s1 + $0xb68] sm:$0xff] }
 0x182   : > { %4725 = vmatprep.subr.mxu0 %v4971_v2  ;;  %4760 = vmatprep.subr.mxu1 %v4971_v2 }
 0x183   : > { %4726 = vmatpush3.msra.mxu0 %v610_v33  ;;  %4761 = vmatpush3.msra.mxu1 %v626_v11  ;;  %v3017_v33 = vrot.slane %v6684_v8, 1  ;;  %v3024_v11 = vrot.slane %v6686_v9, 1 }
 0x184   : > { %4727 = vmatprep.subr.mxu0 %v4971_v2  ;;  %4762 = vmatprep.subr.mxu1 %v4971_v2 }
 0x185   : > { %4728 = vmatpush3.msra.mxu0 %v609_v12  ;;  %4763 = vmatpush3.msra.mxu1 %v625_v13  ;;  %v3011_v12 = vrot.slane %v6682_v7, 2  ;;  %v3018_v13 = vrot.slane %v6684_v8, 2 }
 0x186   : > { %4729 = vmatprep.subr.mxu0 %v4971_v2  ;;  %4764 = vmatprep.subr.mxu1 %v4971_v2 }
 0x187   : > { %4730 = vmatpush3.msra.mxu0 %v608_v45  ;;  %4765 = vmatpush3.msra.mxu1 %v624_v14  ;;  %v3025_v45 = vrot.slane %v6686_v9, 2  ;;  %v3012_v14 = vrot.slane %v6682_v7, 3 }
 0x188   : > { %4731 = vmatprep.subr.mxu0 %v4971_v2  ;;  %4766 = vmatprep.subr.mxu1 %v4971_v2 }
 0x189   : > { %4732 = vmatpush3.msra.mxu0 %v607_v15  ;;  %4767 = vmatpush3.msra.mxu1 %v623_v16  ;;  %v3019_v15 = vrot.slane %v6684_v8, 3  ;;  %v3026_v16 = vrot.slane %v6686_v9, 3 }
 0x18a   : > { %4733 = vmatprep.subr.mxu0 %v4971_v2  ;;  %4768 = vmatprep.subr.mxu1 %v4971_v2 }
 0x18b   : > { %4734 = vmatpush3.msra.mxu0 %v606_v17  ;;  %4769 = vmatpush3.msra.mxu1 %v622_v20  ;;  %v3013_v17 = vrot.slane %v6682_v7, 4  ;;  %v3020_v20 = vrot.slane %v6684_v8, 4 }
 0x18c   : > { %4735 = vmatprep.subr.mxu0 %v4971_v2  ;;  %4770 = vmatprep.subr.mxu1 %v4971_v2 }
 0x18d   : > { %4736 = vmatpush3.msra.mxu0 %v605_v21  ;;  %4771 = vmatpush3.msra.mxu1 %v621_v22  ;;  %v3027_v21 = vrot.slane %v6686_v9, 4  ;;  %v3521_v22 = vld [vmem:[%s7383_s2] ss:$0 sm:$0xff] }
 0x18e   : > { %4737 = vmatprep.subr.mxu0 %v4971_v2  ;;  %4772 = vmatprep.subr.mxu1 %v4971_v2 }
 0x18f   : > { %4738 = vmatpush3.msra.mxu0 %v604_v23  ;;  %4773 = vmatpush3.msra.mxu1 %v620_v24  ;;  %v3522_v23 = vld [vmem:[%s7383_s2 + $0x1] ss:$0 sm:$0xff] }
 0x190   : > { %4739 = vmatprep.subr.mxu0 %v4971_v2  ;;  %4774 = vmatprep.subr.mxu1 %v4971_v2 }
 0x191   : > { %4740 = vmatpush3.msra.mxu0 %v603_v25  ;;  %4775 = vmatpush3.msra.mxu1 %v619_v26  ;;  %v3523_v26 = vld [vmem:[%s7383_s2 + $0x2] ss:$0 sm:$0xff] }
 0x192   : > { %4741 = vmatprep.subr.mxu0 %v4971_v2  ;;  %4776 = vmatprep.subr.mxu1 %v4971_v2 }
 0x193   : > { %4742 = vmatpush3.msra.mxu0 %v602_v27  ;;  %4777 = vmatpush3.msra.mxu1 %v618_v28 }
 0x194   : > { %4743 = vmatprep.subr.mxu0 %v4971_v2  ;;  %4778 = vmatprep.subr.mxu1 %v4971_v2 }
 0x195   : > { %4744 = vmatpush3.msra.mxu0 %v601_v29  ;;  %4779 = vmatpush3.msra.mxu1 %v617_v32  ;;  %v6732_v29 = vadd.f32 %v3521_v22, %v5930_v30  ;;  %v6735_v32 = vadd.f32 %v3522_v23, %v5932_v31  ;;  %v3525_v30 = vld [vmem:[%s7383_s2 + $0x4] ss:$0 sm:$0xff] }
 0x196   : > { %4745 = vmatprep.subr.mxu0 %v4971_v2  ;;  %4780 = vmatprep.subr.mxu1 %v4971_v2 }
 0x197   : > { %4746 = vmatpush3.msra.mxu0 %v600_v34  ;;  %4781 = vmatpush3.msra.mxu1 %v616_v35  ;;  %v6623_v38 = vpop.f32.mrf.mxu0  ;;  %v6625_v39 = vpop.f32.mrf.mxu1  ;;  %v6738_v34 = vadd.f32 %v3523_v26, %v6071_v5  ;;  %v3524_v35 = vld [vmem:[%s7383_s2 + $0x3] ss:$0 sm:$0xff] }
 0x198   : > { %4747 = vmatprep.subr.mxu0 %v4971_v2  ;;  %4782 = vmatprep.subr.mxu1 %v4971_v2  ;;  %v6753_v5 = vadd.f32 %v3524_v35, %v6073_v6 }
 0x199   : > { %4748 = vmatpush3.msra.mxu0 %v599_v36  ;;  %4783 = vmatpush3.msra.mxu1 %v615_v37  ;;  %v4339_v42 = vpop.f32.mrf.mxu0  ;;  %v4374_v46 = vpop.f32.mrf.mxu1  ;;  %v2476_v36 = vsel %vm2475_vm1, %v6732_v29, -inf  ;;  %v2477_v37 = vsel %vm2475_vm1, %v6735_v32, -inf  ;;  %v2478_v31 = vsel %vm2475_vm1, %v6738_v34, -inf }
 0x19a   : > { %4749 = vmatprep.subr.mxu0 %v4971_v2  ;;  %4784 = vmatprep.subr.mxu1 %v4971_v2  ;;  %v3526_v46 = vld [vmem:[%s7383_s2 + $0x5] ss:$0 sm:$0xff] }
 0x19b   : > { %4750 = vmatpush3.msra.mxu0 %v598_v40  ;;  %4785 = vmatpush3.msra.mxu1 %v614_v41  ;;  %v2481_v40 = vmax.f32 %v2476_v36, %v2477_v37  ;;  %v6756_v41 = vadd.f32 %v3525_v30, %v6209_v43  ;;  %v3536_v37 = vld [vmem:[%s7383_s2 + $0xf] ss:$0 sm:$0xff] }
 0x19c   : > { %4751 = vmatprep.subr.mxu0 %v4971_v2  ;;  %4786 = vmatprep.subr.mxu1 %v4971_v2 }
 0x19d   : > { %4752 = vmatpush3.msra.mxu0 %v597_v47  ;;  %4787 = vmatpush3.msra.mxu1 %v613_v48  ;;  %v2483_v42 = vmax.f32 %v2478_v31, %v2481_v40  ;;  %v2479_v47 = vsel %vm2475_vm1, %v6753_v5, -inf  ;;  %v3527_v48 = vld [vmem:[%s7383_s2 + $0x6] ss:$0 sm:$0xff]  ;;  %v2480_v6 = vsel %vm2475_vm1, %v6756_v41, -inf  ;;  %v3537_v31 = vld [vmem:[%s7383_s2 + $0x10] ss:$0 sm:$0xff] }
 0x19e   : > { %4753 = vmatprep.subr.mxu0 %v4971_v2  ;;  %4788 = vmatprep.subr.mxu1 %v4971_v2 }
 0x19f   : > { %4754 = vmatpush3.msra.mxu0 %v596_v49  ;;  %4789 = vmatpush3.msra.mxu1 %v612_v50  ;;  %v6769_v49 = vadd.f32 %v3526_v46, %v6211_v44  ;;  %v2485_v43 = vmax.f32 %v2479_v47, %v2483_v42  ;;  %v6772_v50 = vadd.f32 %v3527_v48, %v6347_v18  ;;  %v3538_v47 = vld [vmem:[%s7383_s2 + $0x11] ss:$0 sm:$0xff] }
 0x1a0   : > { %4755 = vmatprep.subr.mxu0 %v4971_v2  ;;  %4790 = vmatprep.subr.mxu1 %v4971_v2 }
 0x1a1   : > { %4756 = vmatpush3.msra.mxu0 %v595_v51  ;;  %4757 = vmatprep.mubr.msk.f32.mxu0 %vm4972_vm0, %v4971_v2  ;;  %v2487_v51 = vmax.f32 %v2480_v6, %v2485_v43  ;;  %v2484_v44 = vsel %vm2475_vm1, %v6772_v50, -inf  ;;  %v3539_v6 = vld [vmem:[%s7383_s2 + $0x12] ss:$0 sm:$0xff] }
 0x1a2   : > { %4791 = vmatpush3.msra.mxu1 %v611_v52  ;;  %4792 = vmatprep.mubr.msk.f32.mxu1 %vm4972_vm0, %v4971_v2  ;;  %v4973_v2 = vmov 23   ;;  %v3528_v52 = vld [vmem:[%s7383_s2 + $0x7] ss:$0 sm:$0xff] }
 0x1a3   : > { %4758 = vmatmul.mubr.f32.vlgmr.msra.gmra.mxu0 %v4962_v53  ;;  %4793 = vmatmul.mubr.f32.vlgmr.msra.gmra.mxu1 %v4962_v53  ;;  %v2482_v53 = vsel %vm2475_vm1, %v6769_v49, -inf }
 0x1a4   : > { %4814 = vset.pattern.permute.xlu1 %v4973_v2  ;;  %4813 = vset.pattern.permute.xlu0 %v4973_v2  ;;  %v2489_v18 = vmax.f32 %v2482_v53, %v2487_v51  ;;  %v3530_v2 = vld [vmem:[%s7383_s2 + $0x9] ss:$0 sm:$0xff]  ;;  %v3540_v53 = vld [vmem:[%s7383_s2 + $0x13] ss:$0 sm:$0xff] }
 0x1a5   : > { %3033 = vrot.lane.b32.xlu0 %v3010_v10, %s4974_s22  ;;  %3049 = vrot.lane.b32.xlu1 %v3017_v33, %s4974_s22  ;;  %v6801_v10 = vadd.f32 %v3530_v2, %v6487_v61 }
 0x1a9   : > { %3065 = vrot.lane.b32.xlu0 %v3024_v11, %s4974_s22  ;;  %3035 = vrot.lane.b32.xlu1 %v3011_v12, %s4974_s22  ;;  %v3532_v12 = vld [vmem:[%s7383_s2 + $0xb] ss:$0 sm:$0xff] }
 0x1ad   : > { %3051 = vrot.lane.b32.xlu0 %v3018_v13, %s4974_s22  ;;  %3067 = vrot.lane.b32.xlu1 %v3025_v45, %s4974_s22  ;;  %v2490_v13 = vsel %vm2475_vm1, %v6801_v10, -inf  ;;  %v3533_v45 = vld [vmem:[%s7383_s2 + $0xc] ss:$0 sm:$0xff] }
 0x1b1   : > { %3031 = vrot.lane.b32.xlu0 %v6682_v7, %s4974_s22  ;;  %3037 = vrot.lane.b32.xlu1 %v3012_v14, %s4974_s22  ;;  %v6817_v14 = vadd.f32 %v3532_v12, %v6625_v39  ;;  %v3535_v39 = vld [vmem:[%s7383_s2 + $0xe] ss:$0 sm:$0xff] }
 0x1b3   : > { %v2494_v26 = vsel %vm2475_vm1, %v6817_v14, -inf }
 0x1b5   : > { %3047 = vrot.lane.b32.xlu0 %v6684_v8, %s4974_s22  ;;  %3053 = vrot.lane.b32.xlu1 %v3019_v15, %s4974_s22 }
 0x1b9   : > { %v6666_v54 = vpop.f32.mrf.mxu0  ;;  %v6668_v55 = vpop.f32.mrf.mxu1  ;;  %3063 = vrot.lane.b32.xlu0 %v6686_v9, %s4974_s22  ;;  %3069 = vrot.lane.b32.xlu1 %v3026_v16, %s4974_s22 }
 0x1bb   : > { %v4409_v56 = vpop.f32.mrf.mxu0  ;;  %v4444_v57 = vpop.f32.mrf.mxu1 }
 0x1bc   : > { %v3529_v56 = vld [vmem:[%s7383_s2 + $0x8] ss:$0 sm:$0xff]  ;;  %v6785_v57 = vadd.f32 %v3528_v52, %v6349_v19 }
 0x1bd   : > { %3039 = vrot.lane.b32.xlu0 %v3013_v17, %s4974_s22  ;;  %3055 = vrot.lane.b32.xlu1 %v3020_v20, %s4974_s22  ;;  %v6820_v17 = vadd.f32 %v3533_v45, %v6666_v54 }
 0x1c1   : > { %3071 = vrot.lane.b32.xlu0 %v3027_v21, %s4974_s22  ;;  %v3534_v21 = vld [vmem:[%s7383_s2 + $0xd] ss:$0 sm:$0xff] }
 0x1c2   : > { %v6833_v54 = vadd.f32 %v3534_v21, %v6668_v55 }
 0x1c4   : > { %v2498_v30 = vsel %vm2475_vm1, %v6833_v54, -inf }
 0x1db   : > { %v6670_v58 = vpop.f32.mrf.mxu0  ;;  %v6672_v59 = vpop.f32.mrf.mxu1 }
 0x1dc   : > { %v6836_v35 = vadd.f32 %v3535_v39, %v6670_v58  ;;  %v6849_v40 = vadd.f32 %v3536_v37, %v6672_v59 }
 0x1dd   : > { %v4479_v62 = vpop.f32.mrf.mxu0  ;;  %v4514_v63 = vpop.f32.mrf.mxu1 }
 0x1de   : > { %v6788_v62 = vadd.f32 %v3529_v56, %v6485_v60  ;;  %v2491_v63 = vmax.f32 %v2484_v44, %v2489_v18  ;;  %v2500_v55 = vsel %vm2475_vm1, %v6836_v35, -inf  ;;  %7388 = vst [vmem:[#allocation2_spill] sm:$0xff] %v6849_v40  ;;  %v2502_v48 = vsel %vm2475_vm1, %v6849_v40, -inf  ;;  %v3541_v44 = vld [vmem:[%s7383_s2 + $0x14] ss:$0 sm:$0xff] }
 0x1e0   : > { %v2488_v19 = vsel %vm2475_vm1, %v6788_v62, -inf }
 0x1fd   : > { %v6674_v0 = vpop.f32.mrf.mxu0  ;;  %v6676_v1 = vpop.f32.mrf.mxu1 }
 0x1fe   : > { %v6852_v42 = vadd.f32 %v3537_v31, %v6674_v0  ;;  %v6865_v43 = vadd.f32 %v3538_v47, %v6676_v1 }
 0x1ff   : > { %v4549_v3 = vpop.f32.mrf.mxu0  ;;  %v4584_v4 = vpop.f32.mrf.mxu1 }
 0x200   : > { %v2486_v3 = vsel %vm2475_vm1, %v6785_v57, -inf  ;;  %v3531_v4 = vld [vmem:[%s7383_s2 + $0xa] ss:$0 sm:$0xff]  ;;  %v2504_v59 = vsel %vm2475_vm1, %v6852_v42, -inf  ;;  %v2506_v56 = vsel %vm2475_vm1, %v6865_v43, -inf }
 0x201   : > { %v2493_v60 = vmax.f32 %v2486_v3, %v2491_v63  ;;  %v6804_v33 = vadd.f32 %v3531_v4, %v6623_v38  ;;  %v3542_v3 = vld [vmem:[%s7383_s2 + $0x15] ss:$0 sm:$0xff] }
 0x203   : > { %v2495_v11 = vmax.f32 %v2488_v19, %v2493_v60  ;;  %v2492_v61 = vsel %vm2475_vm1, %v6804_v33, -inf }
 0x205   : > { %v2497_v38 = vmax.f32 %v2490_v13, %v2495_v11  ;;  %v3544_v13 = vld [vmem:[%s7383_s2 + $0x17] ss:$0 sm:$0xff] }
 0x207   : > { %v2499_v20 = vmax.f32 %v2492_v61, %v2497_v38 }
 0x21f   : > { %v6723_v24 = vpop.f32.mrf.mxu0  ;;  %v6725_v25 = vpop.f32.mrf.mxu1 }
 0x220   : > { %v6868_v51 = vadd.f32 %v3539_v6, %v6723_v24  ;;  %v6881_v18 = vadd.f32 %v3540_v53, %v6725_v25  ;;  %v3543_v25 = vld [vmem:[%s7383_s2 + $0x16] ss:$0 sm:$0xff] }
 0x221   : > { %v4619_v27 = vpop.f32.mrf.mxu0  ;;  %v4654_v28 = vpop.f32.mrf.mxu1 }
 0x222   : > { %v2496_v27 = vsel %vm2475_vm1, %v6820_v17, -inf  ;;  %v2501_v28 = vmax.f32 %v2494_v26, %v2499_v20  ;;  %v2508_v1 = vsel %vm2475_vm1, %v6868_v51, -inf  ;;  %v2510_v4 = vsel %vm2475_vm1, %v6881_v18, -inf }
 0x224   : > { %v2503_v36 = vmax.f32 %v2496_v27, %v2501_v28 }
 0x226   : > { %v2505_v58 = vmax.f32 %v2498_v30, %v2503_v36 }
 0x228   : > { %v2507_v46 = vmax.f32 %v2500_v55, %v2505_v58 }
 0x22a   : > { %v2509_v0 = vmax.f32 %v2502_v48, %v2507_v46 }
 0x22c   : > { %v2511_v52 = vmax.f32 %v2504_v59, %v2509_v0 }
 0x22e   : > { %v2513_v24 = vmax.f32 %v2506_v56, %v2511_v52 }
 0x230   : > { %v2515_v2 = vmax.f32 %v2508_v1, %v2513_v24 }
 0x232   : > { %v2520_v11 = vmax.f32 %v2510_v4, %v2515_v2 }
 0x241   : > { %v2261_v15 = vpop.f32.mrf.mxu0  ;;  %v2331_v16 = vpop.f32.mrf.mxu1 }
 0x242   : > { %v6883_v63 = vadd.f32 %v3541_v44, %v2261_v15  ;;  %v6892_v60 = vadd.f32 %v3542_v3, %v2331_v16 }
 0x243   : > { %v4689_v22 = vpop.f32.mrf.mxu0  ;;  %v4724_v23 = vpop.f32.mrf.mxu1 }
 0x244   : > { %v2512_v19 = vsel %vm2475_vm1, %v6883_v63, -inf  ;;  %v2514_v45 = vsel %vm2475_vm1, %v6892_v60, -inf }
 0x245   : > { %v2517_v12 = vmax.f32 %v2512_v19, %v2520_v11 }
 0x247   : > { %v2519_v16 = vmax.f32 %v2514_v45, %v2517_v12 }
 0x263   : > { %v2401_v61 = vpop.f32.mrf.mxu0  ;;  %v2471_v38 = vpop.f32.mrf.mxu1 }
 0x264   : > { %v6902_v15 = vadd.f32 %v3543_v25, %v2401_v61  ;;  %v6904_v20 = vadd.f32 %v3544_v13, %v2471_v38 }
 0x265   : > { %v4759_v21 = vpop.f32.mrf.mxu0  ;;  %v4794_v22 = vpop.f32.mrf.mxu1 }
 0x266   : > { %v2516_v23 = vsel %vm2475_vm1, %v6902_v15, -inf  ;;  %v2518_v26 = vsel %vm2475_vm1, %v6904_v20, -inf }
 0x267   : > { %v2521_v39 = vmax.f32 %v2516_v23, %v2519_v16 }
 0x269   : > { %v6910_v27 = vmax.f32 %v2518_v26, %v2521_v39 }
 0x26b   : > { %v2523_v28 = vsub.f32 %v6732_v29, %v6910_v27  ;;  %v2524_v36 = vsub.f32 %v6735_v32, %v6910_v27  ;;  %v2525_v37 = vsub.f32 %v6738_v34, %v6910_v27  ;;  %v2526_v30 = vsub.f32 %v6753_v5, %v6910_v27 }
 0x26c   : > { %v2527_v31 = vsub.f32 %v6756_v41, %v6910_v27  ;;  %v2528_v46 = vsub.f32 %v6769_v49, %v6910_v27  ;;  %v2529_v6 = vsub.f32 %v6772_v50, %v6910_v27  ;;  %v2530_v0 = vsub.f32 %v6785_v57, %v6910_v27 }
 0x26d   : > { %v2547_v55 = vmul.f32 1.442695, %v2523_v28  ;;  %v2549_v58 = vmul.f32 1.442695, %v2524_v36  ;;  %v2551_v47 = vmul.f32 1.442695, %v2525_v37  ;;  %v2531_v53 = vsub.f32 %v6788_v62, %v6910_v27 }
 0x26e   : > { %v2553_v48 = vmul.f32 1.442695, %v2526_v30  ;;  %v2555_v59 = vmul.f32 1.442695, %v2527_v31  ;;  %v2557_v52 = vmul.f32 1.442695, %v2528_v46  ;;  %v2532_v44 = vsub.f32 %v6801_v10, %v6910_v27 }
 0x26f   : > { %4815 = vpow2.f32 %v2547_v55  ;;  %v2559_v56 = vmul.f32 1.442695, %v2529_v6  ;;  %v2561_v1 = vmul.f32 1.442695, %v2530_v0  ;;  %v2533_v24 = vsub.f32 %v6804_v33, %v6910_v27 }
 0x270   : > { %4817 = vpow2.f32 %v2549_v58  ;;  %v2563_v2 = vmul.f32 1.442695, %v2531_v53  ;;  %v2534_v3 = vsub.f32 %v6817_v14, %v6910_v27  ;;  %v2565_v4 = vmul.f32 1.442695, %v2532_v44 }
 0x271   : > { %4819 = vpow2.f32 %v2551_v47  ;;  %v2535_v11 = vsub.f32 %v6820_v17, %v6910_v27  ;;  %v2567_v12 = vmul.f32 1.442695, %v2533_v24  ;;  %v2536_v61 = vsub.f32 %v6833_v54, %v6910_v27 }
 0x272   : > { %4821 = vpow2.f32 %v2553_v48  ;;  %v2569_v38 = vmul.f32 1.442695, %v2534_v3  ;;  %v2537_v23 = vsub.f32 %v6836_v35, %v6910_v27  ;;  %v2538_v37 = vsub.f32 %v6849_v40, %v6910_v27 }
 0x273   : > { %4823 = vpow2.f32 %v2555_v59  ;;  %v2571_v26 = vmul.f32 1.442695, %v2535_v11  ;;  %v2573_v30 = vmul.f32 1.442695, %v2536_v61  ;;  %v2539_v46 = vsub.f32 %v6852_v42, %v6910_v27 }
 0x274   : > { %4825 = vpow2.f32 %v2557_v52  ;;  %v2575_v47 = vmul.f32 1.442695, %v2537_v23  ;;  %v2540_v0 = vsub.f32 %v6865_v43, %v6910_v27  ;;  %v2577_v52 = vmul.f32 1.442695, %v2538_v37 }
 0x275   : > { %4827 = vpow2.f32 %v2559_v56  ;;  %v2579_v24 = vmul.f32 1.442695, %v2539_v46  ;;  %v2542_v11 = vsub.f32 %v6881_v18, %v6910_v27  ;;  %v2545_v46 = vsub.f32 %v6902_v15, %v6910_v27 }
 0x276   : > { %4829 = vpow2.f32 %v2561_v1  ;;  %v2541_v1 = vsub.f32 %v6868_v51, %v6910_v27 }
 0x277   : > { %4831 = vpow2.f32 %v2563_v2  ;;  %v2585_v37 = vmul.f32 1.442695, %v2542_v11 }
 0x278   : > { %4833 = vpow2.f32 %v2565_v4 }
 0x279   : > { %4835 = vpow2.f32 %v2567_v12  ;;  %v2581_v12 = vmul.f32 1.442695, %v2540_v0 }
 0x27a   : > { %4837 = vpow2.f32 %v2569_v38 }
 0x27b   : > { %4839 = vpow2.f32 %v2571_v26 }
 0x27c   : > { %v6936_v19 = vpop.eup %4815  ;;  %4841 = vpow2.f32 %v2573_v30 }
 0x27d   : > { %v6940_v25 = vpop.eup %4817  ;;  %v2595_v13 = vsel %vm2475_vm1, %v6936_v19, 0.0  ;;  %4843 = vpow2.f32 %v2575_v47 }
 0x27e   : > { %v6944_v45 = vpop.eup %4819  ;;  %v2596_v16 = vsel %vm2475_vm1, %v6940_v25, 0.0  ;;  %4845 = vpow2.f32 %v2577_v52  ;;  %v2546_v52 = vsub.f32 %v6904_v20, %v6910_v27 }
 0x27f   : > { %v6950_v21 = vpop.eup %4821  ;;  %v2597_v22 = vadd.f32 %v2596_v16, %v2595_v13  ;;  %v2598_v39 = vsel %vm2475_vm1, %v6944_v45, 0.0  ;;  %v2543_v16 = vsub.f32 %v6883_v63, %v6910_v27  ;;  %4847 = vpow2.f32 %v2579_v24 }
 0x280   : > { %v6956_v28 = vpop.eup %4823  ;;  %v2600_v31 = vsel %vm2475_vm1, %v6950_v21, 0.0  ;;  %4849 = vpow2.f32 %v2581_v12 }
 0x281   : > { %v2599_v36 = vadd.f32 %v2598_v39, %v2597_v22  ;;  %v6962_v55 = vpop.eup %4825  ;;  %v2602_v48 = vsel %vm2475_vm1, %v6956_v28, 0.0  ;;  %v2583_v22 = vmul.f32 1.442695, %v2541_v1  ;;  %v2587_v47 = vmul.f32 1.442695, %v2543_v16 }
 0x282   : > { %v6968_v6 = vpop.eup %4827  ;;  %v2604_v53 = vsel %vm2475_vm1, %v6962_v55, 0.0 }
 0x283   : > { %v2601_v58 = vadd.f32 %v2600_v31, %v2599_v36  ;;  %v6974_v56 = vpop.eup %4829  ;;  %v2606_v2 = vsel %vm2475_vm1, %v6968_v6, 0.0  ;;  %v2544_v36 = vsub.f32 %v6892_v60, %v6910_v27  ;;  %4851 = vpow2.f32 %v2583_v22 }
 0x284   : > { %v6980_v3 = vpop.eup %4831  ;;  %v2608_v13 = vsel %vm2475_vm1, %v6974_v56, 0.0  ;;  %4853 = vpow2.f32 %v2585_v37 }
 0x285   : > { %v2603_v59 = vadd.f32 %v2602_v48, %v2601_v58  ;;  %v6986_v61 = vpop.eup %4833  ;;  %v2610_v23 = vsel %vm2475_vm1, %v6980_v3, 0.0  ;;  %4855 = vpow2.f32 %v2587_v47 }
 0x286   : > { %v6992_v26 = vpop.eup %4835  ;;  %v2612_v30 = vsel %vm2475_vm1, %v6986_v61, 0.0 }
 0x287   : > { %v2605_v44 = vadd.f32 %v2604_v53, %v2603_v59  ;;  %v6998_v31 = vpop.eup %4837  ;;  %v2614_v48 = vsel %vm2475_vm1, %v6992_v26, 0.0  ;;  %v2589_v53 = vmul.f32 1.442695, %v2544_v36 }
 0x288   : > { %v7004_v59 = vpop.eup %4839 }
 0x289   : > { %v2607_v4 = vadd.f32 %v2606_v2, %v2605_v44  ;;  %v2616_v44 = vsel %vm2475_vm1, %v6998_v31, 0.0  ;;  %v7010_v1 = vpop.eup %4841  ;;  %v2591_v2 = vmul.f32 1.442695, %v2545_v46  ;;  %4857 = vpow2.f32 %v2589_v53 }
 0x28a   : > { %v7014_v11 = vpop.eup %4843  ;;  %v2620_v27 = vsel %vm2475_vm1, %v7010_v1, 0.0 }
 0x28b   : > { %v2609_v38 = vadd.f32 %v2608_v13, %v2607_v4  ;;  %v2618_v4 = vsel %vm2475_vm1, %v7004_v59, 0.0  ;;  %v2593_v13 = vmul.f32 1.442695, %v2546_v52  ;;  %4859 = vpow2.f32 %v2591_v2 }
 0x28c   : > { %v2622_v22 = vsel %vm2475_vm1, %v7014_v11, 0.0 }
 0x28d   : > { %v2611_v39 = vadd.f32 %v2610_v23, %v2609_v38  ;;  %v7018_v38 = vpop.eup %4845  ;;  %4861 = vpow2.f32 %v2593_v13 }
 0x28e   : > { %v4848_v23 = vpop.eup %4847  ;;  %v2624_v36 = vsel %vm2475_vm1, %v7018_v38, 0.0 }
 0x28f   : > { %v2613_v58 = vadd.f32 %v2612_v30, %v2611_v39  ;;  %v4850_v37 = vpop.eup %4849 }
 0x290   : > { %v4852_v46 = vpop.eup %4851 }
 0x291   : > { %v2615_v0 = vadd.f32 %v2614_v48, %v2613_v58  ;;  %v2626_v58 = vsel %vm2475_vm1, %v4848_v23, 0.0  ;;  %v2628_v48 = vsel %vm2475_vm1, %v4850_v37, 0.0  ;;  %v2630_v53 = vsel %vm2475_vm1, %v4852_v46, 0.0 }
 0x293   : > { %v2617_v24 = vadd.f32 %v2616_v44, %v2615_v0  ;;  %v4854_v0 = vpop.eup %4853 }
 0x294   : > { %v4856_v44 = vpop.eup %4855  ;;  %v2632_v2 = vsel %vm2475_vm1, %v4854_v0, 0.0 }
 0x295   : > { %v2619_v12 = vadd.f32 %v2618_v4, %v2617_v24  ;;  %v2634_v13 = vsel %vm2475_vm1, %v4856_v44, 0.0 }
 0x296   : > { %v4858_v4 = vpop.eup %4857 }
 0x297   : > { %v2621_v16 = vadd.f32 %v2620_v27, %v2619_v12 }
 0x298   : > { %v4860_v27 = vpop.eup %4859 }
 0x299   : > { %v2623_v39 = vadd.f32 %v2622_v22, %v2621_v16  ;;  %v2636_v22 = vsel %vm2475_vm1, %v4858_v4, 0.0 }
 0x29b   : > { %v2625_v30 = vadd.f32 %v2624_v36, %v2623_v39  ;;  %v4862_v39 = vpop.eup %4861 }
 0x29d   : > { %v2627_v47 = vadd.f32 %v2626_v58, %v2625_v30  ;;  %v2638_v30 = vsel %vm2475_vm1, %v4860_v27, 0.0 }
 0x29f   : > { %v2629_v52 = vadd.f32 %v2628_v48, %v2627_v47  ;;  %v2640_v47 = vsel %vm2475_vm1, %v4862_v39, 0.0 }
 0x2a1   : > { %v2631_v24 = vadd.f32 %v2630_v53, %v2629_v52 }
 0x2a3   : > { %v2633_v12 = vadd.f32 %v2632_v2, %v2631_v24 }
 0x2a5   : > { %v2635_v16 = vadd.f32 %v2634_v13, %v2633_v12 }
 0x2a7   : > { %v2637_v36 = vadd.f32 %v2636_v22, %v2635_v16 }
 0x2a9   : > { %v2639_v58 = vadd.f32 %v2638_v30, %v2637_v36  ;;  %v7066_v36 = vpop.permute.xlu0 %3033  ;;  %v3272_v30 = vld [vmem:[%s7385_s4 + $0x8] sm:$0xff] }
 0x2ab   : > { %v2641_v48 = vadd.f32 %v2640_v47, %v2639_v58  ;;  %v7074_v58 = vpop.permute.xlu1 %3049 }
 0x2ad   : > { %4863 = vrcp.f32 %v2641_v48 }
 0x2af   : > { %v7081_v47 = vpop.permute.xlu1 %3035 }
 0x2ba   : > { %v4864_v52 = vpop.eup %4863 }
 0x2bb   : > { %v2660_v53 = vmul.f32 %v4864_v52, %v4850_v37  ;;  %v2644_v40 = vmul.f32 %v4864_v52, %v6940_v25  ;;  %v2645_v24 = vmul.f32 %v4864_v52, %v6944_v45  ;;  %v2652_v2 = vmul.f32 %v4864_v52, %v6986_v61 }
 0x2bc   : > { %v2661_v12 = vmul.f32 %v4864_v52, %v4852_v46  ;;  %v2653_v13 = vmul.f32 %v4864_v52, %v6992_v26  ;;  %v2646_v16 = vmul.f32 %v4864_v52, %v6950_v21  ;;  %v2643_v22 = vmul.f32 %v4864_v52, %v6936_v19 }
 0x2bd   : > { %2754 = vperm.xlu1 %4814, %v2660_v53   ;;  %2674 = vperm.xlu0 %4813, %v2644_v40   ;;  %v2654_v25 = vmul.f32 %v4864_v52, %v6998_v31  ;;  %v2651_v40 = vmul.f32 %v4864_v52, %v6980_v3  ;;  %v2662_v45 = vmul.f32 %v4864_v52, %v4854_v0 }
 0x2be   : > { %v2659_v61 = vmul.f32 %v4864_v52, %v4848_v23  ;;  %v2655_v26 = vmul.f32 %v4864_v52, %v7004_v59  ;;  %v2647_v37 = vmul.f32 %v4864_v52, %v6956_v28  ;;  %v2648_v19 = vmul.f32 %v4864_v52, %v6962_v55 }
 0x2bf   : > { %v2663_v21 = vmul.f32 %v4864_v52, %v4856_v44  ;;  %v2664_v31 = vmul.f32 %v4864_v52, %v4858_v4  ;;  %v2656_v3 = vmul.f32 %v4864_v52, %v7010_v1  ;;  %v2657_v23 = vmul.f32 %v4864_v52, %v7014_v11 }
 0x2c0   : > { %v2649_v46 = vmul.f32 %v4864_v52, %v6968_v6  ;;  %v2650_v28 = vmul.f32 %v4864_v52, %v6974_v56  ;;  %v2665_v59 = vmul.f32 %v4864_v52, %v4860_v27  ;;  %v2666_v55 = vmul.f32 %v4864_v52, %v4862_v39 }
 0x2c1   : > { %2679 = vperm.xlu1 %4814, %v2645_v24   ;;  %2714 = vperm.xlu0 %4813, %v2652_v2   ;;  %v2658_v0 = vmul.f32 %v4864_v52, %v7018_v38  ;;  %v3014_v1 = vrot.slane %v6682_v7, 5  ;;  %v3021_v44 = vrot.slane %v6684_v8, 5  ;;  %v3028_v6 = vrot.slane %v6686_v9, 5  ;;  %v7085_v52 = vpop.permute.xlu1 %3067 }
 0x2c2   : > { %v3015_v56 = vrot.slane %v6682_v7, 6  ;;  %v3022_v11 = vrot.slane %v6684_v8, 6  ;;  %v3029_v38 = vrot.slane %v6686_v9, 6  ;;  %v3016_v4 = vrot.slane %v6682_v7, 7  ;;  %v3271_v7 = vld [vmem:[%s7385_s4] sm:$0xff] }
 0x2c3   : > { %v3023_v27 = vrot.slane %v6684_v8, 7  ;;  %v3030_v39 = vrot.slane %v6686_v9, 7  ;;  %v7076_v8 = vpop.permute.xlu0 %3065  ;;  %v3273_v9 = vld [vmem:[%s7385_s4 + $0x10] sm:$0xff] }
 0x2c5   : > { %2759 = vperm.xlu1 %4814, %v2661_v12   ;;  %2719 = vperm.xlu0 %4813, %v2653_v13   ;;  %v7089_v24 = vpop.permute.xlu1 %3037 }
 0x2c7   : > { %v7083_v48 = vpop.permute.xlu0 %3051 }
 0x2c9   : > { %2684 = vperm.xlu1 %4814, %v2646_v16   ;;  %2669 = vperm.xlu0 %4813, %v2643_v22   ;;  %v7093_v12 = vpop.permute.xlu1 %3053 }
 0x2cb   : > { %v7087_v53 = vpop.permute.xlu0 %3031 }
 0x2cd   : > { %2724 = vperm.xlu1 %4814, %v2654_v25   ;;  %2709 = vperm.xlu0 %4813, %v2651_v40   ;;  %v7097_v16 = vpop.permute.xlu1 %3069 }
 0x2cf   : > { %v7091_v2 = vpop.permute.xlu0 %3047 }
 0x2d1   : > { %2764 = vperm.xlu1 %4814, %v2662_v45   ;;  %2749 = vperm.xlu0 %4813, %v2659_v61   ;;  %v7101_v25 = vpop.permute.xlu1 %3055 }
 0x2d3   : > { %v7095_v13 = vpop.permute.xlu0 %3063 }
 0x2d5   : > { %2729 = vperm.xlu1 %4814, %v2655_v26   ;;  %2689 = vperm.xlu0 %4813, %v2647_v37  }
 0x2d7   : > { %v7099_v22 = vpop.permute.xlu0 %3039 }
 0x2d9   : > { %2694 = vperm.xlu1 %4814, %v2648_v19   ;;  %2769 = vperm.xlu0 %4813, %v2663_v21  }
 0x2db   : > { %v7103_v40 = vpop.permute.xlu0 %3071 }
 0x2dd   : > { %2774 = vperm.xlu1 %4814, %v2664_v31   ;;  %2734 = vperm.xlu0 %4813, %v2656_v3  }
 0x2e1   : > { %2739 = vperm.xlu1 %4814, %v2657_v23   ;;  %2699 = vperm.xlu0 %4813, %v2649_v46  }
 0x2e5   : > { %2704 = vperm.xlu1 %4814, %v2650_v28   ;;  %2779 = vperm.xlu0 %4813, %v2665_v59  }
 0x2e9   : > { %2784 = vperm.xlu1 %4814, %v2666_v55   ;;  %2744 = vperm.xlu0 %4813, %v2658_v0  }
 0x2ed   : > { %3041 = vrot.lane.b32.xlu1 %v3014_v1, %s4974_s22  ;;  %3057 = vrot.lane.b32.xlu0 %v3021_v44, %s4974_s22 }
 0x2f1   : > { %3073 = vrot.lane.b32.xlu1 %v3028_v6, %s4974_s22  ;;  %3043 = vrot.lane.b32.xlu0 %v3015_v56, %s4974_s22 }
 0x2f5   : > { %3059 = vrot.lane.b32.xlu1 %v3022_v11, %s4974_s22  ;;  %3075 = vrot.lane.b32.xlu0 %v3029_v38, %s4974_s22 }
 0x2f9   : > { %3045 = vrot.lane.b32.xlu1 %v3016_v4, %s4974_s22  ;;  %3061 = vrot.lane.b32.xlu0 %v3023_v27, %s4974_s22 }
 0x2fd   : > { %3077 = vrot.lane.b32.xlu1 %v3030_v39, %s4974_s22  ;;  %3413 = vrot.lane.b32.xlu0 %v3271_v7, %s4975_s6  ;;  %s4976_s22 = smov 1  }
 0x301   : > { %3415 = vrot.lane.b32.xlu1 %v3272_v30, %s4975_s6  ;;  %3417 = vrot.lane.b32.xlu0 %v3273_v9, %s4975_s6 }
 0x338   : > { %v2755_v45 = vpop.permute.xlu1 %2754  ;;  %v2675_v61 = vpop.permute.xlu0 %2674 }
 0x339   : > { %v2804_v26 = vmul.f32 %v2755_v45, %v6865_v43  ;;  %v2788_v37 = vmul.f32 %v2675_v61, %v6735_v32 }
 0x33b   : > { %v2931_v19 = vsel %vm2811_vm2, %v2804_v26, 0.0  ;;  %v2819_v21 = vsel %vm2811_vm2, %v2788_v37, 0.0 }
 0x33c   : > { %v2932_v31 = vrot.slane %v2931_v19, 4  ;;  %v2820_v3 = vrot.slane %v2819_v21, 4  ;;  %v2680_v23 = vpop.permute.xlu1 %2679  ;;  %v2715_v46 = vpop.permute.xlu0 %2714 }
 0x33d   : > { %v2789_v28 = vmul.f32 %v2680_v23, %v6738_v34  ;;  %v2796_v59 = vmul.f32 %v2715_v46, %v6801_v10 }
 0x33e   : > { %v2933_v55 = vadd.f32 %v2932_v31, %v2931_v19  ;;  %v2821_v0 = vadd.f32 %v2820_v3, %v2819_v21 }
 0x33f   : > { %v2826_v1 = vsel %vm2811_vm2, %v2789_v28, 0.0  ;;  %v2875_v43 = vsel %vm2811_vm2, %v2796_v59, 0.0 }
 0x340   : > { %v2934_v44 = vrot.slane %v2933_v55, 2  ;;  %v2822_v32 = vrot.slane %v2821_v0, 2  ;;  %v2827_v6 = vrot.slane %v2826_v1, 4  ;;  %v2876_v56 = vrot.slane %v2875_v43, 4  ;;  %v2760_v11 = vpop.permute.xlu1 %2759  ;;  %v2720_v38 = vpop.permute.xlu0 %2719 }
 0x341   : > { %v2805_v4 = vmul.f32 %v2760_v11, %v6868_v51  ;;  %v2797_v27 = vmul.f32 %v2720_v38, %v6804_v33 }
 0x342   : > { %v2935_v39 = vadd.f32 %v2934_v44, %v2933_v55  ;;  %v2823_v34 = vadd.f32 %v2822_v32, %v2821_v0  ;;  %v2828_v30 = vadd.f32 %v2827_v6, %v2826_v1  ;;  %v2877_v10 = vadd.f32 %v2876_v56, %v2875_v43 }
 0x343   : > { %v2938_v7 = vsel %vm2811_vm2, %v2805_v4, 0.0  ;;  %v2882_v9 = vsel %vm2811_vm2, %v2797_v27, 0.0 }
 0x344   : > { %v2936_v45 = vrot.slane %v2935_v39, 1  ;;  %v2824_v61 = vrot.slane %v2823_v34, 1  ;;  %v2829_v26 = vrot.slane %v2828_v30, 2  ;;  %v2878_v37 = vrot.slane %v2877_v10, 2  ;;  %v2685_v19 = vpop.permute.xlu1 %2684  ;;  %v2670_v21 = vpop.permute.xlu0 %2669 }
 0x345   : > { %v2939_v31 = vrot.slane %v2938_v7, 4  ;;  %v2883_v3 = vrot.slane %v2882_v9, 4  ;;  %v2790_v51 = vmul.f32 %v2685_v19, %v6753_v5  ;;  %v2787_v33 = vmul.f32 %v2670_v21, %v6732_v29 }
 0x346   : > { %v7119_v23 = vadd.f32 %v2936_v45, %v2935_v39  ;;  %v7121_v46 = vadd.f32 %v2824_v61, %v2823_v34  ;;  %v2830_v28 = vadd.f32 %v2829_v26, %v2828_v30  ;;  %v2879_v59 = vadd.f32 %v2878_v37, %v2877_v10 }
 0x347   : > { %v2940_v55 = vadd.f32 %v2939_v31, %v2938_v7  ;;  %v2884_v0 = vadd.f32 %v2883_v3, %v2882_v9  ;;  %v2833_v1 = vsel %vm2811_vm2, %v2790_v51, 0.0  ;;  %v2812_v43 = vsel %vm2811_vm2, %v2787_v33, 0.0 }
 0x348   : > { %v3120_v44 = vadd.f32 %v7076_v8, %v7119_v23  ;;  %v3104_v5 = vadd.f32 %v7066_v36, %v7121_v46  ;;  %v2831_v32 = vrot.slane %v2830_v28, 1  ;;  %v2880_v29 = vrot.slane %v2879_v59, 1  ;;  %v2725_v11 = vpop.permute.xlu1 %2724  ;;  %v2710_v61 = vpop.permute.xlu0 %2709 }
 0x349   : > { %v2941_v6 = vrot.slane %v2940_v55, 2  ;;  %v2885_v56 = vrot.slane %v2884_v0, 2  ;;  %v2834_v27 = vrot.slane %v2833_v1, 4  ;;  %v2813_v39 = vrot.slane %v2812_v43, 4 }
 0x34a   : > { %v3144_v38 = vsub.f32 0.0, %v3120_v44  ;;  %v3128_v4 = vsub.f32 0.0, %v3104_v5  ;;  %v7129_v34 = vadd.f32 %v2831_v32, %v2830_v28  ;;  %v7131_v30 = vadd.f32 %v2880_v29, %v2879_v59 }
 0x34b   : > { %v2942_v10 = vadd.f32 %v2941_v6, %v2940_v55  ;;  %v2886_v7 = vadd.f32 %v2885_v56, %v2884_v0  ;;  %v2835_v9 = vadd.f32 %v2834_v27, %v2833_v1  ;;  %v2814_v8 = vadd.f32 %v2813_v39, %v2812_v43 }
 0x34c   : > { %v3105_v36 = vadd.f32 %v7081_v47, %v7129_v34  ;;  %v3112_v45 = vadd.f32 %v7074_v58, %v7131_v30  ;;  %v3185_v26 = vmul.f32 1.442695, %v3144_v38  ;;  %v3153_v31 = vmul.f32 1.442695, %v3128_v4  ;;  %v2765_v28 = vpop.permute.xlu1 %2764  ;;  %v2750_v38 = vpop.permute.xlu0 %2749 }
 0x34d   : > { %v2943_v37 = vrot.slane %v2942_v10, 1  ;;  %v2887_v19 = vrot.slane %v2886_v7, 1  ;;  %v2836_v21 = vrot.slane %v2835_v9, 2  ;;  %v2815_v33 = vrot.slane %v2814_v8, 2 }
 0x34e   : > { %v3129_v3 = vsub.f32 0.0, %v3105_v36  ;;  %v3136_v51 = vsub.f32 0.0, %v3112_v45  ;;  %v2798_v47 = vmul.f32 %v2725_v11, %v6817_v14  ;;  %v2795_v58 = vmul.f32 %v2710_v61, %v6788_v62 }
 0x34f   : > { %v7137_v59 = vadd.f32 %v2943_v37, %v2942_v10  ;;  %v7139_v55 = vadd.f32 %v2887_v19, %v2886_v7  ;;  %v2837_v0 = vadd.f32 %v2836_v21, %v2835_v9  ;;  %v2816_v1 = vadd.f32 %v2815_v33, %v2814_v8 }
 0x350   : > { %4865 = vpow2.f32 %v3185_v26  ;;  %v3155_v43 = vmul.f32 1.442695, %v3129_v3  ;;  %v3169_v32 = vmul.f32 1.442695, %v3136_v51  ;;  %v2889_v56 = vsel %vm2811_vm2, %v2798_v47, 0.0  ;;  %v2730_v10 = vpop.permute.xlu1 %2729 }
 0x351   : > { %v3121_v44 = vadd.f32 %v7085_v52, %v7137_v59  ;;  %v3113_v5 = vadd.f32 %v7083_v48, %v7139_v55  ;;  %v2838_v29 = vrot.slane %v2837_v0, 1  ;;  %v2817_v6 = vrot.slane %v2816_v1, 1 }
 0x352   : > { %4867 = vpow2.f32 %v3153_v31  ;;  %v2890_v11 = vrot.slane %v2889_v56, 4  ;;  %v2868_v39 = vsel %vm2811_vm2, %v2795_v58, 0.0  ;;  %v2806_v52 = vmul.f32 %v2765_v28, %v6881_v18  ;;  %v2690_v18 = vpop.permute.xlu0 %2689 }
 0x353   : > { %v3145_v4 = vsub.f32 0.0, %v3121_v44  ;;  %v3137_v14 = vsub.f32 0.0, %v3113_v5  ;;  %v7148_v27 = vadd.f32 %v2838_v29, %v2837_v0  ;;  %v7150_v62 = vadd.f32 %v2817_v6, %v2816_v1 }
 0x354   : > { %4869 = vpow2.f32 %v3155_v43  ;;  %v2891_v7 = vadd.f32 %v2890_v11, %v2889_v56  ;;  %v2869_v9 = vrot.slane %v2868_v39, 4  ;;  %v2945_v26 = vsel %vm2811_vm2, %v2806_v52, 0.0 }
 0x355   : > { %v3187_v48 = vmul.f32 1.442695, %v3145_v4  ;;  %4871 = vpow2.f32 %v3169_v32  ;;  %v3171_v8 = vmul.f32 1.442695, %v3137_v14  ;;  %v3106_v36 = vadd.f32 %v7089_v24, %v7148_v27  ;;  %v7161_v24 = vpop.permute.xlu1 %2694 }
 0x356   : > { %v2892_v45 = vrot.slane %v2891_v7, 2  ;;  %v2870_v61 = vadd.f32 %v2869_v9, %v2868_v39  ;;  %v3103_v19 = vadd.f32 %v7087_v53, %v7150_v62  ;;  %v2946_v3 = vrot.slane %v2945_v26, 4  ;;  %v2770_v56 = vpop.permute.xlu0 %2769 }
 0x357   : > { %4873 = vpow2.f32 %v3187_v48  ;;  %v3130_v37 = vsub.f32 0.0, %v3106_v36  ;;  %v2803_v51 = vmul.f32 %v2750_v38, %v6852_v42  ;;  %v2799_v28 = vmul.f32 %v2730_v10, %v6820_v17 }
 0x358   : > { %v2893_v21 = vadd.f32 %v2892_v45, %v2891_v7  ;;  %v2871_v31 = vrot.slane %v2870_v61, 2  ;;  %4875 = vpow2.f32 %v3171_v8  ;;  %v2947_v1 = vadd.f32 %v2946_v3, %v2945_v26 }
 0x359   : > { %v3157_v33 = vmul.f32 1.442695, %v3130_v37  ;;  %v3127_v58 = vsub.f32 0.0, %v3103_v19  ;;  %v2924_v43 = vsel %vm2811_vm2, %v2803_v51, 0.0  ;;  %v2896_v53 = vsel %vm2811_vm2, %v2799_v28, 0.0  ;;  %v7174_v48 = vpop.permute.xlu1 %2774 }
 0x35a   : > { %v2894_v0 = vrot.slane %v2893_v21, 1  ;;  %v2872_v47 = vadd.f32 %v2871_v31, %v2870_v61  ;;  %v2791_v44 = vmul.f32 %v2690_v18, %v6756_v41  ;;  %v2948_v32 = vrot.slane %v2947_v1, 2  ;;  %v2735_v28 = vpop.permute.xlu0 %2734 }
 0x35b   : > { %4877 = vpow2.f32 %v3157_v33  ;;  %v2925_v6 = vrot.slane %v2924_v43, 4  ;;  %v2897_v17 = vrot.slane %v2896_v53, 4  ;;  %v2997_v38 = vmax.f32 %v7119_v23, 0.0 }
 0x35c   : > { %v7166_v5 = vadd.f32 %v2894_v0, %v2893_v21  ;;  %v2873_v42 = vrot.slane %v2872_v47, 1  ;;  %v2981_v4 = vmax.f32 %v7121_v46, 0.0  ;;  %v2949_v41 = vadd.f32 %v2948_v32, %v2947_v1 }
 0x35d   : > { %v4866_v29 = vpop.eup %4865  ;;  %v2926_v52 = vadd.f32 %v2925_v6, %v2924_v43  ;;  %v2898_v10 = vadd.f32 %v2897_v17, %v2896_v53  ;;  %v2982_v7 = vmax.f32 %v7129_v34, 0.0  ;;  %v2989_v9 = vmax.f32 %v7131_v30, 0.0 }
 0x35e   : > { %v3114_v14 = vadd.f32 %v7093_v12, %v7166_v5  ;;  %v7172_v39 = vadd.f32 %v2873_v42, %v2872_v47  ;;  %v3151_v8 = vmul.f32 1.442695, %v3127_v58  ;;  %v2840_v36 = vsel %vm2811_vm2, %v2791_v44, 0.0  ;;  %v2740_v42 = vpop.permute.xlu1 %2739 }
 0x35f   : > { %v4868_v11 = vpop.eup %4867  ;;  %v3216_v45 = vadd.f32 1.0, %v4866_v29  ;;  %v2950_v61 = vrot.slane %v2949_v41, 1  ;;  %v2927_v12 = vrot.slane %v2926_v52, 2  ;;  %v2899_v26 = vrot.slane %v2898_v10, 2 }
 0x360   : > { %v3200_v19 = vadd.f32 1.0, %v4868_v11  ;;  %v2998_v18 = vmax.f32 %v7137_v59, 0.0  ;;  %v2990_v21 = vmax.f32 %v7139_v55, 0.0  ;;  %v3138_v31 = vsub.f32 0.0, %v3114_v14 }
 0x361   : > { %v4870_v46 = vpop.eup %4869  ;;  %v3111_v3 = vadd.f32 %v7091_v2, %v7172_v39  ;;  %v2928_v51 = vadd.f32 %v2927_v12, %v2926_v52  ;;  %v2900_v30 = vadd.f32 %v2899_v26, %v2898_v10  ;;  %v2841_v33 = vrot.slane %v2840_v36, 4 }
 0x362   : > { %v4872_v37 = vpop.eup %4871  ;;  %v3201_v47 = vadd.f32 1.0, %v4870_v46  ;;  %v2983_v1 = vmax.f32 %v7148_v27, 0.0  ;;  %4879 = vpow2.f32 %v3151_v8  ;;  %v7184_v58 = vadd.f32 %v2950_v61, %v2949_v41  ;;  %v2700_v61 = vpop.permute.xlu0 %2699 }
 0x363   : > { %4881 = vrcp.f32 %v3216_v45  ;;  %v3208_v43 = vadd.f32 1.0, %v4872_v37  ;;  %v2980_v53 = vmax.f32 %v7150_v62, 0.0  ;;  %v2929_v44 = vrot.slane %v2928_v51, 1 }
 0x364   : > { %v4874_v0 = vpop.eup %4873  ;;  %4883 = vrcp.f32 %v3200_v19  ;;  %v3173_v2 = vmul.f32 1.442695, %v3138_v31  ;;  %v2901_v29 = vrot.slane %v2900_v30, 1  ;;  %v2842_v6 = vadd.f32 %v2841_v33, %v2840_v36  ;;  %v2705_v19 = vpop.permute.xlu1 %2704 }
 0x365   : > { %v4876_v32 = vpop.eup %4875  ;;  %v3217_v17 = vadd.f32 1.0, %v4874_v0  ;;  %v3135_v14 = vsub.f32 0.0, %v3111_v3  ;;  %v2930_v11 = vadd.f32 %v2929_v44, %v2928_v51  ;;  %v2792_v52 = vmul.f32 %v7161_v24, %v6769_v49 }
 0x366   : > { %4885 = vrcp.f32 %v3201_v47  ;;  %v3122_v41 = vadd.f32 %v7097_v16, %v7184_v58  ;;  %v7191_v10 = vadd.f32 %v2901_v29, %v2900_v30  ;;  %v2843_v62 = vrot.slane %v2842_v6, 2 }
 0x367   : > { %4887 = vrcp.f32 %v3208_v43  ;;  %v3209_v46 = vadd.f32 1.0, %v4876_v32  ;;  %v2988_v45 = vmax.f32 %v7172_v39, 0.0  ;;  %v2807_v36 = vmul.f32 %v2770_v56, %v6883_v63 }
 0x368   : > { %v4878_v8 = vpop.eup %4877  ;;  %v7196_v12 = vsel %vm3299_vm3, %v2981_v4, %v2980_v53  ;;  %4889 = vpow2.f32 %v3173_v2  ;;  %v3119_v49 = vadd.f32 %v7095_v13, %v2930_v11  ;;  %v2844_v24 = vadd.f32 %v2843_v62, %v2842_v6  ;;  %v2780_v53 = vpop.permute.xlu0 %2779 }
 0x369   : > { %4891 = vrcp.f32 %v3217_v17  ;;  %v3167_v26 = vmul.f32 1.442695, %v3135_v14  ;;  %v2847_v37 = vsel %vm2811_vm2, %v2792_v52, 0.0  ;;  %v3202_v31 = vadd.f32 1.0, %v4878_v8  ;;  %v2785_v17 = vpop.permute.xlu1 %2784 }
 0x36a   : > { %v3146_v3 = vsub.f32 0.0, %v3122_v41  ;;  %v3115_v63 = vadd.f32 %v7101_v25, %v7191_v10  ;;  %v2845_v56 = vrot.slane %v2844_v24, 1  ;;  %4893 = vrcp.f32 %v3209_v46 }
 0x36b   : > { %v7204_v4 = vsel %vm3299_vm3, %v2989_v9, %v2988_v45  ;;  %v2952_v13 = vsel %vm2811_vm2, %v2807_v36, 0.0  ;;  %v2808_v39 = vmul.f32 %v7174_v48, %v6892_v60  ;;  %v3143_v51 = vsub.f32 0.0, %v3119_v49 }
 0x36c   : > { %v7209_v30 = vadd.f32 %v2845_v56, %v2844_v24  ;;  %v2848_v33 = vrot.slane %v2847_v37, 4  ;;  %v2953_v0 = vrot.slane %v2952_v13, 4  ;;  %4895 = vpow2.f32 %v3167_v26 }
 0x36d   : > { %v2999_v47 = vmax.f32 %v7184_v58, 0.0  ;;  %v2996_v43 = vmax.f32 %v2930_v11, 0.0  ;;  %v2800_v25 = vmul.f32 %v2735_v28, %v6833_v54  ;;  %4897 = vrcp.f32 %v3202_v31 }
 0x36e   : > { %v3189_v9 = vmul.f32 1.442695, %v3146_v3  ;;  %v3139_v32 = vsub.f32 0.0, %v3115_v63  ;;  %v2954_v29 = vadd.f32 %v2953_v0, %v2952_v13  ;;  %v2959_v60 = vsel %vm2811_vm2, %v2808_v39, 0.0  ;;  %v3042_v13 = vpop.permute.xlu1 %3041 }
 0x36f   : > { %v4880_v2 = vpop.eup %4879  ;;  %v2903_v48 = vsel %vm2811_vm2, %v2800_v25, 0.0  ;;  %v2801_v6 = vmul.f32 %v2740_v42, %v6836_v35  ;;  %v3183_v11 = vmul.f32 1.442695, %v3143_v51  ;;  %v3107_v54 = vadd.f32 %v7099_v22, %v7209_v30 }
 0x370   : > { %v7217_v14 = vpop.eup %4881  ;;  %v2849_v28 = vadd.f32 %v2848_v33, %v2847_v37  ;;  %v2793_v52 = vmul.f32 %v2700_v61, %v6772_v50  ;;  %v7227_v62 = vsel %vm3299_vm3, %v2997_v38, %v2996_v43  ;;  %v2955_v8 = vrot.slane %v2954_v29, 2  ;;  %v2745_v38 = vpop.permute.xlu0 %2744  ;;  %v7389_v43 = vld [vmem:[#allocation2_spill] sm:$0xff] }
 0x371   : > { %v7222_v41 = vpop.eup %4883  ;;  %v2910_v35 = vsel %vm2811_vm2, %v2801_v6, 0.0  ;;  %v2794_v42 = vmul.f32 %v2705_v19, %v6785_v57  ;;  %v7231_v46 = vadd.f32 1.0, %v4880_v2  ;;  %4899 = vpow2.f32 %v3189_v9 }
 0x372   : > { %v2960_v45 = vrot.slane %v2959_v60, 4  ;;  %v2904_v22 = vrot.slane %v2903_v48, 4  ;;  %v2956_v50 = vadd.f32 %v2955_v8, %v2954_v29  ;;  %v2911_v61 = vrot.slane %v2910_v35, 4 }
 0x373   : > { %v7233_v36 = vpop.eup %4885  ;;  %v2854_v49 = vsel %vm2811_vm2, %v2793_v52, 0.0  ;;  %v2861_v23 = vsel %vm2811_vm2, %v2794_v42, 0.0  ;;  %4901 = vpow2.f32 %v3183_v11  ;;  %v3175_v26 = vmul.f32 1.442695, %v3139_v32 }
 0x374   : > { %v7237_v24 = vpop.eup %4887  ;;  %v3131_v37 = vsub.f32 0.0, %v3107_v54  ;;  %v2850_v57 = vrot.slane %v2849_v28, 2  ;;  %v2957_v31 = vrot.slane %v2956_v50, 1  ;;  %v2855_v3 = vrot.slane %v2854_v49, 4 }
 0x375   : > { %v4890_v19 = vpop.eup %4889  ;;  %v2862_v63 = vrot.slane %v2861_v23, 4  ;;  %v2809_v56 = vmul.f32 %v2780_v53, %v6902_v15  ;;  %v2961_v51 = vadd.f32 %v2960_v45, %v2959_v60  ;;  %v2905_v33 = vadd.f32 %v2904_v22, %v2903_v48  ;;  %v3058_v45 = vpop.permute.xlu0 %3057 }
 0x376   : > { %v7240_v39 = vpop.eup %4891  ;;  %v2810_v0 = vmul.f32 %v2785_v17, %v6904_v20  ;;  %v2802_v25 = vmul.f32 %v2745_v38, %v7389_v43  ;;  %v7244_v9 = vadd.f32 %v2957_v31, %v2956_v50  ;;  %v2912_v32 = vadd.f32 %v2911_v61, %v2910_v35  ;;  %v3074_v38 = vpop.permute.xlu1 %3073 }
 0x377   : > { %v2863_v2 = vadd.f32 %v2862_v63, %v2861_v23  ;;  %v2966_v29 = vsel %vm2811_vm2, %v2809_v56, 0.0  ;;  %v7247_v6 = vpop.eup %4893  ;;  %v2856_v11 = vadd.f32 %v2855_v3, %v2854_v49  ;;  %4903 = vpow2.f32 %v3175_v26 }
 0x378   : > { %v2967_v54 = vrot.slane %v2966_v29, 4  ;;  %v2973_v15 = vsel %vm2811_vm2, %v2810_v0, 0.0  ;;  %v2917_v53 = vsel %vm2811_vm2, %v2802_v25, 0.0  ;;  %v3159_v60 = vmul.f32 1.442695, %v3131_v37 }
 0x379   : > { %v3123_v20 = vadd.f32 %v7103_v40, %v7244_v9  ;;  %v2864_v48 = vrot.slane %v2863_v2, 2  ;;  %v4896_v17 = vpop.eup %4895  ;;  %v2906_v52 = vrot.slane %v2905_v33, 2  ;;  %v2974_v35 = vrot.slane %v2973_v15, 4 }
 0x37a   : > { %v2968_v8 = vadd.f32 %v2967_v54, %v2966_v29  ;;  %v2918_v42 = vrot.slane %v2917_v53, 4  ;;  %v7253_v22 = vpop.eup %4897  ;;  %v2962_v61 = vrot.slane %v2961_v51, 2  ;;  %v2851_v23 = vadd.f32 %v2850_v57, %v2849_v28 }
 0x37b   : > { %v3147_v50 = vsub.f32 0.0, %v3123_v20  ;;  %v2865_v49 = vadd.f32 %v2864_v48, %v2863_v2  ;;  %v2984_v26 = vmax.f32 %v7209_v30, 0.0  ;;  %v2913_v37 = vrot.slane %v2912_v32, 2 }
 0x37c   : > { %v2857_v31 = vrot.slane %v2856_v11, 2  ;;  %v2975_v3 = vadd.f32 %v2974_v35, %v2973_v15  ;;  %v7256_v40 = vadd.f32 1.0, %v4890_v19  ;;  %v7258_v63 = vadd.f32 1.0, %v4896_v17  ;;  %v3044_v17 = vpop.permute.xlu0 %3043 }
 0x37d   : > { %v2969_v56 = vrot.slane %v2968_v8, 2  ;;  %v2852_v0 = vrot.slane %v2851_v23, 1  ;;  %4905 = vpow2.f32 %v3159_v60  ;;  %v7260_v25 = vadd.f32 %v2918_v42, %v2917_v53  ;;  %v3060_v42 = vpop.permute.xlu1 %3059 }
 0x37e   : > { %v2976_v43 = vrot.slane %v2975_v3, 2  ;;  %v2907_v29 = vadd.f32 %v2906_v52, %v2905_v33  ;;  %v7262_v2 = vpop.eup %4899  ;;  %v3191_v28 = vmul.f32 1.442695, %v3147_v50  ;;  %v2866_v57 = vrot.slane %v2865_v49, 1 }
 0x37f   : > { %v7264_v54 = vadd.f32 %v2852_v0, %v2851_v23  ;;  %v2963_v20 = vadd.f32 %v2962_v61, %v2961_v51  ;;  %v2858_v48 = vadd.f32 %v2857_v31, %v2856_v11  ;;  %v2914_v35 = vadd.f32 %v2913_v37, %v2912_v32 }
 0x380   : > { %v2977_v19 = vadd.f32 %v2976_v43, %v2975_v3  ;;  %v2908_v15 = vrot.slane %v2907_v29, 1  ;;  %v7266_v60 = vpop.eup %4901  ;;  %v2970_v50 = vadd.f32 %v2969_v56, %v2968_v8  ;;  %v2920_v51 = vrot.slane %v7260_v25, 2  ;;  %v3076_v16 = vpop.permute.xlu0 %3075 }
 0x381   : > { %v3108_v33 = vadd.f32 %v3042_v13, %v7264_v54  ;;  %v2964_v52 = vrot.slane %v2963_v20, 1  ;;  %v2859_v3 = vrot.slane %v2858_v48, 1  ;;  %v2915_v37 = vrot.slane %v2914_v35, 1 }
 0x382   : > { %v2978_v23 = vrot.slane %v2977_v19, 1  ;;  %v7271_v61 = vadd.f32 %v2908_v15, %v2907_v29  ;;  %v2971_v31 = vrot.slane %v2970_v50, 1  ;;  %4907 = vpow2.f32 %v3191_v28 }
 0x383   : > { %v3132_v11 = vsub.f32 0.0, %v3108_v33  ;;  %v7273_v32 = vadd.f32 %v2964_v52, %v2963_v20  ;;  %v2867_v0 = vadd.f32 %v2866_v57, %v2865_v49  ;;  %v2985_v13 = vmax.f32 %v7264_v54, 0.0 }
 0x384   : > { %v3116_v8 = vadd.f32 %v3058_v45, %v7271_v61  ;;  %v7277_v56 = vadd.f32 %v2978_v23, %v2977_v19  ;;  %v2860_v15 = vadd.f32 %v2859_v3, %v2858_v48  ;;  %v7280_v44 = vpop.eup %4903  ;;  %v2993_v20 = vmax.f32 %v7271_v61, 0.0  ;;  %v3046_v45 = vpop.permute.xlu1 %3045 }
 0x385   : > { %v3161_v43 = vmul.f32 1.442695, %v3132_v11  ;;  %v3124_v29 = vadd.f32 %v3074_v38, %v7273_v32  ;;  %v2916_v52 = vadd.f32 %v2915_v37, %v2914_v35  ;;  %v2972_v53 = vadd.f32 %v2971_v31, %v2970_v50  ;;  %v3062_v30 = vpop.permute.xlu0 %3061 }
 0x386   : > { %v3140_v33 = vsub.f32 0.0, %v3116_v8  ;;  %v3001_v49 = vmax.f32 %v7273_v32, 0.0  ;;  %v3109_v57 = vadd.f32 %v3044_v17, %v2860_v15  ;;  %v2986_v19 = vmax.f32 %v2860_v15, 0.0 }
 0x387   : > { %4909 = vpow2.f32 %v3161_v43  ;;  %v3148_v28 = vsub.f32 0.0, %v3124_v29  ;;  %v3117_v23 = vadd.f32 %v3060_v42, %v2916_v52  ;;  %v2987_v11 = vmax.f32 %v2867_v0, 0.0 }
 0x388   : > { %v3177_v54 = vmul.f32 1.442695, %v3140_v33  ;;  %v3133_v38 = vsub.f32 0.0, %v3109_v57  ;;  %v2994_v48 = vmax.f32 %v2916_v52, 0.0  ;;  %v3125_v3 = vadd.f32 %v3076_v16, %v2972_v53  ;;  %v3078_v33 = vpop.permute.xlu1 %3077 }
 0x389   : > { %v3381_v35 = vsel %vm3302_vm4, %v2982_v7, %v7196_v12  ;;  %v3193_v50 = vmul.f32 1.442695, %v3148_v28  ;;  %v3141_v61 = vsub.f32 0.0, %v3117_v23  ;;  %v3110_v17 = vadd.f32 %v3046_v45, %v2867_v0 }
 0x38a   : > { %v3382_v32 = vsel %vm3305_vm5, %v2983_v1, %v3381_v35  ;;  %v4906_v37 = vpop.eup %4905  ;;  %4911 = vpow2.f32 %v3177_v54  ;;  %v3163_v31 = vmul.f32 1.442695, %v3133_v38  ;;  %v3149_v42 = vsub.f32 0.0, %v3125_v3 }
 0x38b   : > { %v3383_v16 = vsel %vm3308_vm6, %v2984_v26, %v3382_v32  ;;  %v3179_v8 = vmul.f32 1.442695, %v3141_v61  ;;  %v3134_v43 = vsub.f32 0.0, %v3110_v17  ;;  %v2921_v7 = vadd.f32 %v2920_v51, %v7260_v25 }
 0x38c   : > { %v3384_v34 = vsel %vm3311_vm7, %v2985_v13, %v3383_v16  ;;  %4913 = vpow2.f32 %v3163_v31  ;;  %v3002_v12 = vmax.f32 %v2972_v53, 0.0  ;;  %v3195_v27 = vmul.f32 1.442695, %v3149_v42 }
 0x38d   : > { %v3385_v1 = vsel %vm3314_vm8, %v2986_v19, %v3384_v34  ;;  %4915 = vpow2.f32 %v3193_v50  ;;  %v3165_v29 = vmul.f32 1.442695, %v3134_v43  ;;  %v2922_v15 = vrot.slane %v2921_v7, 1 }
 0x38e   : > { %v3386_v0 = vsel %vm3317_vm9, %v2987_v11, %v3385_v1  ;;  %4917 = vpow2.f32 %v3179_v8  ;;  %v3003_v26 = vmax.f32 %v7277_v56, 0.0  ;;  %v3395_v25 = vsel %vm3302_vm4, %v2998_v18, %v7227_v62 }
 0x38f   : > { %3401 = vrot.lane.b32.xlu1 %v3386_v0, %s4976_s22  ;;  %v3388_v53 = vsel %vm3302_vm4, %v2990_v21, %v7204_v4  ;;  %4919 = vpow2.f32 %v3195_v27  ;;  %v2923_v51 = vadd.f32 %v2922_v15, %v2921_v7  ;;  %v3396_v13 = vsel %vm3305_vm5, %v2999_v47, %v3395_v25  ;;  %v4908_v57 = vpop.eup %4907 }
 0x390   : > { %v7390_v52 = vmax.f32 %v7166_v5, 0.0  ;;  %4921 = vpow2.f32 %v3165_v29  ;;  %v7391_v59 = vmax.f32 %v7244_v9, 0.0  ;;  %v7392_v55 = vmax.f32 %v7191_v10, 0.0 }
 0x391   : > { %v3126_v4 = vadd.f32 %v3078_v33, %v7277_v56  ;;  %v2995_v62 = vmax.f32 %v2923_v51, 0.0  ;;  %v3118_v58 = vadd.f32 %v3062_v30, %v2923_v51  ;;  %v3218_v45 = vadd.f32 1.0, %v7262_v2 }
 0x392   : > { %v3389_v28 = vsel %vm3305_vm5, %v7390_v52, %v3388_v53  ;;  %v3397_v18 = vsel %vm3308_vm6, %v7391_v59, %v3396_v13  ;;  %4923 = vrcp.f32 %v7231_v46  ;;  %v3211_v3 = vadd.f32 1.0, %v7280_v44 }
 0x393   : > { %v3390_v21 = vsel %vm3308_vm6, %v7392_v55, %v3389_v28  ;;  %v3398_v47 = vsel %vm3311_vm7, %v3001_v49, %v3397_v18  ;;  %v3150_v19 = vsub.f32 0.0, %v3126_v4  ;;  %v3142_v10 = vsub.f32 0.0, %v3118_v58 }
 0x394   : > { %v3391_v5 = vsel %vm3311_vm7, %v2993_v20, %v3390_v21  ;;  %v3399_v54 = vsel %vm3314_vm8, %v3002_v12, %v3398_v47  ;;  %v4910_v23 = vpop.eup %4909  ;;  %4925 = vrcp.f32 %v7256_v40  ;;  %v3203_v20 = vadd.f32 1.0, %v4906_v37 }
 0x395   : > { %v3392_v9 = vsel %vm3314_vm8, %v2994_v48, %v3391_v5  ;;  %v7327_v11 = vsel %vm3317_vm9, %v3003_v26, %v3399_v54  ;;  %v3197_v2 = vmul.f32 1.442695, %v3150_v19  ;;  %4927 = vrcp.f32 %v7258_v63 }
 0x396   : > { %v7330_v56 = vsel %vm3317_vm9, %v2995_v62, %v3392_v9  ;;  %3405 = vrot.lane.b32.xlu1 %v7327_v11, %s4976_s22  ;;  %v3181_v49 = vmul.f32 1.442695, %v3142_v10  ;;  %4929 = vrcp.f32 %v3218_v45  ;;  %v3204_v46 = vadd.f32 1.0, %v4910_v23 }
 0x397   : > { %3403 = vrot.lane.b32.xlu0 %v7330_v56, %s4976_s22  ;;  %v4912_v38 = vpop.eup %4911  ;;  %v3215_v48 = vadd.f32 1.0, %v7266_v60  ;;  %v3219_v50 = vadd.f32 1.0, %v4908_v57  ;;  %v3298_v12 = vrot.slane %v7222_v41, 7  ;;  %v3301_v30 = vrot.slane %v7233_v36, 6 }
 0x398   : > { %4931 = vpow2.f32 %v3181_v49  ;;  %v3212_v32 = vadd.f32 1.0, %v4912_v38  ;;  %v3304_v25 = vrot.slane %v7253_v22, 5  ;;  %v3319_v57 = vrot.slane %v7237_v24, 7 }
 0x399   : > { %4933 = vpow2.f32 %v3197_v2  ;;  %v4914_v40 = vpop.eup %4913  ;;  %v3333_v55 = vrot.slane %v7217_v14, 7  ;;  %v3321_v5 = vrot.slane %v7247_v6, 6  ;;  %v3335_v14 = vrot.slane %v7240_v39, 6 }
 0x39a   : > { %3422 = vrot.lane.b32.xlu1 %v3386_v0, %s4977_s9  ;;  %4935 = vrcp.f32 %v3203_v20  ;;  %v4916_v35 = vpop.eup %4915  ;;  %v3205_v63 = vadd.f32 1.0, %v4914_v40 }
 0x39b   : > { %4937 = vrcp.f32 %v3204_v46  ;;  %v4918_v61 = vpop.eup %4917  ;;  %v3220_v60 = vadd.f32 1.0, %v4916_v35 }
 0x39c   : > { %4939 = vrcp.f32 %v3215_v48  ;;  %v4920_v17 = vpop.eup %4919  ;;  %v3213_v31 = vadd.f32 1.0, %v4918_v61 }
 0x39d   : > { %4941 = vrcp.f32 %v3205_v63  ;;  %v4922_v37 = vpop.eup %4921  ;;  %v3221_v16 = vadd.f32 1.0, %v4920_v17 }
 0x39e   : > { %4943 = vrcp.f32 %v3211_v3  ;;  %v3206_v42 = vadd.f32 1.0, %v4922_v37 }
 0x39f   : > { %4945 = vrcp.f32 %v3219_v50  ;;  %v4924_v8 = vpop.eup %4923 }
 0x3a0   : > { %4947 = vrcp.f32 %v3212_v32  ;;  %v3300_v15 = vsel %vm3299_vm3, %v3298_v12, %v4924_v8  ;;  %v3414_v12 = vpop.permute.xlu0 %3413 }
 0x3a1   : > { %4949 = vrcp.f32 %v3206_v42  ;;  %v4926_v44 = vpop.eup %4925  ;;  %v3303_v51 = vsel %vm3302_vm4, %v3301_v30, %v3300_v15 }
 0x3a2   : > { %4951 = vrcp.f32 %v3220_v60  ;;  %v4928_v34 = vpop.eup %4927  ;;  %v3306_v21 = vsel %vm3305_vm5, %v3304_v25, %v3303_v51  ;;  %v3323_v9 = vrot.slane %v4926_v44, 5  ;;  %v3416_v44 = vpop.permute.xlu1 %3415 }
 0x3a3   : > { %4953 = vrcp.f32 %v3213_v31  ;;  %v4930_v43 = vpop.eup %4929  ;;  %v3320_v22 = vsel %vm3299_vm3, %v3319_v57, %v4928_v34 }
 0x3a4   : > { %4955 = vrcp.f32 %v3221_v16  ;;  %v3322_v10 = vsel %vm3302_vm4, %v3321_v5, %v3320_v22  ;;  %v3337_v20 = vrot.slane %v4930_v43, 5 }
 0x3a5   : > { %v4932_v7 = vpop.eup %4931  ;;  %v3324_v40 = vsel %vm3305_vm5, %v3323_v9, %v3322_v10 }
 0x3a6   : > { %v4934_v27 = vpop.eup %4933  ;;  %v3214_v1 = vadd.f32 1.0, %v4932_v7 }
 0x3a7   : > { %v4936_v0 = vpop.eup %4935  ;;  %v3222_v29 = vadd.f32 1.0, %v4934_v27  ;;  %v3418_v27 = vpop.permute.xlu0 %3417 }
 0x3a8   : > { %v4938_v33 = vpop.eup %4937  ;;  %4957 = vrcp.f32 %v3214_v1  ;;  %v3307_v13 = vrot.slane %v4936_v0, 4 }
 0x3a9   : > { %v4940_v26 = vpop.eup %4939  ;;  %4959 = vrcp.f32 %v3222_v29  ;;  %v3310_v41 = vrot.slane %v4938_v33, 3 }
 0x3aa   : > { %v4942_v53 = vpop.eup %4941  ;;  %v3309_v4 = vsel %vm3308_vm6, %v3307_v13, %v3306_v21  ;;  %v3334_v45 = vsel %vm3299_vm3, %v3333_v55, %v4940_v26 }
 0x3ab   : > { %v4944_v52 = vpop.eup %4943  ;;  %v3313_v59 = vrot.slane %v4942_v53, 2  ;;  %v3312_v58 = vsel %vm3311_vm7, %v3310_v41, %v3309_v4  ;;  %v3336_v6 = vsel %vm3302_vm4, %v3335_v14, %v3334_v45 }
 0x3ac   : > { %v4946_v28 = vpop.eup %4945  ;;  %v3325_v2 = vrot.slane %v4944_v52, 4  ;;  %v3338_v50 = vsel %vm3305_vm5, %v3337_v20, %v3336_v6 }
 0x3ad   : > { %v4948_v18 = vpop.eup %4947  ;;  %v3315_v54 = vsel %vm3314_vm8, %v3313_v59, %v3312_v58  ;;  %v3339_v46 = vrot.slane %v4946_v28, 4 }
 0x3ae   : > { %v4950_v36 = vpop.eup %4949  ;;  %v3327_v49 = vrot.slane %v4948_v18, 3  ;;  %v3326_v39 = vsel %vm3308_vm6, %v3325_v2, %v3324_v40 }
 0x3af   : > { %v4952_v62 = vpop.eup %4951  ;;  %v3316_v47 = vrot.slane %v4950_v36, 1  ;;  %v3340_v17 = vsel %vm3308_vm6, %v3339_v46, %v3338_v50 }
 0x3b0   : > { %v4954_v24 = vpop.eup %4953  ;;  %v3341_v38 = vrot.slane %v4952_v62, 3  ;;  %v3328_v61 = vsel %vm3311_vm7, %v3327_v49, %v3326_v39 }
 0x3b1   : > { %v4956_v19 = vpop.eup %4955  ;;  %v3318_v23 = vsel %vm3317_vm9, %v3316_v47, %v3315_v54  ;;  %v3329_v48 = vrot.slane %v4954_v24, 2 }
 0x3b2   : > { %3347 = vrot.lane.b32.xlu0 %v3318_v23, %s4978_s10  ;;  %v3343_v3 = vrot.slane %v4956_v19, 2  ;;  %v3342_v60 = vsel %vm3311_vm7, %v3341_v38, %v3340_v17 }
 0x3b3   : > { %v3330_v37 = vsel %vm3314_vm8, %v3329_v48, %v3328_v61 }
 0x3b4   : > { %v3344_v16 = vsel %vm3314_vm8, %v3343_v3, %v3342_v60 }
 0x3b5   : > { %v4958_v35 = vpop.eup %4957 }
 0x3b6   : > { %v4960_v63 = vpop.eup %4959  ;;  %v3331_v32 = vrot.slane %v4958_v35, 1 }
 0x3b7   : > { %v3345_v31 = vrot.slane %v4960_v63, 1 }
 0x3b8   : > { %v3332_v42 = vsel %vm3317_vm9, %v3331_v32, %v3330_v37 }
 0x3b9   : > { %3349 = vrot.lane.b32.xlu1 %v3332_v42, %s4978_s10  ;;  %v3346_v8 = vsel %vm3317_vm9, %v3345_v31, %v3344_v16 }
 0x3ba   : > { %3351 = vrot.lane.b32.xlu0 %v3346_v8, %s4978_s10 }
 0x3bd   : > { %3426 = vrot.lane.b32.xlu1 %v7327_v11, %s4977_s9 }
 0x3be   : > { %3424 = vrot.lane.b32.xlu0 %v7330_v56, %s4977_s9 }
 0x401   : > { %v3402_v34 = vpop.permute.xlu1 %3401 }
 0x408   : > { %v3406_v43 = vpop.permute.xlu1 %3405 }
 0x409   : > { %v3404_v1 = vpop.permute.xlu0 %3403 }
 0x40c   : > { %v3423_v7 = vpop.permute.xlu1 %3422 }
 0x40d   : > { %3441 = vst.msk [vmem:[%s241_s15 + $0x8] sm:$0xff] %vm3440_vm10, %v3423_v7 }
 0x424   : > { %v3348_v11 = vpop.permute.xlu0 %3347 }
 0x425   : > { %v3432_v0 = vsel %vm3431_vm11, %v3348_v11, %v3402_v34 }
 0x426   : > { %v3436_v56 = vsel %vm3435_vm12, %v3432_v0, %v3414_v12 }
 0x427   : > { %3439 = vst [vmem:[%s241_s15] sm:$0xff] %v3436_v56 }
 0x42b   : > { %v3350_v29 = vpop.permute.xlu1 %3349 }
 0x42c   : > { %v3433_v15 = vsel %vm3431_vm11, %v3350_v29, %v3404_v1  ;;  %v3352_v33 = vpop.permute.xlu0 %3351 }
 0x42d   : > { %v3437_v30 = vsel %vm3435_vm12, %v3433_v15, %v3416_v44  ;;  %v3434_v26 = vsel %vm3431_vm11, %v3352_v33, %v3406_v43 }
 0x42e   : > { %3442 = vst [vmem:[%s241_s15 + $0x10] sm:$0xff] %v3437_v30  ;;  %v3438_v25 = vsel %vm3435_vm12, %v3434_v26, %v3418_v27 }
 0x42f   : > { %v3427_v53 = vpop.permute.xlu1 %3426  ;;  %3444 = vst [vmem:[%s241_s15 + $0x20] sm:$0xff] %v3438_v25 }
 0x430   : > { %3445 = vst.msk [vmem:[%s241_s15 + $0x28] sm:$0xff] %vm3440_vm10, %v3427_v53  ;;  %v3425_v51 = vpop.permute.xlu0 %3424 }
 0x431   : > { %3443 = vst.msk [vmem:[%s241_s15 + $0x18] sm:$0xff] %vm3440_vm10, %v3425_v51 }
 0x432 PF: > { %s15_s18 = sadd.s32 1, %s4969_s18  }
 0x433   : > { %p12_p4 = scmp.ge.s32.totalorder %s15_s18, 4  }
 0x435   :  { %14 = sbr.rel (!%p12_p4) target bundleno = 1 (0x1), region = 73 }

</bundles_post_ra>
